<compile_context>
chip_gen: v7x
topology: tpu7x:2x2x1
jax: 0.10.0
libtpu: 0.0.40
codegen_flags: <defaults>
</compile_context>

<pallas_src>
import functools

import jax
import jax.numpy as jnp
from jax.experimental import pallas as pl
from jax.experimental.pallas import tpu as pltpu


def _basic_block_kernel(x_ref, res_ref, w1_ref, s1_ref, b1_ref,
                        w2_ref, s2_ref, b2_ref, o_ref, h1p_ref,
                        *, tile_h, width, channels):
    # x_ref   : (1, 1, tile_h+4, W+2, C) bf16  zero-padded input row-tile (+halo)
    # res_ref : (1, tile_h, W, C) f32          residual rows (unpadded x)
    # w1_ref / w2_ref : (9*C, C) bf16          im2col conv weights
    # s*_ref / b*_ref : (1, C) f32             folded BN scale / bias
    # o_ref   : (1, tile_h, W, C)              output rows
    # h1p_ref : VMEM scratch (tile_h+2, W+2, C) bf16  padded conv2 input
    TH, W, C = tile_h, width, channels
    R1 = TH + 2                       # conv1 output rows (1-row halo each side)
    t = pl.program_id(1)
    nt = pl.num_programs(1)

    # ---- conv1: single im2col matmul (contraction 9*C), f32 accumulate ----
    taps1 = [x_ref[0, 0, ky:ky + R1, kx:kx + W, :]
             for ky in range(3) for kx in range(3)]
    p1 = jnp.concatenate(taps1, axis=-1)                      # (R1, W, 9C) bf16
    acc1 = jnp.einsum('rwk,ko->rwo', p1, w1_ref[...],
                      preferred_element_type=jnp.float32)     # (R1, W, C) f32

    # ---- bn1 + relu, written straight into the padded conv2 buffer ----
    h1 = jnp.maximum(acc1 * s1_ref[...] + b1_ref[...], 0.0)
    h1p_ref[:, 1:W + 1, :] = h1.astype(jnp.bfloat16)
    zcol = jnp.zeros((R1, 1, C), jnp.bfloat16)
    h1p_ref[:, 0:1, :] = zcol                                 # conv2 W padding
    h1p_ref[:, W + 1:W + 2, :] = zcol

    # Halo rows that fall outside the image are conv2's zero padding.
    @pl.when(t == 0)
    def _():
        h1p_ref[0:1, :, :] = jnp.zeros((1, W + 2, C), jnp.bfloat16)

    @pl.when(t == nt - 1)
    def _():
        h1p_ref[R1 - 1:R1, :, :] = jnp.zeros((1, W + 2, C), jnp.bfloat16)

    # ---- conv2: single im2col matmul ----
    taps2 = [h1p_ref[ky:ky + TH, kx:kx + W, :]
             for ky in range(3) for kx in range(3)]
    p2 = jnp.concatenate(taps2, axis=-1)                      # (TH, W, 9C) bf16
    acc2 = jnp.einsum('rwk,ko->rwo', p2, w2_ref[...],
                      preferred_element_type=jnp.float32)     # (TH, W, C) f32

    # ---- bn2 + residual add + relu ----
    h2 = acc2 * s2_ref[...] + b2_ref[...]
    o_ref[0] = jnp.maximum(h2 + res_ref[0], 0.0).astype(o_ref.dtype)


def fold_bn(gamma, beta, running_mean, running_var, eps=1e-5):
    scale = gamma / jnp.sqrt(running_var + eps)
    bias = beta - running_mean * scale
    return scale, bias


def basic_block(x_nhwc, w1_oihw, bn1, w2_oihw, bn2, *, tile_h=8):
    """x_nhwc: (N, H, W, C); w*_oihw: (C, C, 3, 3) in PyTorch layout."""
    N, H, W, C = x_nhwc.shape
    if H % tile_h != 0:
        tile_h = H                    # fall back to one row-tile per image
    n_tiles = H // tile_h

    # PyTorch (Cout, Cin, kH, kW) -> im2col matrix with rows (ky, kx, Cin).
    def to_im2col(w):
        return jnp.transpose(w, (2, 3, 1, 0)).reshape(9 * C, C).astype(jnp.bfloat16)

    w1 = to_im2col(w1_oihw)
    w2 = to_im2col(w2_oihw)
    s1, b1 = fold_bn(*bn1)
    s2, b2 = fold_bn(*bn2)
    s1, b1, s2, b2 = (v.astype(jnp.float32).reshape(1, C)
                      for v in (s1, b1, s2, b2))

    # bf16 conv operand, zero-padded by 2 rows / 1 column per side, cut into
    # overlapping row tiles with a 2-row halo so conv1+conv2 fuse per tile.
    x_pad = jnp.pad(x_nhwc.astype(jnp.bfloat16),
                    ((0, 0), (2, 2), (1, 1), (0, 0)))
    x_halo = jnp.stack(
        [x_pad[:, t * tile_h: t * tile_h + tile_h + 4] for t in range(n_tiles)],
        axis=1)                       # (N, n_tiles, tile_h+4, W+2, C)

    kernel = functools.partial(_basic_block_kernel,
                               tile_h=tile_h, width=W, channels=C)

    grid_spec = pltpu.PrefetchScalarGridSpec(
        num_scalar_prefetch=0,
        grid=(N, n_tiles),
        in_specs=[
            pl.BlockSpec((1, 1, tile_h + 4, W + 2, C),
                         lambda n, t: (n, t, 0, 0, 0)),          # haloed x (bf16)
            pl.BlockSpec((1, tile_h, W, C), lambda n, t: (n, t, 0, 0)),  # residual
            pl.BlockSpec((9 * C, C), lambda n, t: (0, 0)),       # w1
            pl.BlockSpec((1, C), lambda n, t: (0, 0)),           # s1
            pl.BlockSpec((1, C), lambda n, t: (0, 0)),           # b1
            pl.BlockSpec((9 * C, C), lambda n, t: (0, 0)),       # w2
            pl.BlockSpec((1, C), lambda n, t: (0, 0)),           # s2
            pl.BlockSpec((1, C), lambda n, t: (0, 0)),           # b2
        ],
        out_specs=pl.BlockSpec((1, tile_h, W, C), lambda n, t: (n, t, 0, 0)),
        scratch_shapes=[pltpu.VMEM((tile_h + 2, W + 2, C), jnp.bfloat16)],
    )

    return pl.pallas_call(
        kernel,
        out_shape=jax.ShapeDtypeStruct((N, H, W, C), x_nhwc.dtype),
        grid_spec=grid_spec,
        compiler_params=pltpu.CompilerParams(
            dimension_semantics=("parallel", "parallel"),
            vmem_limit_bytes=64 * 1024 * 1024),
    )(x_halo, x_nhwc.astype(jnp.float32), w1, s1, b1, w2, s2, b2)


def reference_basic_block(x_nhwc, w1_oihw, bn1, w2_oihw, bn2):
    """Pure-JAX reference (lax conv), same NHWC layout."""
    def conv(x, w_oihw):
        w_hwio = jnp.transpose(w_oihw, (2, 3, 1, 0))
        return jax.lax.conv_general_dilated(
            x, w_hwio, window_strides=(1, 1), padding=((1, 1), (1, 1)),
            dimension_numbers=('NHWC', 'HWIO', 'NHWC'))

    def bn(x, params):
        s, b = fold_bn(*params)
        return x * s + b

    # Match the kernel's bf16 quantization of the conv operands.
    xq = x_nhwc.astype(jnp.bfloat16).astype(jnp.float32)
    w1q = w1_oihw.astype(jnp.bfloat16).astype(jnp.float32)
    w2q = w2_oihw.astype(jnp.bfloat16).astype(jnp.float32)

    out = jnp.maximum(bn(conv(xq, w1q), bn1), 0.0)
    out = bn(conv(out, w2q), bn2)
    return jnp.maximum(out + x_nhwc, 0.0)


if __name__ == "__main__":
    # Small shapes consistent with the module: inplanes == planes so the
    # residual add works with downsample=None, stride=1.
    N, C, H, W = 2, 4, 16, 16

    key = jax.random.PRNGKey(0)
    kx_, kw1, kw2, kb = jax.random.split(key, 4)

    x_nhwc = jax.random.normal(kx_, (N, H, W, C), jnp.float32)
    w1 = 0.1 * jax.random.normal(kw1, (C, C, 3, 3), jnp.float32)  # PyTorch OIHW
    w2 = 0.1 * jax.random.normal(kw2, (C, C, 3, 3), jnp.float32)

    kb1, kb2, kb3, kb4 = jax.random.split(kb, 4)
    bn1 = (1.0 + 0.1 * jax.random.normal(kb1, (C,), jnp.float32),          # gamma
           0.1 * jax.random.normal(kb2, (C,), jnp.float32),                # beta
           0.05 * jax.random.normal(kb3, (C,), jnp.float32),               # mean
           1.0 + 0.1 * jnp.abs(jax.random.normal(kb4, (C,), jnp.float32))) # var
    bn2 = (1.0 - 0.05 * jax.random.normal(kb2, (C,), jnp.float32),
           0.05 * jax.random.normal(kb3, (C,), jnp.float32),
           0.02 * jax.random.normal(kb4, (C,), jnp.float32),
           1.0 + 0.05 * jnp.abs(jax.random.normal(kb1, (C,), jnp.float32)))

    out = jax.block_until_ready(basic_block(x_nhwc, w1, bn1, w2, bn2))
    ref = reference_basic_block(x_nhwc, w1, bn1, w2, bn2)

    assert out.shape == (N, H, W, C)
    # bf16 MXU operands + bf16 intermediate => loosened tolerance vs f32 ref.
    assert jnp.allclose(out, ref, rtol=2e-2, atol=2e-2), "mismatch vs reference"

    print("KERNEL_OK")
</pallas_src>

<mosaic_0001>
module attributes {stable_mosaic.version = 11 : i64} {
  func.func @_basic_block_kernel(%arg0: i32, %arg1: i32, %arg2: memref<1x1x12x18x4xbf16, #tpu.memory_space<vmem>>, %arg3: memref<1x8x16x4xf32, #tpu.memory_space<vmem>>, %arg4: memref<36x4xbf16, #tpu.memory_space<vmem>>, %arg5: memref<1x4xf32, #tpu.memory_space<vmem>>, %arg6: memref<1x4xf32, #tpu.memory_space<vmem>>, %arg7: memref<36x4xbf16, #tpu.memory_space<vmem>>, %arg8: memref<1x4xf32, #tpu.memory_space<vmem>>, %arg9: memref<1x4xf32, #tpu.memory_space<vmem>>, %arg10: memref<1x8x16x4xf32, #tpu.memory_space<vmem>>, %arg11: memref<10x18x4xbf16, #tpu.memory_space<vmem>>) attributes {dimension_semantics = [#tpu.dimension_semantics<parallel>, #tpu.dimension_semantics<parallel>], iteration_bounds = array<i64: 2, 2>, scalar_prefetch = 0 : i64, scratch_operands = 1 : i64, tpu.core_type = #tpu.core_type<tc>, window_params = [{transform_indices = @transform_0, window_bounds = array<i64: 1, 1, 12, 18, 4>}, {transform_indices = @transform_1, window_bounds = array<i64: 1, 8, 16, 4>}, {pipeline_mode = #tpu.pipeline_mode<synchronous>, transform_indices = @transform_2, window_bounds = array<i64: 36, 4>}, {pipeline_mode = #tpu.pipeline_mode<synchronous>, transform_indices = @transform_3, window_bounds = array<i64: 1, 4>}, {pipeline_mode = #tpu.pipeline_mode<synchronous>, transform_indices = @transform_4, window_bounds = array<i64: 1, 4>}, {pipeline_mode = #tpu.pipeline_mode<synchronous>, transform_indices = @transform_5, window_bounds = array<i64: 36, 4>}, {pipeline_mode = #tpu.pipeline_mode<synchronous>, transform_indices = @transform_6, window_bounds = array<i64: 1, 4>}, {pipeline_mode = #tpu.pipeline_mode<synchronous>, transform_indices = @transform_7, window_bounds = array<i64: 1, 4>}, {transform_indices = @transform_8, window_bounds = array<i64: 1, 8, 16, 4>}]} {
    %c0 = arith.constant 0 : index
    %c0_0 = arith.constant 0 : index
    %c0_1 = arith.constant 0 : index
    %c0_2 = arith.constant 0 : index
    %c0_3 = arith.constant 0 : index
    %0 = vector.load %arg2[%c0, %c0_0, %c0_1, %c0_2, %c0_3] : memref<1x1x12x18x4xbf16, #tpu.memory_space<vmem>>, vector<1x1x10x16x4xbf16>
    %1 = vector.shape_cast %0 : vector<1x1x10x16x4xbf16> to vector<10x16x4xbf16>
    %c0_4 = arith.constant 0 : index
    %c0_5 = arith.constant 0 : index
    %c0_6 = arith.constant 0 : index
    %c1 = arith.constant 1 : index
    %c0_7 = arith.constant 0 : index
    %2 = vector.load %arg2[%c0_4, %c0_5, %c0_6, %c1, %c0_7] : memref<1x1x12x18x4xbf16, #tpu.memory_space<vmem>>, vector<1x1x10x16x4xbf16>
    %3 = vector.shape_cast %2 : vector<1x1x10x16x4xbf16> to vector<10x16x4xbf16>
    %c0_8 = arith.constant 0 : index
    %c0_9 = arith.constant 0 : index
    %c0_10 = arith.constant 0 : index
    %c2 = arith.constant 2 : index
    %c0_11 = arith.constant 0 : index
    %4 = vector.load %arg2[%c0_8, %c0_9, %c0_10, %c2, %c0_11] : memref<1x1x12x18x4xbf16, #tpu.memory_space<vmem>>, vector<1x1x10x16x4xbf16>
    %5 = vector.shape_cast %4 : vector<1x1x10x16x4xbf16> to vector<10x16x4xbf16>
    %c0_12 = arith.constant 0 : index
    %c0_13 = arith.constant 0 : index
    %c1_14 = arith.constant 1 : index
    %c0_15 = arith.constant 0 : index
    %c0_16 = arith.constant 0 : index
    %6 = vector.load %arg2[%c0_12, %c0_13, %c1_14, %c0_15, %c0_16] : memref<1x1x12x18x4xbf16, #tpu.memory_space<vmem>>, vector<1x1x10x16x4xbf16>
    %7 = vector.shape_cast %6 : vector<1x1x10x16x4xbf16> to vector<10x16x4xbf16>
    %c0_17 = arith.constant 0 : index
    %c0_18 = arith.constant 0 : index
    %c1_19 = arith.constant 1 : index
    %c1_20 = arith.constant 1 : index
    %c0_21 = arith.constant 0 : index
    %8 = vector.load %arg2[%c0_17, %c0_18, %c1_19, %c1_20, %c0_21] : memref<1x1x12x18x4xbf16, #tpu.memory_space<vmem>>, vector<1x1x10x16x4xbf16>
    %9 = vector.shape_cast %8 : vector<1x1x10x16x4xbf16> to vector<10x16x4xbf16>
    %c0_22 = arith.constant 0 : index
    %c0_23 = arith.constant 0 : index
    %c1_24 = arith.constant 1 : index
    %c2_25 = arith.constant 2 : index
    %c0_26 = arith.constant 0 : index
    %10 = vector.load %arg2[%c0_22, %c0_23, %c1_24, %c2_25, %c0_26] : memref<1x1x12x18x4xbf16, #tpu.memory_space<vmem>>, vector<1x1x10x16x4xbf16>
    %11 = vector.shape_cast %10 : vector<1x1x10x16x4xbf16> to vector<10x16x4xbf16>
    %c0_27 = arith.constant 0 : index
    %c0_28 = arith.constant 0 : index
    %c2_29 = arith.constant 2 : index
    %c0_30 = arith.constant 0 : index
    %c0_31 = arith.constant 0 : index
    %12 = vector.load %arg2[%c0_27, %c0_28, %c2_29, %c0_30, %c0_31] : memref<1x1x12x18x4xbf16, #tpu.memory_space<vmem>>, vector<1x1x10x16x4xbf16>
    %13 = vector.shape_cast %12 : vector<1x1x10x16x4xbf16> to vector<10x16x4xbf16>
    %c0_32 = arith.constant 0 : index
    %c0_33 = arith.constant 0 : index
    %c2_34 = arith.constant 2 : index
    %c1_35 = arith.constant 1 : index
    %c0_36 = arith.constant 0 : index
    %14 = vector.load %arg2[%c0_32, %c0_33, %c2_34, %c1_35, %c0_36] : memref<1x1x12x18x4xbf16, #tpu.memory_space<vmem>>, vector<1x1x10x16x4xbf16>
    %15 = vector.shape_cast %14 : vector<1x1x10x16x4xbf16> to vector<10x16x4xbf16>
    %c0_37 = arith.constant 0 : index
    %c0_38 = arith.constant 0 : index
    %c2_39 = arith.constant 2 : index
    %c2_40 = arith.constant 2 : index
    %c0_41 = arith.constant 0 : index
    %16 = vector.load %arg2[%c0_37, %c0_38, %c2_39, %c2_40, %c0_41] : memref<1x1x12x18x4xbf16, #tpu.memory_space<vmem>>, vector<1x1x10x16x4xbf16>
    %17 = vector.shape_cast %16 : vector<1x1x10x16x4xbf16> to vector<10x16x4xbf16>
    %18 = tpu.concatenate %1, %3, %5, %7, %9, %11, %13, %15, %17 in 2 : vector<10x16x4xbf16>, vector<10x16x4xbf16>, vector<10x16x4xbf16>, vector<10x16x4xbf16>, vector<10x16x4xbf16>, vector<10x16x4xbf16>, vector<10x16x4xbf16>, vector<10x16x4xbf16>, vector<10x16x4xbf16> -> vector<10x16x36xbf16>
    %c0_42 = arith.constant 0 : index
    %c0_43 = arith.constant 0 : index
    %19 = vector.load %arg4[%c0_42, %c0_43] : memref<36x4xbf16, #tpu.memory_space<vmem>>, vector<36x4xbf16>
    "tpu.trace_start"() <{level = 10 : i32, message = "rwk,ko->rwo"}> : () -> ()
    %cst = arith.constant dense<0.000000e+00> : vector<10x16x4xf32>
    %20 = tpu.matmul %18, %19, %cst {dimension_numbers = #tpu.dot_dimension_numbers<[2], [0], [0, 1], [1], [0, 0, 0, 1, 1, 1], [], []>} : vector<10x16x36xbf16>, vector<36x4xbf16>, vector<10x16x4xf32> -> vector<10x16x4xf32>
    "tpu.trace_stop"() : () -> ()
    %c0_44 = arith.constant 0 : index
    %c0_45 = arith.constant 0 : index
    %21 = vector.load %arg5[%c0_44, %c0_45] : memref<1x4xf32, #tpu.memory_space<vmem>>, vector<1x4xf32>
    %22 = vector.shape_cast %21 : vector<1x4xf32> to vector<1x1x4xf32>
    %23 = vector.broadcast %22 : vector<1x1x4xf32> to vector<10x16x4xf32>
    %24 = arith.mulf %20, %23 : vector<10x16x4xf32>
    %c0_46 = arith.constant 0 : index
    %c0_47 = arith.constant 0 : index
    %25 = vector.load %arg6[%c0_46, %c0_47] : memref<1x4xf32, #tpu.memory_space<vmem>>, vector<1x4xf32>
    %26 = vector.shape_cast %25 : vector<1x4xf32> to vector<1x1x4xf32>
    %27 = vector.broadcast %26 : vector<1x1x4xf32> to vector<10x16x4xf32>
    %28 = arith.addf %24, %27 : vector<10x16x4xf32>
    %cst_48 = arith.constant 0.000000e+00 : f32
    %29 = vector.broadcast %cst_48 : f32 to vector<10x16x4xf32>
    %30 = arith.maximumf %28, %29 : vector<10x16x4xf32>
    %31 = arith.truncf %30 : vector<10x16x4xf32> to vector<10x16x4xbf16>
    %c0_49 = arith.constant 0 : index
    %c1_50 = arith.constant 1 : index
    %c0_51 = arith.constant 0 : index
    %32 = vector.load %arg11[%c0_49, %c1_50, %c0_51] : memref<10x18x4xbf16, #tpu.memory_space<vmem>>, vector<10x16x4xbf16>
    tpu.vector_store %arg11[%c0_49, %c1_50, %c0_51], %31 {strides = array<i32>} : memref<10x18x4xbf16, #tpu.memory_space<vmem>>, vector<10x16x4xbf16>,
    %cst_52 = arith.constant 0.000000e+00 : bf16
    %33 = vector.broadcast %cst_52 : bf16 to vector<10x1x4xbf16>
    %c0_53 = arith.constant 0 : index
    %c0_54 = arith.constant 0 : index
    %c0_55 = arith.constant 0 : index
    %34 = vector.load %arg11[%c0_53, %c0_54, %c0_55] : memref<10x18x4xbf16, #tpu.memory_space<vmem>>, vector<10x1x4xbf16>
    tpu.vector_store %arg11[%c0_53, %c0_54, %c0_55], %33 {strides = array<i32>} : memref<10x18x4xbf16, #tpu.memory_space<vmem>>, vector<10x1x4xbf16>,
    %c0_56 = arith.constant 0 : index
    %c17 = arith.constant 17 : index
    %c0_57 = arith.constant 0 : index
    %35 = vector.load %arg11[%c0_56, %c17, %c0_57] : memref<10x18x4xbf16, #tpu.memory_space<vmem>>, vector<10x1x4xbf16>
    tpu.vector_store %arg11[%c0_56, %c17, %c0_57], %33 {strides = array<i32>} : memref<10x18x4xbf16, #tpu.memory_space<vmem>>, vector<10x1x4xbf16>,
    %c0_i32 = arith.constant 0 : i32
    %36 = arith.cmpi eq, %arg1, %c0_i32 : i32
    %37 = arith.extui %36 : i1 to i32
    %c0_i32_58 = arith.constant 0 : i32
    %38 = arith.cmpi ne, %37, %c0_i32_58 : i32
    scf.if %38 {
      %cst_103 = arith.constant 0.000000e+00 : bf16
      %70 = vector.broadcast %cst_103 : bf16 to vector<1x18x4xbf16>
      %c0_104 = arith.constant 0 : index
      %c0_105 = arith.constant 0 : index
      %c0_106 = arith.constant 0 : index
      %71 = vector.load %arg11[%c0_104, %c0_105, %c0_106] : memref<10x18x4xbf16, #tpu.memory_space<vmem>>, vector<1x18x4xbf16>
      tpu.vector_store %arg11[%c0_104, %c0_105, %c0_106], %70 {strides = array<i32>} : memref<10x18x4xbf16, #tpu.memory_space<vmem>>, vector<1x18x4xbf16>,
    } else {
    }
    %c1_i32 = arith.constant 1 : i32
    %39 = arith.cmpi eq, %arg1, %c1_i32 : i32
    %40 = arith.extui %39 : i1 to i32
    %c0_i32_59 = arith.constant 0 : i32
    %41 = arith.cmpi ne, %40, %c0_i32_59 : i32
    scf.if %41 {
      %cst_103 = arith.constant 0.000000e+00 : bf16
      %70 = vector.broadcast %cst_103 : bf16 to vector<1x18x4xbf16>
      %c9 = arith.constant 9 : index
      %c0_104 = arith.constant 0 : index
      %c0_105 = arith.constant 0 : index
      %71 = vector.load %arg11[%c9, %c0_104, %c0_105] : memref<10x18x4xbf16, #tpu.memory_space<vmem>>, vector<1x18x4xbf16>
      tpu.vector_store %arg11[%c9, %c0_104, %c0_105], %70 {strides = array<i32>} : memref<10x18x4xbf16, #tpu.memory_space<vmem>>, vector<1x18x4xbf16>,
    } else {
    }
    %c0_60 = arith.constant 0 : index
    %c0_61 = arith.constant 0 : index
    %c0_62 = arith.constant 0 : index
    %42 = vector.load %arg11[%c0_60, %c0_61, %c0_62] : memref<10x18x4xbf16, #tpu.memory_space<vmem>>, vector<8x16x4xbf16>
    %c0_63 = arith.constant 0 : index
    %c1_64 = arith.constant 1 : index
    %c0_65 = arith.constant 0 : index
    %43 = vector.load %arg11[%c0_63, %c1_64, %c0_65] : memref<10x18x4xbf16, #tpu.memory_space<vmem>>, vector<8x16x4xbf16>
    %c0_66 = arith.constant 0 : index
    %c2_67 = arith.constant 2 : index
    %c0_68 = arith.constant 0 : index
    %44 = vector.load %arg11[%c0_66, %c2_67, %c0_68] : memref<10x18x4xbf16, #tpu.memory_space<vmem>>, vector<8x16x4xbf16>
    %c1_69 = arith.constant 1 : index
    %c0_70 = arith.constant 0 : index
    %c0_71 = arith.constant 0 : index
    %45 = vector.load %arg11[%c1_69, %c0_70, %c0_71] : memref<10x18x4xbf16, #tpu.memory_space<vmem>>, vector<8x16x4xbf16>
    %c1_72 = arith.constant 1 : index
    %c1_73 = arith.constant 1 : index
    %c0_74 = arith.constant 0 : index
    %46 = vector.load %arg11[%c1_72, %c1_73, %c0_74] : memref<10x18x4xbf16, #tpu.memory_space<vmem>>, vector<8x16x4xbf16>
    %c1_75 = arith.constant 1 : index
    %c2_76 = arith.constant 2 : index
    %c0_77 = arith.constant 0 : index
    %47 = vector.load %arg11[%c1_75, %c2_76, %c0_77] : memref<10x18x4xbf16, #tpu.memory_space<vmem>>, vector<8x16x4xbf16>
    %c2_78 = arith.constant 2 : index
    %c0_79 = arith.constant 0 : index
    %c0_80 = arith.constant 0 : index
    %48 = vector.load %arg11[%c2_78, %c0_79, %c0_80] : memref<10x18x4xbf16, #tpu.memory_space<vmem>>, vector<8x16x4xbf16>
    %c2_81 = arith.constant 2 : index
    %c1_82 = arith.constant 1 : index
    %c0_83 = arith.constant 0 : index
    %49 = vector.load %arg11[%c2_81, %c1_82, %c0_83] : memref<10x18x4xbf16, #tpu.memory_space<vmem>>, vector<8x16x4xbf16>
    %c2_84 = arith.constant 2 : index
    %c2_85 = arith.constant 2 : index
    %c0_86 = arith.constant 0 : index
    %50 = vector.load %arg11[%c2_84, %c2_85, %c0_86] : memref<10x18x4xbf16, #tpu.memory_space<vmem>>, vector<8x16x4xbf16>
    %51 = tpu.concatenate %42, %43, %44, %45, %46, %47, %48, %49, %50 in 2 : vector<8x16x4xbf16>, vector<8x16x4xbf16>, vector<8x16x4xbf16>, vector<8x16x4xbf16>, vector<8x16x4xbf16>, vector<8x16x4xbf16>, vector<8x16x4xbf16>, vector<8x16x4xbf16>, vector<8x16x4xbf16> -> vector<8x16x36xbf16>
    %c0_87 = arith.constant 0 : index
    %c0_88 = arith.constant 0 : index
    %52 = vector.load %arg7[%c0_87, %c0_88] : memref<36x4xbf16, #tpu.memory_space<vmem>>, vector<36x4xbf16>
    "tpu.trace_start"() <{level = 10 : i32, message = "rwk,ko->rwo"}> : () -> ()
    %cst_89 = arith.constant dense<0.000000e+00> : vector<8x16x4xf32>
    %53 = tpu.matmul %51, %52, %cst_89 {dimension_numbers = #tpu.dot_dimension_numbers<[2], [0], [0, 1], [1], [0, 0, 0, 1, 1, 1], [], []>} : vector<8x16x36xbf16>, vector<36x4xbf16>, vector<8x16x4xf32> -> vector<8x16x4xf32>
    "tpu.trace_stop"() : () -> ()
    %c0_90 = arith.constant 0 : index
    %c0_91 = arith.constant 0 : index
    %54 = vector.load %arg8[%c0_90, %c0_91] : memref<1x4xf32, #tpu.memory_space<vmem>>, vector<1x4xf32>
    %55 = vector.shape_cast %54 : vector<1x4xf32> to vector<1x1x4xf32>
    %56 = vector.broadcast %55 : vector<1x1x4xf32> to vector<8x16x4xf32>
    %57 = arith.mulf %53, %56 : vector<8x16x4xf32>
    %c0_92 = arith.constant 0 : index
    %c0_93 = arith.constant 0 : index
    %58 = vector.load %arg9[%c0_92, %c0_93] : memref<1x4xf32, #tpu.memory_space<vmem>>, vector<1x4xf32>
    %59 = vector.shape_cast %58 : vector<1x4xf32> to vector<1x1x4xf32>
    %60 = vector.broadcast %59 : vector<1x1x4xf32> to vector<8x16x4xf32>
    %61 = arith.addf %57, %60 : vector<8x16x4xf32>
    %c0_94 = arith.constant 0 : index
    %c0_95 = arith.constant 0 : index
    %c0_96 = arith.constant 0 : index
    %c0_97 = arith.constant 0 : index
    %62 = vector.load %arg3[%c0_94, %c0_95, %c0_96, %c0_97] : memref<1x8x16x4xf32, #tpu.memory_space<vmem>>, vector<1x8x16x4xf32>
    %63 = vector.shape_cast %62 : vector<1x8x16x4xf32> to vector<8x16x4xf32>
    %64 = arith.addf %61, %63 : vector<8x16x4xf32>
    %cst_98 = arith.constant 0.000000e+00 : f32
    %65 = vector.broadcast %cst_98 : f32 to vector<8x16x4xf32>
    %66 = arith.maximumf %64, %65 : vector<8x16x4xf32>
    %c0_99 = arith.constant 0 : index
    %c0_100 = arith.constant 0 : index
    %c0_101 = arith.constant 0 : index
    %c0_102 = arith.constant 0 : index
    %67 = vector.load %arg10[%c0_99, %c0_100, %c0_101, %c0_102] : memref<1x8x16x4xf32, #tpu.memory_space<vmem>>, vector<1x8x16x4xf32>
    %68 = vector.shape_cast %67 : vector<1x8x16x4xf32> to vector<8x16x4xf32>
    %69 = vector.shape_cast %66 : vector<8x16x4xf32> to vector<1x8x16x4xf32>
    tpu.vector_store %arg10[%c0_99, %c0_100, %c0_101, %c0_102], %69 {strides = array<i32>} : memref<1x8x16x4xf32, #tpu.memory_space<vmem>>, vector<1x8x16x4xf32>,
    return
  }
  func.func @transform_0(%arg0: i32, %arg1: i32) -> (i32, i32, i32, i32, i32) {
    %c0_i32 = arith.constant 0 : i32
    %c0_i32_0 = arith.constant 0 : i32
    %c0_i32_1 = arith.constant 0 : i32
    %c0_i32_2 = arith.constant 0 : i32
    return %arg0, %arg1, %c0_i32, %c0_i32_0, %c0_i32_1 : i32, i32, i32, i32, i32
  }
  func.func @transform_1(%arg0: i32, %arg1: i32) -> (i32, i32, i32, i32) {
    %c0_i32 = arith.constant 0 : i32
    %c0_i32_0 = arith.constant 0 : i32
    %c0_i32_1 = arith.constant 0 : i32
    return %arg0, %arg1, %c0_i32, %c0_i32_0 : i32, i32, i32, i32
  }
  func.func @transform_2(%arg0: i32, %arg1: i32) -> (i32, i32) {
    %c0_i32 = arith.constant 0 : i32
    %c0_i32_0 = arith.constant 0 : i32
    %c0_i32_1 = arith.constant 0 : i32
    return %c0_i32, %c0_i32_0 : i32, i32
  }
  func.func @transform_3(%arg0: i32, %arg1: i32) -> (i32, i32) {
    %c0_i32 = arith.constant 0 : i32
    %c0_i32_0 = arith.constant 0 : i32
    %c0_i32_1 = arith.constant 0 : i32
    return %c0_i32, %c0_i32_0 : i32, i32
  }
  func.func @transform_4(%arg0: i32, %arg1: i32) -> (i32, i32) {
    %c0_i32 = arith.constant 0 : i32
    %c0_i32_0 = arith.constant 0 : i32
    %c0_i32_1 = arith.constant 0 : i32
    return %c0_i32, %c0_i32_0 : i32, i32
  }
  func.func @transform_5(%arg0: i32, %arg1: i32) -> (i32, i32) {
    %c0_i32 = arith.constant 0 : i32
    %c0_i32_0 = arith.constant 0 : i32
    %c0_i32_1 = arith.constant 0 : i32
    return %c0_i32, %c0_i32_0 : i32, i32
  }
  func.func @transform_6(%arg0: i32, %arg1: i32) -> (i32, i32) {
    %c0_i32 = arith.constant 0 : i32
    %c0_i32_0 = arith.constant 0 : i32
    %c0_i32_1 = arith.constant 0 : i32
    return %c0_i32, %c0_i32_0 : i32, i32
  }
  func.func @transform_7(%arg0: i32, %arg1: i32) -> (i32, i32) {
    %c0_i32 = arith.constant 0 : i32
    %c0_i32_0 = arith.constant 0 : i32
    %c0_i32_1 = arith.constant 0 : i32
    return %c0_i32, %c0_i32_0 : i32, i32
  }
  func.func @transform_8(%arg0: i32, %arg1: i32) -> (i32, i32, i32, i32) {
    %c0_i32 = arith.constant 0 : i32
    %c0_i32_0 = arith.constant 0 : i32
    %c0_i32_1 = arith.constant 0 : i32
    return %arg0, %arg1, %c0_i32, %c0_i32_0 : i32, i32, i32, i32
  }
}

</mosaic_0001>

<bundles_post_ra>
// kernel: tpu_custom_call.1
= control target key start
LH: loop header
LB: loop body
LE: loop exit
PB: predicated region body
PF: predicated region fallthrough
CT: control target
= control target key end

     0   :  { %s6499_s0 = inlined_call_operand.hbm [shape: bf16[2,2,12,18,4], index: 0, kind: input, shape index: {}]   ;;  %s6500_s1 = inlined_call_operand.hbm [shape: f32[2,16,16,4], index: 1, kind: input, shape index: {}]   ;;  %s6501_s2 = inlined_call_operand.hbm [shape: bf16[36,4], index: 2, kind: input, shape index: {}]   ;;  %s6502_s3 = inlined_call_operand.hbm [shape: f32[1,4], index: 3, kind: input, shape index: {}]   ;;  %s6503_s4 = inlined_call_operand.hbm [shape: f32[1,4], index: 4, kind: input, shape index: {}]   ;;  %s6504_s5 = inlined_call_operand.hbm [shape: bf16[36,4], index: 5, kind: input, shape index: {}]   ;;  %s6505_s6 = inlined_call_operand.hbm [shape: f32[1,4], index: 6, kind: input, shape index: {}]   ;;  %s6506_s7 = inlined_call_operand.hbm [shape: f32[1,4], index: 7, kind: input, shape index: {}]   ;;  %s6507_s8 = inlined_call_operand.hbm [shape: f32[2,16,16,4], index: 8, kind: output, shape index: {}]  }
   0x1   :  { %6520 = sst [smem:[#allocation29_spill]] %s6499_s0 }
   0x2   :  { %6521 = sst [smem:[#allocation30_spill]] %s6501_s2 }
   0x3   :  { %6522 = sst [smem:[#allocation31_spill]] %s6502_s3 }
   0x4   :  { %6523 = sst [smem:[#allocation32_spill]] %s6503_s4 }
   0x5   :  { %6524 = sst [smem:[#allocation33_spill]] %s6504_s5 }
   0x6   :  { %6525 = sst [smem:[#allocation34_spill]] %s6505_s6 }
   0x7   :  { %6526 = sst [smem:[#allocation35_spill]] %s6506_s7 }
   0x8   :  { %6527 = sst [smem:[#allocation36_spill]] %s6507_s8 }
   0x9   :  { %13 = vsyncpa [#allocation4], 0 }
   0xa   :  { %15 = vsyncpa [#allocation4 + $0x1], 0 }
   0xb   :  { %16 = vsyncpa [#allocation7], 0 }
   0xc   :  { %18 = vsyncpa [#allocation7 + $0x1], 0 }
   0xd   :  { %19 = vsyncpa [#allocation10], 0 }
   0xe   :  { %20 = vsyncpa [#allocation13], 0 }
   0xf   :  { %21 = vsyncpa [#allocation16], 0 }
  0x10   :  { %22 = vsyncpa [#allocation5], 0 }
  0x11   :  { %24 = vsyncpa [#allocation5 + $0x1], 0  ;;  %s4932_s27 = smov 0   ;;  %s4934_s28 = smov 0  }
  0x12   :  { %s4936_s29 = smov 0   ;;  %s4938_s30 = smov 0  }
  0x13   :  { %s4940_s9 = smov 0   ;;  %s4942_s10 = smov 0  }
  0x14   :  { %s4944_s11 = smov 0   ;;  %s4946_s12 = smov 0  }
  0x15 LB: > { %6528 = sst [smem:[#allocation25_spill]] %s4845_s30  ;;  %s4973_s13 = sadd.s32 4294967295, %s4861_s12   ;;  %s4861_s12 = sphi %s4946_s12, %s30_s12   ;;  %s4857_s11 = sphi %s4944_s11, %s6615_s11   ;;  %s4853_s10 = sphi %s4942_s10, %s6614_s10   ;;  %s4849_s9 = sphi %s4940_s9, %s6613_s9   ;;  %s4845_s30 = sphi %s4938_s30, %s6612_s30   ;;  %s4841_s29 = sphi %s4936_s29, %s6611_s29   ;;  %s4837_s28 = sphi %s4934_s28, %s6610_s28   ;;  %s4833_s27 = sphi %s4932_s27, %s6609_s27  }
  0x16   : > { %6529 = sst [smem:[#allocation26_spill]] %s4849_s9  ;;  %p3766_p0 = scmp.ge.s32.totalorder %s4861_s12, 1 }
  0x17   : > { %p6510_p1 = scmp.eq.s32.totalorder %s4973_s13, 0  ;;  %p257_p2 = scmp.lt.s32.totalorder %s4861_s12, 5 }
  0x18   : > { %s4863_s15 = smov [#allocation8]   ;;  %s4864_s18 = smov [#allocation9]  }
  0x19   : > { %p4978_p3 = pnand %p3766_p0, %p257_p2  ;;  %s269_s16 = sshll.u32 %s4863_s15, 4  ;;  %s4982_s16 = int_to_ptr.vmem [resolvable:$true] %s269_s16 }
  0x1a   : > { %s283_s19 = sshll.u32 %s4864_s18, 4  ;;  %s4865_s20 = smov [#allocation12]   ;;  %s4992_s19 = int_to_ptr.vmem [resolvable:$true] %s283_s19 }
  0x1b   : > { %s6530_s14 = scalar_select %p4978_p3, 1, 0 }
  0x1c   : > { %p4218_p4 = pneg %p4978_p3  ;;  %s4994_s21 = sshll.u32 %s4865_s20, 4  ;;  %s305_s21 = int_to_ptr.vmem [resolvable:$true] %s4994_s21 }
  0x1d   : > { %6531 = sst [smem:[#allocation27_spill]] %s6530_s14  ;;  %s6533_s2 = sld [smem:[#allocation30_spill]] }
  0x1e   : > { %p4988_p5 = pnand %p4218_p4, %p6510_p1 }
  0x20   : > { %p5004_p7 = pneg %p4988_p5 }
  0x23   : > { %s4515_s24 = scalar_lea.hbm %s6533_s2, 320 }
  0x24   : > { %p4516_p6 = scmp.ne.s32.totalorder %s6533_s2, %s4515_s24  ;;  %p4522_p10 = scmp.lt.u32.totalorder %s4515_s24, %s6533_s2 }
  0x26   : > { %p4518_p8 = pnand %p5004_p7, %p4516_p6 }
  0x28   : > { %p4519_p9 = pneg %p4518_p8 }
  0x2a   : > { %p4524_p11 = pnand %p4522_p10, %p4519_p9 }
  0x2c   : > { %4527 = shalt.err (!%p4524_p11)
}
  0x2d   : > { %s4528_s22 = scalar_lea.vmem %s4982_s16, 320  ;;  %p4536_p2 = scmp.lt.s32.totalorder %s4982_s16, %s4982_s16 }
  0x2e   : > { %p4529_p12 = scmp.ne.s32.totalorder %s4982_s16, %s4528_s22  ;;  %p4537_p4 = scmp.lt.s32.totalorder %s4528_s22, %s4528_s22 }
  0x30   : > { %p4531_p13 = pnand %p4529_p12, %p5004_p7  ;;  %p4538_p6 = por %p4537_p4, %p4536_p2 }
  0x32   : > { %p4532_p0 = pneg %p4531_p13 }
  0x34   : > { %p4539_p8 = pnand %p4538_p6, %p4532_p0 }
  0x36   : > { %4542 = shalt.err (!%p4539_p8)
}
  0x37   : > { %s6512_s23 = smov 64   ;;  %s6513_s24 = smov 4  }
  0x38   : > { %4221 = dma.hbm_to_vmem [thread:$0]  (!%p4988_p5), %s6533_s2, 320, %s4982_s16, [#allocation7], %s6512_s23, %s6512_s23, %s6513_s24  }
  0x39   : > { %s6535_s3 = sld [smem:[#allocation31_spill]] }
  0x3f   : > { %s4543_s22 = scalar_lea.hbm %s6535_s3, 16 }
  0x40   : > { %p4544_p9 = scmp.ne.s32.totalorder %s6535_s3, %s4543_s22  ;;  %p4550_p12 = scmp.lt.u32.totalorder %s4543_s22, %s6535_s3 }
  0x42   : > { %p4546_p10 = pnand %p4544_p9, %p5004_p7 }
  0x44   : > { %p4547_p11 = pneg %p4546_p10 }
  0x46   : > { %p4552_p13 = pnand %p4550_p12, %p4547_p11 }
  0x48   : > { %4555 = shalt.err (!%p4552_p13)
}
  0x49   : > { %s4556_s16 = scalar_lea.vmem %s4992_s19, 16  ;;  %s4563_s8 = scalar_lea.vmem %s4992_s19, 32 }
  0x4a   : > { %p4557_p0 = scmp.ne.s32.totalorder %s4992_s19, %s4556_s16  ;;  %p4564_p6 = scmp.lt.s32.totalorder %s4992_s19, %s4992_s19 }
  0x4b   : > { %p4565_p8 = scmp.lt.s32.totalorder %s4563_s8, %s4556_s16 }
  0x4c   : > { %p4559_p2 = pnand %p4557_p0, %p5004_p7 }
  0x4d   : > { %p4566_p9 = por %p4565_p8, %p4564_p6 }
  0x4e   : > { %p4560_p4 = pneg %p4559_p2 }
  0x50   : > { %p4567_p10 = pnand %p4566_p9, %p4560_p4 }
  0x52   : > { %4570 = shalt.err (!%p4567_p10)
}
  0x53   : > { %4224 = dma.hbm_to_vmem [thread:$0]  (!%p4988_p5), %s6535_s3, 16, %s4992_s19, [#allocation10]  }
  0x54   : > { %s6536_s5 = sld [smem:[#allocation33_spill]] }
  0x5a   : > { %s4571_s26 = scalar_lea.hbm %s6536_s5, 320 }
  0x5b   : > { %p4572_p11 = scmp.ne.s32.totalorder %s6536_s5, %s4571_s26  ;;  %p4578_p0 = scmp.lt.u32.totalorder %s4571_s26, %s6536_s5 }
  0x5d   : > { %p4574_p12 = pnand %p4572_p11, %p5004_p7 }
  0x5f   : > { %p4575_p13 = pneg %p4574_p12 }
  0x61   : > { %p4580_p2 = pnand %p4578_p0, %p4575_p13 }
  0x63   : > { %4583 = shalt.err (!%p4580_p2)
}
  0x64   : > { %s4584_s8 = scalar_lea.vmem %s305_s21, 320  ;;  %p4592_p9 = scmp.lt.s32.totalorder %s305_s21, %s305_s21 }
  0x65   : > { %p4585_p4 = scmp.ne.s32.totalorder %s305_s21, %s4584_s8  ;;  %p4593_p10 = scmp.lt.s32.totalorder %s4584_s8, %s4584_s8 }
  0x67   : > { %p4587_p6 = pnand %p4585_p4, %p5004_p7  ;;  %p4594_p1 = por %p4593_p10, %p4592_p9 }
  0x69   : > { %p4588_p8 = pneg %p4587_p6 }
  0x6b   : > { %p4595_p3 = pnand %p4594_p1, %p4588_p8 }
  0x6d   : > { %4598 = shalt.err (!%p4595_p3)
}
  0x6e   : > { %4230 = dma.hbm_to_vmem [thread:$0]  (!%p4988_p5), %s6536_s5, 320, %s305_s21, [#allocation13], %s6512_s23, %s6512_s23, %s6513_s24  }
  0x6f   : > { %s4868_s9 = smov [#allocation11]   ;;  %s4869_s25 = smov [#allocation14]  }
  0x70   : > { %s294_s14 = sshll.u32 %s4868_s9, 4  ;;  %s318_s26 = sshll.u32 %s4869_s25, 4  ;;  %s295_s14 = int_to_ptr.vmem [resolvable:$true] %s294_s14  ;;  %s319_s26 = int_to_ptr.vmem [resolvable:$true] %s318_s26 }
  0x71   : > { %s6537_s4 = sld [smem:[#allocation32_spill]] }
  0x77   : > { %s4599_s22 = scalar_lea.hbm %s6537_s4, 16 }
  0x78   : > { %p4600_p1 = scmp.ne.s32.totalorder %s6537_s4, %s4599_s22  ;;  %p4606_p12 = scmp.lt.u32.totalorder %s4599_s22, %s6537_s4 }
  0x7a   : > { %p4602_p3 = pnand %p4600_p1, %p5004_p7 }
  0x7c   : > { %p4603_p11 = pneg %p4602_p3 }
  0x7e   : > { %p4608_p13 = pnand %p4606_p12, %p4603_p11 }
  0x80   : > { %4611 = shalt.err (!%p4608_p13)
}
  0x81   : > { %s4612_s21 = scalar_lea.vmem %s295_s14, 16  ;;  %s4619_s30 = scalar_lea.vmem %s295_s14, 32 }
  0x82   : > { %p4613_p0 = scmp.ne.s32.totalorder %s295_s14, %s4612_s21  ;;  %p4620_p6 = scmp.lt.s32.totalorder %s295_s14, %s295_s14 }
  0x83   : > { %p4621_p8 = scmp.lt.s32.totalorder %s4619_s30, %s4612_s21 }
  0x84   : > { %p4615_p2 = pnand %p4613_p0, %p5004_p7 }
  0x85   : > { %p4622_p9 = por %p4621_p8, %p4620_p6 }
  0x86   : > { %p4616_p4 = pneg %p4615_p2 }
  0x88   : > { %p4623_p10 = pnand %p4622_p9, %p4616_p4 }
  0x8a   : > { %4626 = shalt.err (!%p4623_p10)
}
  0x8b   : > { %4227 = dma.hbm_to_vmem [thread:$0]  (!%p4988_p5), %s6537_s4, 16, %s295_s14, [#allocation10]  }
  0x8c   : > { %s6538_s6 = sld [smem:[#allocation34_spill]] }
  0x92   : > { %s4627_s20 = scalar_lea.hbm %s6538_s6, 16 }
  0x93   : > { %p4628_p1 = scmp.ne.s32.totalorder %s6538_s6, %s4627_s20  ;;  %p4634_p12 = scmp.lt.u32.totalorder %s4627_s20, %s6538_s6 }
  0x95   : > { %p4630_p3 = pnand %p4628_p1, %p5004_p7 }
  0x97   : > { %p4631_p11 = pneg %p4630_p3 }
  0x99   : > { %p4636_p13 = pnand %p4634_p12, %p4631_p11 }
  0x9b   : > { %4639 = shalt.err (!%p4636_p13)
}
  0x9c   : > { %s4640_s21 = scalar_lea.vmem %s319_s26, 16  ;;  %s4647_s14 = scalar_lea.vmem %s319_s26, 32 }
  0x9d   : > { %p4641_p0 = scmp.ne.s32.totalorder %s319_s26, %s4640_s21  ;;  %p4648_p6 = scmp.lt.s32.totalorder %s319_s26, %s319_s26 }
  0x9e   : > { %p4649_p8 = scmp.lt.s32.totalorder %s4647_s14, %s4640_s21 }
  0x9f   : > { %p4643_p2 = pnand %p4641_p0, %p5004_p7 }
  0xa0   : > { %p4650_p9 = por %p4649_p8, %p4648_p6 }
  0xa1   : > { %p4644_p4 = pneg %p4643_p2 }
  0xa3   : > { %p4651_p10 = pnand %p4650_p9, %p4644_p4 }
  0xa5   : > { %4654 = shalt.err (!%p4651_p10)
}
  0xa6   : > { %4233 = dma.hbm_to_vmem [thread:$0]  (!%p4988_p5), %s6538_s6, 16, %s319_s26, [#allocation13]  }
  0xa7   : > { %s4870_s25 = smov [#allocation15]   ;;  %s6539_s7 = sld [smem:[#allocation35_spill]] }
  0xa8   : > { %s329_s2 = sshll.u32 %s4870_s25, 4  ;;  %s330_s2 = int_to_ptr.vmem [resolvable:$true] %s329_s2 }
  0xad   : > { %s4655_s22 = scalar_lea.hbm %s6539_s7, 16 }
  0xae   : > { %p4656_p1 = scmp.ne.s32.totalorder %s6539_s7, %s4655_s22  ;;  %p4662_p12 = scmp.lt.u32.totalorder %s4655_s22, %s6539_s7 }
  0xb0   : > { %p4658_p3 = pnand %p4656_p1, %p5004_p7 }
  0xb2   : > { %p4659_p11 = pneg %p4658_p3 }
  0xb4   : > { %p4664_p13 = pnand %p4662_p12, %p4659_p11 }
  0xb6   : > { %4667 = shalt.err (!%p4664_p13)
}
  0xb7   : > { %s4668_s26 = scalar_lea.vmem %s330_s2, 16  ;;  %s4675_s14 = scalar_lea.vmem %s330_s2, 32 }
  0xb8   : > { %p4669_p0 = scmp.ne.s32.totalorder %s330_s2, %s4668_s26  ;;  %p4676_p6 = scmp.lt.s32.totalorder %s330_s2, %s330_s2 }
  0xb9   : > { %p4677_p8 = scmp.lt.s32.totalorder %s4675_s14, %s4668_s26 }
  0xba   : > { %p4671_p2 = pnand %p4669_p0, %p5004_p7 }
  0xbb   : > { %p4678_p9 = por %p4677_p8, %p4676_p6 }
  0xbc   : > { %p4672_p4 = pneg %p4671_p2 }
  0xbe   : > { %p4679_p10 = pnand %p4678_p9, %p4672_p4 }
  0xc0   : > { %4682 = shalt.err (!%p4679_p10)
}
  0xc1   : > { %4236 = dma.hbm_to_vmem [thread:$0]  (!%p4988_p5), %s6539_s7, 16, %s330_s2, [#allocation16]  }
  0xc2   : > { %s3765_s15 = sadd.s32 4294967294, %s4861_s12   ;;  %s39_s25 = sadd.s32 1, %s4853_s10 }
  0xc3   : > { %p40_p7 = scmp.ge.s32.totalorder %s39_s25, 2  ;;  %s42_s17 = sadd.s32 1, %s4857_s11 }
  0xc4   : > { %s51_s18 = sadd.s32 1, %s4841_s29  ;;  %p58_p1 = scmp.ne.s32.totalorder %s4841_s29, %s4837_s28 }
  0xc5   : > { %s6617_s25 = smov (%p40_p7, %s39_s25), 0  ;;  %s6619_s17 = smov (!%p40_p7, %s42_s17), %s4857_s11 }
  0xc6   : > { %s47_s20 = ssub.s32 %s4853_s10, %s6617_s25  ;;  %p59_p3 = scmp.eq.s32.totalorder %s4861_s12, 0 }
  0xc7   : > { %p44_p11 = scmp.ge.s32.totalorder %s6619_s17, 2  ;;  %p64_p5 = scmp.ne.s32.totalorder %s4837_s28, %s4833_s27 }
  0xc8   : > { %p5142_p12 = por %p59_p3, %p58_p1  ;;  %p244_p13 = scmp.eq.s32.totalorder %s4973_s13, 3 }
  0xc9   : > { %s6621_s17 = smov (%p44_p11, %s6619_s17), 0  ;;  %p6542_p0 = scmp.eq.s32.totalorder %s4973_s13, 0 }
  0xca   : > { %6541 = sst [smem:[#allocation28_spill]] %s6621_s17  ;;  %p5155_p4 = por %p244_p13, %p58_p1 }
  0xcb   : > { %p5151_p2 = por %p6542_p0, %p64_p5  ;;  %s46_s8 = ssub.s32 %s4857_s11, %s6621_s17 }
  0xcc   : > { %s6544_s16 = scalar_select %p5155_p4, 1, 0 }
  0xcd   : > { %p250_p6 = scmp.eq.s32.totalorder %s3765_s15, 3  ;;  %s48_s19 = sor.u32 %s47_s20, %s46_s8 }
  0xce   : > { %p4254_p8 = scmp.lt.s32.totalorder %s4861_s12, 4  ;;  %p49_p9 = scmp.eq.s32.totalorder %s48_s19, 0 }
  0xcf   : > { %p5162_p10 = por %p250_p6, %p64_p5  ;;  %s5167_s26 = sand.u32 1, %s4841_s29  }
  0xd0   : > { %s4185_s14 = smul.u32 36, %s4853_s10  ;;  %p5177_p7 = pnand %p4254_p8, %p5142_p12 }
  0xd1   : > { %s6545_s21 = scalar_select %p5162_p10, 1, 0 }
  0xd2   : > { %s5171_s30 = scalar_select %p49_p9, %s4841_s29, %s51_s18  }
  0xd3   : > { %s4184_s9 = smul.u32 144, %s5167_s26  ;;  %s6547_s0 = sld [smem:[#allocation29_spill]] }
  0xd4   : > { %s4186_s23 = smul.u32 72, %s4857_s11  ;;  %s341_s2 = scalar_lea.sflag [#allocation4], %s5167_s26 }
  0xd5   : > { %s344_s8 = scalar_lea.vmem [#allocation3], %s4184_s9  ;;  %p4685_p3 = pneg %p5177_p7 }
  0xd6   : > { %s350_s20 = sadd.s32 %s4186_s23, %s4185_s14  ;;  %s353_s19 = sshll.u32 %s344_s8, 4  ;;  %s5182_s19 = int_to_ptr.vmem [resolvable:$true] %s353_s19 }
  0xd7   : > { %s3774_s3 = sshll.u32 %s350_s20, 6 }
  0xd9   : > { %s5187_s18 = scalar_lea.hbm %s6547_s0, %s3774_s3  ;;  %s4688_s9 = scalar_lea.hbm %s6547_s0, 9216 }
  0xda   : > { %s4683_s6 = scalar_lea.hbm %s5187_s18, 2304  ;;  %p4689_p12 = scmp.lt.u32.totalorder %s5187_s18, %s6547_s0 }
  0xdb   : > { %p4684_p1 = scmp.ne.s32.totalorder %s5187_s18, %s4683_s6  ;;  %p4690_p13 = scmp.lt.u32.totalorder %s4688_s9, %s4683_s6 }
  0xdc   : > { %p4692_p6 = scmp.lt.u32.totalorder %s4683_s6, %s5187_s18 }
  0xdd   : > { %p4686_p11 = pnand %p4685_p3, %p4684_p1  ;;  %p4691_p0 = por %p4690_p13, %p4689_p12 }
  0xdf   : > { %p4687_p5 = pneg %p4686_p11  ;;  %p4693_p8 = por %p4692_p6, %p4691_p0 }
  0xe1   : > { %p4694_p9 = pnand %p4693_p8, %p4687_p5 }
  0xe3   : > { %4697 = shalt.err (!%p4694_p9)
}
  0xe4   : > { %s4698_s5 = scalar_lea.vmem %s5182_s19, 2304  ;;  %s4871_s20 = smov [#allocation3]  }
  0xe5   : > { %p4699_p1 = scmp.ne.s32.totalorder %s5182_s19, %s4698_s5  ;;  %s4703_s8 = sshll.u32 %s4871_s20, 4  ;;  %s4704_s8 = int_to_ptr.vmem [resolvable:$false] %s4703_s8 }
  0xe6   : > { %s4705_s23 = scalar_lea.vmem %s4704_s8, 4608  ;;  %p4706_p4 = scmp.lt.s32.totalorder %s5182_s19, %s4704_s8 }
  0xe7   : > { %p4701_p11 = pnand %p4699_p1, %p4685_p3  ;;  %p4707_p12 = scmp.lt.s32.totalorder %s4705_s23, %s4698_s5 }
  0xe9   : > { %p4702_p10 = pneg %p4701_p11  ;;  %p4708_p13 = por %p4707_p12, %p4706_p4 }
  0xeb   : > { %p4709_p0 = pnand %p4708_p13, %p4702_p10 }
  0xed   : > { %4712 = shalt.err (!%p4709_p0)
}
  0xee   : > { %s6548_s6 = smov 4   ;;  %s6549_s14 = smov 64  }
  0xef   : > { %4240 = dma.hbm_to_vmem [thread:$0]  (!%p5177_p7), %s5187_s18, 2304, %s5182_s19, %s341_s2, %s6549_s14, %s6549_s14, %s6548_s6  }
  0xf0   : > { %s3775_s9 = sshll.u32 %s5167_s26, 7  ;;  %s4088_s4 = sshll.u32 %s4853_s10, 4 }
  0xf1   : > { %s3778_s3 = sshll.u32 %s4857_s11, 5  ;;  %s367_s5 = scalar_lea.vmem [#allocation6], %s3775_s9 }
  0xf2   : > { %s377_s20 = sshll.u32 %s367_s5, 4  ;;  %s374_s8 = sadd.s32 %s4088_s4, %s3778_s3  ;;  %s5223_s20 = int_to_ptr.vmem [resolvable:$true] %s377_s20 }
  0xf3   : > { %s3779_s23 = sshll.u32 %s374_s8, 7  ;;  %s6550_s17 = sand.u32 1, %s4861_s12  }
  0xf4   : > { %s5228_s7 = scalar_lea.hbm %s6500_s1, %s3779_s23  ;;  %s5232_s19 = scalar_lea.sflag [#allocation7], %s6550_s17 }
  0xf5   : > { %s4713_s26 = scalar_lea.hbm %s5228_s7, 2048  ;;  %s4718_s6 = scalar_lea.hbm %s6500_s1, 8192 }
  0xf6   : > { %p4714_p4 = scmp.ne.s32.totalorder %s5228_s7, %s4713_s26  ;;  %p4719_p6 = scmp.lt.u32.totalorder %s5228_s7, %s6500_s1 }
  0xf7   : > { %p4720_p8 = scmp.lt.u32.totalorder %s4718_s6, %s4713_s26  ;;  %p4722_p1 = scmp.lt.u32.totalorder %s4713_s26, %s5228_s7 }
  0xf8   : > { %p4716_p10 = pnand %p4714_p4, %p4685_p3 }
  0xf9   : > { %p4721_p9 = por %p4720_p8, %p4719_p6 }
  0xfa   : > { %p4717_p5 = pneg %p4716_p10 }
  0xfb   : > { %p4723_p11 = por %p4722_p1, %p4721_p9 }
  0xfd   : > { %p4724_p12 = pnand %p4723_p11, %p4717_p5 }
  0xff   : > { %4727 = shalt.err (!%p4724_p12)
}
 0x100   : > { %s4728_s17 = scalar_lea.vmem %s5223_s20, 2048  ;;  %s4872_s14 = smov [#allocation6]  }
 0x101   : > { %p4729_p13 = scmp.ne.s32.totalorder %s5223_s20, %s4728_s17  ;;  %s4733_s9 = sshll.u32 %s4872_s14, 4  ;;  %s4734_s9 = int_to_ptr.vmem [resolvable:$false] %s4733_s9 }
 0x102   : > { %s4735_s4 = scalar_lea.vmem %s4734_s9, 4096  ;;  %p4736_p10 = scmp.lt.s32.totalorder %s5223_s20, %s4734_s9 }
 0x103   : > { %p4731_p0 = pnand %p4729_p13, %p4685_p3  ;;  %p4737_p6 = scmp.lt.s32.totalorder %s4735_s4, %s4728_s17 }
 0x105   : > { %p4732_p4 = pneg %p4731_p0  ;;  %p4738_p8 = por %p4737_p6, %p4736_p10 }
 0x107   : > { %p4739_p9 = pnand %p4738_p8, %p4732_p4 }
 0x109   : > { %4742 = shalt.err (!%p4739_p9)
}
 0x10a   : > { %s4873_s3 = smov 128   ;;  %s4874_s5 = smov 8  }
 0x10b   : > { %4243 = dma.hbm_to_vmem [thread:$0]  (!%p5177_p7), %s5228_s7, 2048, %s5223_s20, %s5232_s19, %s4873_s3, %s4873_s3, %s4874_s5  }
 0x10c   : > { %s6551_s8 = sld [smem:[#allocation27_spill]] }
 0x112   : > { %p6552_p3 = scmp.ne.s32.totalorder %s6551_s8, 0 }
 0x113   : > { %s5261_s23 = sand.u32 (!%p6552_p3), 1, %s4837_s28  }
 0x114   : > { %389 = sbr.rel (%p6552_p3) target bundleno = 1322 (0x52a), region = 52  ;;  %s392_s18 = scalar_lea.sflag (!%p6552_p3), [#allocation4], %s5261_s23 }
 0x115   : > { %s4187_s26 = smul.u32 (!%p6552_p3), 144, %s5261_s23 }
 0x117   : > { %s5265_s2 = scalar_lea.vmem (!%p6552_p3), [#allocation3], %s4187_s26 }
 0x11b   : > { %4804 = dma.done.wait (%p5151_p2), %s392_s18, 2304  }
 0x11c   : > { %4806 = vsyncadd (%p5151_p2), %s392_s18, 4294964992  ;;  %s400_s7 = sand.u32 1, %s4973_s13   ;;  %s3781_s24 = sshll.u32 %s5261_s23, 7 }
 0x11d   : > { %s401_s20 = scalar_lea.sflag [#allocation7], %s400_s7  ;;  %s5275_s19 = scalar_lea.vmem [#allocation6], %s3781_s24 }
 0x11e   : > { %4808 = dma.done.wait (%p5151_p2), %s401_s20, 2048  }
 0x11f   : > { %4810 = vsyncadd (%p5151_p2), %s401_s20, 4294965248  ;;  %p6553_p7 = scmp.eq.s32.totalorder %s4973_s13, 0 }
 0x121   : > { %4812 = dma.done.wait (%p6553_p7), [#allocation7], 320   ;;  %p6554_p5 = pmov %p6553_p7 }
 0x123   : > { %4814 = vsyncadd (%p6554_p5), [#allocation7], 4294966976  ;;  %p6555_p1 = pmov %p6554_p5 }
 0x125   : > { %4816 = dma.done.wait (%p6555_p1), [#allocation10], 32   ;;  %p6556_p11 = pmov %p6555_p1 }
 0x126   : > { %p6557_p12 = pmov %p6555_p1 }
 0x127   : > { %4818 = vsyncadd (%p6556_p11), [#allocation10], 4294967264 }
 0x128   : > { %4820 = dma.done.wait (%p6557_p12), [#allocation13], 336   ;;  %p6558_p13 = pmov %p6555_p1 }
 0x129   : > { %p6559_p2 = pmov %p6555_p1 }
 0x12a   : > { %4822 = vsyncadd (%p6558_p13), [#allocation13], 4294966960 }
 0x12b   : > { %4824 = dma.done.wait (%p6559_p2), [#allocation16], 16   ;;  %p6560_p0 = pmov %p6555_p1 }
 0x12c   : > { %v3791_v0 = vld [vmem:[%s5265_s2 + $0x18] sm:$0xf]  ;;  %v3792_v1 = vld [vmem:[%s5265_s2 + $0x1c] sm:$0xf]  ;;  %v3789_v5 = vld [vmem:[%s5265_s2 + $0xc] sm:$0xf] }
 0x12d   : > { %4826 = vsyncadd (%p6560_p0), [#allocation16], 4294967280  ;;  %v3820_v2 = vld [vmem:[%s5265_s2 + $0x18] sm:$0xe]  ;;  %v5300_v3 = vcombine.low %v3791_v0, %v3792_v1  ;;  %v3790_v6 = vld [vmem:[%s5265_s2 + $0x10] sm:$0xf] }
 0x12e   : > { %v3920_v4 = vcombine.low %v3820_v2, %v3792_v1  ;;  %v3819_v7 = vld [vmem:[%s5265_s2 + $0xc] sm:$0xe]  ;;  %v5305_v8 = vcombine.low %v3789_v5, %v3790_v6  ;;  %vm842_vm0 = vcmask 1046528   ;;  %v5308_v10 = vld [vmem:[%s5265_s2 + $0x14] ss:$0 sps:$4 sm:$0x11]  }
 0x12f   : > { %v3919_v9 = vcombine.low %v3819_v7, %v3790_v6  ;;  %s4875_s13 = smov 12   ;;  %v1008_v11 = vshll.u32 %v5300_v3, 16  ;;  %v470_v12 = vld [vmem:[%s5265_s2 + $0x4] sm:$0xf]  ;;  %vm671_vm1 = vsmask.f32 7424 }
 0x130   : > { %945 = vrot.lane.b32.xlu1 %v5300_v3, %s4875_s13  ;;  %943 = vrot.lane.b32.xlu0 %v5305_v8, %s4875_s13  ;;  %v996_v13 = vshll.u32 %v5305_v8, 16  ;;  %v1164_v15 = vrot.slane %v5308_v10, 1  ;;  %v499_v16 = vld [vmem:[%s5265_s2] sm:$0xe]  ;;  %v1166_v17 = vrot.slane %v3920_v4, 1  ;;  %v1006_v21 = vshrl.u32 %v5300_v3, 16 }
 0x131   : > { %v1163_v14 = vrot.slane %v3919_v9, 1  ;;  %v4352_v18 = vld [vmem:[%s5265_s2 + $0x8] ss:$0 sps:$4 sm:$0x11]   ;;  %v3889_v19 = vcombine.low %v499_v16, %v470_v12  ;;  %v469_v20 = vld [vmem:[%s5265_s2] sm:$0xf] }
 0x132   : > { %v5323_v23 = vcombine.low %v469_v20, %v470_v12  ;;  %v471_v24 = vld [vmem:[%s5265_s2 + $0xc] sm:$0xf]  ;;  %v472_v25 = vld [vmem:[%s5265_s2 + $0x10] sm:$0xf]  ;;  %v844_v27 = vrot.slane %v4352_v18, 1  ;;  %v680_v30 = vshll.u32 %v4352_v18, 16 }
 0x133   : > { %v1165_v22 = vsel %vm842_vm0, %v1163_v14, %v1164_v15  ;;  %v843_v26 = vrot.slane %v3889_v19, 1  ;;  %v500_v28 = vld [vmem:[%s5265_s2 + $0xc] sm:$0xe]  ;;  %v5328_v29 = vcombine.low %v471_v24, %v472_v25  ;;  %s4876_s22 = smov 20   ;;  %v1010_v35 = vrot.slane %v1008_v11, 1  ;;  %s4877_s6 = smov 8  }
 0x134   : > { %1193 = vrot.lane.b32.xlu0 %v1165_v22, %s4876_s22  ;;  %v4356_v31 = vld [vmem:[%s5265_s2 + $0x14] ss:$0 sps:$4 sm:$0x11]   ;;  %v3890_v32 = vcombine.low %v500_v28, %v472_v25  ;;  %v673_v33 = vshrl.u32 %v5323_v23, 16  ;;  %v675_v34 = vshll.u32 %v5323_v23, 16  ;;  %v682_v37 = vrot.slane %v680_v30, 1 }
 0x135   : > { %v845_v36 = vsel %vm842_vm0, %v843_v26, %v844_v27  ;;  %v4358_v38 = vld [vmem:[%s5265_s2 + $0x20] ss:$0 sps:$4 sm:$0x11]   ;;  %v847_v40 = vrot.slane %v4356_v31, 1  ;;  %v685_v42 = vshrl.u32 %v5328_v29, 16  ;;  %v687_v45 = vshll.u32 %v5328_v29, 16 }
 0x136   : > { %873 = vrot.lane.b32.xlu1 %v845_v36, %s4877_s6  ;;  %v846_v39 = vrot.slane %v3890_v32, 1  ;;  %v677_v41 = vrot.slane %v675_v34, 1  ;;  %v3831_v43 = vld [vmem:[%s5265_s2 + $0x24] sm:$0xf]  ;;  %v1167_v44 = vrot.slane %v4358_v38, 1  ;;  %v692_v46 = vshll.u32 %v4356_v31, 16 }
 0x137   : > { %v1013_v47 = vshll.u32 %v4358_v38, 16  ;;  %v5341_v48 = vld [vmem:[%s5265_s2 + $0x28] sm:$0xf]  ;;  %v994_v51 = vshrl.u32 %v5305_v8, 16  ;;  %v998_v52 = vrot.slane %v996_v13, 1  ;;  %v689_v54 = vrot.slane %v687_v45, 1 }
 0x138   : > { %v848_v49 = vsel %vm842_vm0, %v846_v39, %v847_v40  ;;  %v678_v50 = vor.u32 %v677_v41, %v673_v33  ;;  %v3829_v53 = vld [vmem:[%s5265_s2 + $0x18] sm:$0xf]  ;;  %v694_v55 = vrot.slane %v692_v46, 1  ;;  %v3830_v56 = vld [vmem:[%s5265_s2 + $0x1c] sm:$0xf]  ;;  %v4425_v57 = vld [vmem:[#allocation8] sm:$0xff]   ;;  %v1011_v59 = vor.u32 %v1010_v35, %v1006_v21 }
 0x139   : > { %v1001_v60 = vshll.u32 %v5308_v10, 16  ;;  %v3930_v61 = vcombine.low %v3831_v43, %v5341_v48  ;;  %s4878_s0 = smov 4   ;;  %v1168_v62 = vsel %vm842_vm0, %v1166_v17, %v1167_v44  ;;  %v690_v63 = vor.u32 %v689_v54, %v685_v42  ;;  %v5354_v2 = vld [vmem:[%s5265_s2 + $0x2c] ss:$0 sps:$4 sm:$0x11]   ;;  %4134 = vmatprep.subr.bf16.mxu0 %v4425_v57  ;;  %s4879_s15 = smov 16  }
 0x13a   : > { %875 = vrot.lane.b32.xlu1 %v848_v49, %s4877_s6  ;;  %v683_v58 = vsel %vm671_vm1, %v678_v50, %v682_v37  ;;  %v1015_v0 = vrot.slane %v1013_v47, 1  ;;  %v3929_v1 = vcombine.low %v3829_v53, %v3830_v56  ;;  %v999_v3 = vor.u32 %v998_v52, %v994_v51  ;;  %v3859_v6 = vld [vmem:[%s5265_s2 + $0x18] sm:$0xe]  ;;  %v5358_v7 = vld [vmem:[%s5265_s2 + $0x20] ss:$0 sps:$4 sm:$0x11]   ;;  %4135 = vmatpush3.bf16.msra.mxu0 %v4425_v57 }
 0x13b   : > { %792 = vrot.lane.b32.xlu0 %v683_v58, %s4878_s0  ;;  %v1003_v4 = vrot.slane %v1001_v60, 1  ;;  %v1328_v5 = vshll.u32 %v3930_v61, 16  ;;  %v695_v8 = vsel %vm671_vm1, %v690_v63, %v694_v55  ;;  %v1326_v10 = vshrl.u32 %v3930_v61, 16  ;;  %v473_v11 = vld [vmem:[%s5265_s2 + $0x18] sm:$0xf]  ;;  %s4880_s17 = smov 24  }
 0x13c   : > { %v1316_v9 = vshll.u32 %v3929_v1, 16  ;;  %v4430_v12 = vld [vmem:[#allocation8 + $0x8] sm:$0xff]   ;;  %v1333_v14 = vshll.u32 %v5354_v2, 16  ;;  %v1016_v16 = vsel %vm671_vm1, %v1011_v59, %v1015_v0  ;;  %v1314_v17 = vshrl.u32 %v3929_v1, 16  ;;  %v475_v24 = vld [vmem:[%s5265_s2 + $0x24] sm:$0xf] }
 0x13d   : > { %v1330_v13 = vrot.slane %v1328_v5, 1  ;;  %v5365_v15 = vld [vmem:[%s5265_s2 + $0x1c] sm:$0xf]  ;;  %v5373_v19 = vld [vmem:[%s5265_s2 + $0x20] ss:$0 sps:$4 sm:$0x11]   ;;  %4136 = vmatprep.subr.bf16.mxu0 %v4430_v12  ;;  %v1004_v20 = vsel %vm671_vm1, %v999_v3, %v1003_v4  ;;  %v3949_v26 = vcombine.low %v3859_v6, %v3830_v56 }
 0x13e   : > { %1195 = vrot.lane.b32.xlu1 %v1168_v62, %s4876_s22  ;;  %v5370_v18 = vcombine.low %v473_v11, %v5365_v15  ;;  %v1318_v21 = vrot.slane %v1316_v9, 1  ;;  %v1321_v22 = vshll.u32 %v5358_v7, 16  ;;  %v476_v25 = vld [vmem:[%s5265_s2 + $0x28] sm:$0xf]  ;;  %4137 = vmatpush3.bf16.msra.mxu0 %v4430_v12  ;;  %v1335_v30 = vrot.slane %v1333_v14, 1  ;;  %s4881_s14 = smov 28  }
 0x13f   : > { %794 = vrot.lane.b32.xlu0 %v695_v8, %s4878_s0  ;;  %v1331_v28 = vor.u32 %v1330_v13, %v1326_v10  ;;  %v704_v31 = vshll.u32 %v5373_v19, 16  ;;  %v5382_v32 = vcombine.low %v475_v24, %v476_v25  ;;  %v4368_v35 = vld [vmem:[%s5265_s2 + $0x2c] ss:$0 sps:$4 sm:$0x11]   ;;  %v3860_v39 = vld [vmem:[%s5265_s2 + $0x24] sm:$0xe] }
 0x140   : > { %v699_v27 = vshll.u32 %v5370_v18, 16  ;;  %v697_v33 = vshrl.u32 %v5370_v18, 16  ;;  %v1319_v36 = vor.u32 %v1318_v21, %v1314_v17  ;;  %v1323_v37 = vrot.slane %v1321_v22, 1  ;;  %v502_v44 = vld [vmem:[%s5265_s2 + $0x24] sm:$0xe]  ;;  %s4882_s9 = smov 32  }
 0x141   : > { %v711_v38 = vshll.u32 %v5382_v32, 16  ;;  %v1336_v40 = vsel %vm671_vm1, %v1331_v28, %v1335_v30  ;;  %v706_v41 = vrot.slane %v704_v31, 1  ;;  %v1483_v42 = vrot.slane %v3949_v26, 1  ;;  %v501_v50 = vld [vmem:[%s5265_s2 + $0x18] sm:$0xe]  ;;  %s6024_s4 = scalar_lea.vmem [#allocation17], %s3781_s24 }
 0x142   : > { %1115 = vrot.lane.b32.xlu1 %v1016_v16, %s4879_s15  ;;  %v701_v34 = vrot.slane %v699_v27, 1  ;;  %v1484_v43 = vrot.slane %v5358_v7, 1  ;;  %v709_v46 = vshrl.u32 %v5382_v32, 16  ;;  %v716_v49 = vshll.u32 %v4368_v35, 16  ;;  %v3795_v53 = vld [vmem:[%s5265_s2 + $0x30] sm:$0xf] }
 0x143   : > { %1113 = vrot.lane.b32.xlu0 %v1004_v20, %s4879_s15  ;;  %v713_v47 = vrot.slane %v711_v38, 1  ;;  %v3950_v51 = vcombine.low %v3860_v39, %v5341_v48  ;;  %v1324_v52 = vsel %vm671_vm1, %v1319_v36, %v1323_v37  ;;  %v3796_v54 = vld [vmem:[%s5265_s2 + $0x34] sm:$0xf]  ;;  %v3793_v55 = vld [vmem:[%s5265_s2 + $0x24] sm:$0xf]  ;;  %v3892_v58 = vcombine.low %v502_v44, %v476_v25  ;;  %s6569_s3 = sld [smem:[#allocation25_spill]] }
 0x144   : > { %v702_v45 = vor.u32 %v701_v34, %v697_v33  ;;  %v3794_v56 = vld [vmem:[%s5265_s2 + $0x28] sm:$0xf]  ;;  %v1485_v57 = vsel %vm842_vm0, %v1483_v42, %v1484_v43  ;;  %v3902_v48 = vcombine.low %v3795_v53, %v3796_v54  ;;  %v1487_v63 = vrot.slane %v5354_v2, 1  ;;  %v5410_v3 = vld [vmem:[%s5265_s2 + $0x38] ss:$0 sps:$4 sm:$0x11]  }
 0x145   : > { %v714_v60 = vor.u32 %v713_v47, %v709_v46  ;;  %v1486_v62 = vrot.slane %v3950_v51, 1  ;;  %v3891_v0 = vcombine.low %v501_v50, %v5365_v15  ;;  %v852_v5 = vrot.slane %v3892_v58, 1  ;;  %v4376_v11 = vld [vmem:[%s5265_s2 + $0x2c] ss:$0 sps:$4 sm:$0x11]  }
 0x146   : > { %1265 = vrot.lane.b32.xlu1 %v3930_v61, %s4880_s17  ;;  %v707_v59 = vsel %vm671_vm1, %v702_v45, %v706_v41  ;;  %v718_v61 = vrot.slane %v716_v49, 1  ;;  %v853_v6 = vrot.slane %v4368_v35, 1  ;;  %v1032_v7 = vshll.u32 %v3902_v48, 16  ;;  %v3822_v12 = vld [vmem:[%s5265_s2 + $0x30] sm:$0xe] }
 0x147   : > { %1263 = vrot.lane.b32.xlu0 %v3929_v1, %s4880_s17  ;;  %v3901_v1 = vcombine.low %v3793_v55, %v3794_v56  ;;  %v1488_v2 = vsel %vm842_vm0, %v1486_v62, %v1487_v63  ;;  %v849_v8 = vrot.slane %v3891_v0, 1  ;;  %v850_v9 = vrot.slane %v5373_v19, 1  ;;  %v3821_v13 = vld [vmem:[%s5265_s2 + $0x24] sm:$0xe]  ;;  %v3835_v21 = vld [vmem:[%s5265_s2 + $0x3c] sm:$0xf] }
 0x148   : > { %v719_v4 = vsel %vm671_vm1, %v714_v60, %v718_v61  ;;  %v1030_v14 = vshrl.u32 %v3902_v48, 16  ;;  %v1037_v15 = vshll.u32 %v5410_v3, 16  ;;  %v854_v16 = vsel %vm842_vm0, %v852_v5, %v853_v6  ;;  %v5425_v22 = vld [vmem:[%s5265_s2 + $0x40] sm:$0xf]  ;;  %v3833_v26 = vld [vmem:[%s5265_s2 + $0x30] sm:$0xf] }
 0x149   : > { %v1020_v10 = vshll.u32 %v3901_v1, 16  ;;  %v1034_v17 = vrot.slane %v1032_v7, 1  ;;  %v1018_v20 = vshrl.u32 %v3901_v1, 16  ;;  %v851_v19 = vsel %vm842_vm0, %v849_v8, %v850_v9  ;;  %v3834_v27 = vld [vmem:[%s5265_s2 + $0x34] sm:$0xf]  ;;  %p3994_p4 = scmp.ne.s32.totalorder %s6569_s3, 0 }
 0x14a   : > { %1435 = vrot.lane.b32.xlu1 %v1336_v40, %s4881_s14  ;;  %v1025_v25 = vshll.u32 %v4376_v11, 16  ;;  %v3922_v28 = vcombine.low %v3822_v12, %v3796_v54  ;;  %v3921_v30 = vcombine.low %v3821_v13, %v3794_v56  ;;  %v3932_v31 = vcombine.low %v3835_v21, %v5425_v22  ;;  %v477_v38 = vld [vmem:[%s5265_s2 + $0x30] sm:$0xf]  ;;  %v5435_v39 = vld [vmem:[%s5265_s2 + $0x34] sm:$0xf] }
 0x14b   : > { %1433 = vrot.lane.b32.xlu0 %v1324_v52, %s4881_s14  ;;  %v1022_v24 = vrot.slane %v1020_v10, 1  ;;  %v1035_v33 = vor.u32 %v1034_v17, %v1030_v14  ;;  %v1039_v34 = vrot.slane %v1037_v15, 1  ;;  %v3931_v35 = vcombine.low %v3833_v26, %v3834_v27  ;;  %v5440_v45 = vld [vmem:[%s5265_s2 + $0x44] ss:$0 sps:$4 sm:$0x11]  }
 0x14c   : > { %v1027_v37 = vrot.slane %v1025_v25, 1  ;;  %v1172_v40 = vrot.slane %v3922_v28, 1  ;;  %v1173_v41 = vrot.slane %v5410_v3, 1  ;;  %v1169_v42 = vrot.slane %v3921_v30, 1  ;;  %v479_v52 = vld [vmem:[%s5265_s2 + $0x3c] sm:$0xf] }
 0x14d   : > { %v1023_v36 = vor.u32 %v1022_v24, %v1018_v20  ;;  %v1170_v43 = vrot.slane %v4376_v11, 1  ;;  %v1352_v44 = vshll.u32 %v3932_v31, 16  ;;  %v1040_v46 = vsel %vm671_vm1, %v1035_v33, %v1039_v34  ;;  %v4382_v49 = vld [vmem:[%s5265_s2 + $0x38] ss:$0 sps:$4 sm:$0x11]  }
 0x14e   : > { %796 = vrot.lane.b32.xlu1 %v707_v59, %s4878_s0  ;;  %v1340_v47 = vshll.u32 %v3931_v35, 16  ;;  %v5446_v50 = vcombine.low %v477_v38, %v5435_v39  ;;  %v480_v53 = vld [vmem:[%s5265_s2 + $0x40] sm:$0xf]  ;;  %v1350_v54 = vshrl.u32 %v3932_v31, 16  ;;  %v1357_v56 = vshll.u32 %v5440_v45, 16 }
 0x14f   : > { %1513 = vrot.lane.b32.xlu0 %v1485_v57, %s4882_s9  ;;  %v1028_v51 = vsel %vm671_vm1, %v1023_v36, %v1027_v37  ;;  %v1354_v55 = vrot.slane %v1352_v44, 1  ;;  %v5454_v57 = vld [vmem:[%s5265_s2 + $0x38] ss:$0 sps:$4 sm:$0x11]   ;;  %v1174_v58 = vsel %vm842_vm0, %v1172_v40, %v1173_v41  ;;  %v3861_v59 = vld [vmem:[%s5265_s2 + $0x30] sm:$0xe]  ;;  %v5460_v61 = vcombine.low %v479_v52, %v480_v53 }
 0x150   : > { %v723_v60 = vshll.u32 %v5446_v50, 16  ;;  %v1338_v62 = vshrl.u32 %v3931_v35, 16  ;;  %v1342_v63 = vrot.slane %v1340_v47, 1  ;;  %v1345_v0 = vshll.u32 %v4382_v49, 16  ;;  %v504_v24 = vld [vmem:[%s5265_s2 + $0x3c] sm:$0xe] }
 0x151   : > { %v3951_v3 = vcombine.low %v3861_v59, %v3834_v27  ;;  %v1359_v5 = vrot.slane %v1357_v56, 1  ;;  %v728_v6 = vshll.u32 %v5454_v57, 16  ;;  %v721_v7 = vshrl.u32 %v5446_v50, 16  ;;  %v4386_v8 = vld [vmem:[%s5265_s2 + $0x44] ss:$0 sps:$4 sm:$0x11]  }
 0x152   : > { %798 = vrot.lane.b32.xlu1 %v719_v4, %s4878_s0  ;;  %v1355_v4 = vor.u32 %v1354_v55, %v1350_v54  ;;  %v735_v9 = vshll.u32 %v5460_v61, 16  ;;  %v1343_v10 = vor.u32 %v1342_v63, %v1338_v62  ;;  %v1347_v11 = vrot.slane %v1345_v0, 1  ;;  %v3800_v26 = vld [vmem:[%s5265_s2 + $0x4c] sm:$0xf]  ;;  %v503_v27 = vld [vmem:[%s5265_s2 + $0x30] sm:$0xe] }
 0x153   : > { %1515 = vrot.lane.b32.xlu0 %v1488_v2, %s4882_s9  ;;  %v725_v2 = vrot.slane %v723_v60, 1  ;;  %v730_v14 = vrot.slane %v728_v6, 1  ;;  %v1489_v15 = vrot.slane %v3951_v3, 1  ;;  %v733_v20 = vshrl.u32 %v5460_v61, 16  ;;  %v3797_v28 = vld [vmem:[%s5265_s2 + $0x3c] sm:$0xf] }
 0x154   : > { %v1360_v13 = vsel %vm671_vm1, %v1355_v4, %v1359_v5  ;;  %v737_v21 = vrot.slane %v735_v9, 1  ;;  %v1348_v25 = vsel %vm671_vm1, %v1343_v10, %v1347_v11  ;;  %v3798_v30 = vld [vmem:[%s5265_s2 + $0x40] sm:$0xf]  ;;  %v3894_v33 = vcombine.low %v504_v24, %v480_v53  ;;  %v4394_v53 = vld [vmem:[%s5265_s2 + $0x44] ss:$0 sps:$4 sm:$0x11]  }
 0x155   : > { %v726_v17 = vor.u32 %v725_v2, %v721_v7  ;;  %v1493_v40 = vrot.slane %v5440_v45, 1  ;;  %v3893_v41 = vcombine.low %v503_v27, %v5435_v39  ;;  %v856_v52 = vrot.slane %v5454_v57, 1  ;;  %v3839_v54 = vld [vmem:[%s5265_s2 + $0x54] sm:$0xf]  ;;  %v5498_v55 = vld [vmem:[%s5265_s2 + $0x58] sm:$0xf] }
 0x156   : > { %879 = vrot.lane.b32.xlu1 %v854_v16, %s4877_s6  ;;  %v1490_v16 = vrot.slane %v4382_v49, 1  ;;  %v858_v44 = vrot.slane %v3894_v33, 1  ;;  %v4393_v49 = vld [vmem:[%s5265_s2 + $0x50] ss:$0 sps:$4 sm:$0x11]   ;;  %v3934_v3 = vcombine.low %v3839_v54, %v5498_v55  ;;  %vm1742_vm2 = vcmask 1041408  }
 0x157   : > { %877 = vrot.lane.b32.xlu0 %v851_v19, %s4877_s6  ;;  %v740_v19 = vshll.u32 %v4386_v8, 16  ;;  %v731_v34 = vsel %vm671_vm1, %v726_v17, %v730_v14  ;;  %v855_v45 = vrot.slane %v3893_v41, 1  ;;  %v3823_v62 = vld [vmem:[%s5265_s2 + $0x3c] sm:$0xe]  ;;  %v3837_v4 = vld [vmem:[%s5265_s2 + $0x48] sm:$0xf] }
 0x158   : > { %v1491_v38 = vsel %vm842_vm0, %v1489_v15, %v1490_v16  ;;  %v3838_v5 = vld [vmem:[%s5265_s2 + $0x4c] sm:$0xf]  ;;  %v3923_v7 = vcombine.low %v3823_v62, %v3798_v30  ;;  %v481_v9 = vld [vmem:[%s5265_s2 + $0x48] sm:$0xf]  ;;  %v1376_v14 = vshll.u32 %v3934_v3, 16  ;;  %v1179_v17 = vrot.slane %v4393_v49, 1 }
 0x159   : > { %v742_v36 = vrot.slane %v740_v19, 1  ;;  %v857_v57 = vsel %vm842_vm0, %v855_v45, %v856_v52  ;;  %v5512_v10 = vld [vmem:[%s5265_s2 + $0x4c] sm:$0xf]  ;;  %v5515_v15 = vld [vmem:[%s5265_s2 + $0x5c] ss:$0 sps:$4 sm:$0x11]  }
 0x15a   : > { %949 = vrot.lane.b32.xlu1 %v3902_v48, %s4875_s13  ;;  %v1171_v48 = vsel %vm842_vm0, %v1169_v42, %v1170_v43  ;;  %v3903_v42 = vcombine.low %v3797_v28, %v3798_v30  ;;  %v1175_v19 = vrot.slane %v3923_v7, 1  ;;  %v5524_v24 = vld [vmem:[%s5265_s2 + $0x50] ss:$0 sps:$4 sm:$0x11]   ;;  %v483_v27 = vld [vmem:[%s5265_s2 + $0x54] sm:$0xf] }
 0x15b   : > { %947 = vrot.lane.b32.xlu0 %v3901_v1, %s4875_s13  ;;  %v3862_v1 = vld [vmem:[%s5265_s2 + $0x3c] sm:$0xe]  ;;  %v5529_v28 = vld [vmem:[%s5265_s2 + $0x58] sm:$0xf]  ;;  %v3863_v30 = vld [vmem:[%s5265_s2 + $0x48] sm:$0xe] }
 0x15c   : > { %v3952_v12 = vcombine.low %v3862_v1, %v5425_v22  ;;  %v3799_v22 = vld [vmem:[%s5265_s2 + $0x48] sm:$0xf]  ;;  %v1044_v39 = vshll.u32 %v3903_v42, 16  ;;  %v1042_v63 = vshrl.u32 %v3903_v42, 16  ;;  %v1049_v1 = vshll.u32 %v4394_v53, 16 }
 0x15d   : > { %v3904_v37 = vcombine.low %v3799_v22, %v3800_v26  ;;  %v1176_v22 = vrot.slane %v4394_v53, 1  ;;  %v1378_v33 = vrot.slane %v1376_v14, 1  ;;  %v505_v7 = vld [vmem:[%s5265_s2 + $0x48] sm:$0xe]  ;;  %vm1533_vm3 = vcmask 31744  }
 0x15e   : > { %1119 = vrot.lane.b32.xlu1 %v1040_v46, %s4879_s15  ;;  %v859_v46 = vrot.slane %v4386_v8, 1  ;;  %v1046_v0 = vrot.slane %v1044_v39, 1  ;;  %v4404_v39 = vld [vmem:[%s5265_s2 + $0x5c] ss:$0 sps:$4 sm:$0x11]   ;;  %vm1554_vm4 = vcmask 64512  }
 0x15f   : > { %1117 = vrot.lane.b32.xlu0 %v1028_v51, %s4879_s15  ;;  %v1056_v47 = vshll.u32 %v3904_v37, 16  ;;  %v1054_v59 = vshrl.u32 %v3904_v37, 16  ;;  %vm1575_vm5 = vcmask 97280   ;;  %vm1596_vm6 = vcmask 130048  }
 0x160   : > { %v860_v56 = vsel %vm842_vm0, %v858_v44, %v859_v46  ;;  %v1047_v11 = vor.u32 %v1046_v0, %v1042_v63  ;;  %v3953_v44 = vcombine.low %v3863_v30, %v3838_v5  ;;  %v3803_v63 = vld [vmem:[%s5265_s2 + $0x60] sm:$0xf]  ;;  %v4411_v30 = vld [vmem:[%s5265_s2 + $0x68] ss:$0 sps:$4 sm:$0x11]   ;;  %vm1617_vm7 = vcmask 162816  }
 0x161   : > { %v1058_v60 = vrot.slane %v1056_v47, 1  ;;  %v3864_v47 = vld [vmem:[%s5265_s2 + $0x54] sm:$0xe]  ;;  %vm6519_vm8 = vcmask 195584   ;;  %vm6518_vm9 = vcmask 228352   ;;  %vm6517_vm10 = vcmask 261120  }
 0x162   : > { %1199 = vrot.lane.b32.xlu1 %v1174_v58, %s4876_s22  ;;  %v3824_v58 = vld [vmem:[%s5265_s2 + $0x48] sm:$0xe]  ;;  %v1495_v62 = vrot.slane %v3953_v44, 1  ;;  %v5590_v44 = vld [vmem:[%s5265_s2 + $0x70] sm:$0xf]  ;;  %vm6516_vm11 = vcmask 293888  }
 0x163   : > { %1197 = vrot.lane.b32.xlu0 %v1171_v48, %s4876_s22  ;;  %v1061_v48 = vshll.u32 %v4393_v49, 16  ;;  %v3924_v6 = vcombine.low %v3824_v58, %v3800_v26  ;;  %v1059_v2 = vor.u32 %v1058_v60, %v1054_v59  ;;  %v3954_v58 = vcombine.low %v3864_v47, %v5498_v55  ;;  %v506_v59 = vld [vmem:[%s5265_s2 + $0x54] sm:$0xe] }
 0x164   : > { %vm2196_vm12 = vcmask 27648   ;;  %vm2197_vm13 = vsmask.f32 7938  ;;  %vm1993_vm14 = vsmask.f32 256  ;;  %vm2204_vm15 = vcmask 24576  }
 0x165   : > { %v1063_v8 = vrot.slane %v1061_v48, 1  ;;  %v1178_v16 = vrot.slane %v3924_v6, 1  ;;  %v4433_v6 = vld [vmem:[#allocation8 + $0x10] ss:$0 sps:$4 sm:$0x33]  }
 0x166   : > { %1269 = vrot.lane.b32.xlu1 %v3932_v31, %s4880_s17  ;;  %v1492_v31 = vrot.slane %v3952_v12, 1  ;;  %v1051_v12 = vrot.slane %v1049_v1, 1  ;;  %4182 = vmatprep.subr.msk.bf16.mxu0 %vm1742_vm2, %v4433_v6 }
 0x167   : > { %1267 = vrot.lane.b32.xlu0 %v3931_v35, %s4880_s17  ;;  %v738_v35 = vor.u32 %v737_v21, %v733_v20  ;;  %v5519_v20 = vcombine.low %v481_v9, %v5512_v10  ;;  %v1064_v21 = vsel %vm671_vm1, %v1059_v2, %v1063_v8  ;;  %v3801_v2 = vld [vmem:[%s5265_s2 + $0x54] sm:$0xf]  ;;  %v5565_v8 = vld [vmem:[%s5265_s2 + $0x58] sm:$0xf]  ;;  %v1498_v9 = vrot.slane %v3954_v58, 1 }
 0x168   : > { %v1494_v51 = vsel %vm842_vm0, %v1492_v31, %v1493_v40  ;;  %v1374_v31 = vshrl.u32 %v3934_v3, 16  ;;  %v1177_v40 = vsel %vm842_vm0, %v1175_v19, %v1176_v22  ;;  %v1499_v19 = vrot.slane %v5515_v15, 1 }
 0x169   : > { %v743_v43 = vsel %vm671_vm1, %v738_v35, %v742_v36  ;;  %v5535_v35 = vld [vmem:[%s5265_s2 + $0x50] ss:$0 sps:$4 sm:$0x11]   ;;  %v747_v36 = vshll.u32 %v5519_v20, 16 }
 0x16a   : > { %1439 = vrot.lane.b32.xlu1 %v1360_v13, %s4881_s14  ;;  %v3933_v13 = vcombine.low %v3837_v4, %v3838_v5  ;;  %v1379_v46 = vor.u32 %v1378_v33, %v1374_v31  ;;  %v752_v52 = vshll.u32 %v5535_v35, 16  ;;  %v764_v4 = vshll.u32 %v4404_v39, 16 }
 0x16b   : > { %1437 = vrot.lane.b32.xlu0 %v1348_v25, %s4881_s14  ;;  %v1052_v25 = vsel %vm671_vm1, %v1047_v11, %v1051_v12  ;;  %v749_v45 = vrot.slane %v747_v36, 1  ;;  %v1496_v5 = vrot.slane %v5524_v24, 1  ;;  %v3896_v11 = vcombine.low %v506_v59, %v5529_v28  ;;  %v3826_v36 = vld [vmem:[%s5265_s2 + $0x60] sm:$0xe] }
 0x16c   : > { %v1364_v26 = vshll.u32 %v3933_v13, 16  ;;  %v1362_v41 = vshrl.u32 %v3933_v13, 16  ;;  %v1744_v12 = vsel %vm1742_vm2, %v4433_v6, 0 }
 0x16d   : > { %4139 = vmatpush3.bf16.msra.mxu0 %v1744_v12 }
 0x16e   : > { %800 = vrot.lane.b32.xlu1 %v731_v34, %s4878_s0  ;;  %v1381_v34 = vshll.u32 %v5515_v15, 16  ;;  %v1500_v15 = vsel %vm842_vm0, %v1498_v9, %v1499_v19  ;;  %v487_v9 = vld [vmem:[%s5265_s2 + $0x6c] sm:$0xf] }
 0x16f   : > { %1517 = vrot.lane.b32.xlu0 %v1491_v38, %s4882_s9  ;;  %v5541_v38 = vcombine.low %v483_v27, %v5529_v28  ;;  %v865_v27 = vrot.slane %v4404_v39, 1 }
 0x170   : > { %v1383_v49 = vrot.slane %v1381_v34, 1  ;;  %v4412_v34 = vld [vmem:[%s5265_s2 + $0x5c] ss:$0 sps:$4 sm:$0x11]  }
 0x171   : > { %v759_v53 = vshll.u32 %v5541_v38, 16  ;;  %v757_v0 = vshrl.u32 %v5541_v38, 16 }
 0x172   : > { %802 = vrot.lane.b32.xlu1 %v743_v43, %s4878_s0  ;;  %v1369_v43 = vshll.u32 %v5524_v24, 16  ;;  %v1384_v60 = vsel %vm671_vm1, %v1379_v46, %v1383_v49  ;;  %v3895_v24 = vcombine.low %v505_v7, %v5512_v10  ;;  %v862_v10 = vrot.slane %v5535_v35, 1  ;;  %v3825_v35 = vld [vmem:[%s5265_s2 + $0x54] sm:$0xe] }
 0x173   : > { %1519 = vrot.lane.b32.xlu0 %v1494_v51, %s4882_s9  ;;  %v745_v51 = vshrl.u32 %v5519_v20, 16  ;;  %v761_v1 = vrot.slane %v759_v53, 1 }
 0x174   : > { %v861_v31 = vrot.slane %v3895_v24, 1 }
 0x175   : > { %v750_v48 = vor.u32 %v749_v45, %v745_v51  ;;  %v762_v14 = vor.u32 %v761_v1, %v757_v0  ;;  %v1073_v51 = vshll.u32 %v4412_v34, 16  ;;  %v3841_v45 = vld [vmem:[%s5265_s2 + $0x60] sm:$0xf]  ;;  %v5606_v1 = vld [vmem:[%s5265_s2 + $0x74] ss:$0 sps:$4 sm:$0x11]  }
 0x176   : > { %883 = vrot.lane.b32.xlu1 %v860_v56, %s4877_s6  ;;  %v1371_v56 = vrot.slane %v1369_v43, 1  ;;  %v3843_v43 = vld [vmem:[%s5265_s2 + $0x6c] sm:$0xf]  ;;  %v863_v46 = vsel %vm842_vm0, %v861_v31, %v862_v10 }
 0x177   : > { %881 = vrot.lane.b32.xlu0 %v857_v57, %s4877_s6  ;;  %v754_v57 = vrot.slane %v752_v52, 1  ;;  %v3842_v52 = vld [vmem:[%s5265_s2 + $0x64] sm:$0xf]  ;;  %v3936_v53 = vcombine.low %v3843_v43, %v5590_v44  ;;  %v3866_v43 = vld [vmem:[%s5265_s2 + $0x6c] sm:$0xe] }
 0x179   : > { %v1400_v0 = vshll.u32 %v3936_v53, 16  ;;  %v1398_v12 = vshrl.u32 %v3936_v53, 16 }
 0x17a   : > { %953 = vrot.lane.b32.xlu1 %v3904_v37, %s4875_s13  ;;  %v1180_v37 = vsel %vm842_vm0, %v1178_v16, %v1179_v17  ;;  %v766_v16 = vrot.slane %v764_v4, 1 }
 0x17b   : > { %951 = vrot.lane.b32.xlu0 %v3903_v42, %s4875_s13  ;;  %v1366_v42 = vrot.slane %v1364_v26, 1  ;;  %v864_v26 = vrot.slane %v3896_v11, 1  ;;  %v5617_v11 = vld [vmem:[%s5265_s2 + $0x70] sm:$0xf] }
 0x17c   : > { %v767_v22 = vsel %vm671_vm1, %v762_v14, %v766_v16  ;;  %v1405_v14 = vshll.u32 %v5606_v1, 16  ;;  %v5622_v16 = vld [vmem:[%s5265_s2 + $0x68] ss:$0 sps:$4 sm:$0x11]   ;;  %v5629_v24 = vcombine.low %v487_v9, %v5617_v11  ;;  %v1505_v9 = vrot.slane %v5606_v1, 1 }
 0x17d   : > { %v1367_v54 = vor.u32 %v1366_v42, %v1362_v41  ;;  %v1085_v42 = vshll.u32 %v4411_v30, 16 }
 0x17e   : > { %1123 = vrot.lane.b32.xlu1 %v1064_v21, %s4879_s15  ;;  %v1497_v21 = vsel %vm842_vm0, %v1495_v62, %v1496_v5  ;;  %v5602_v62 = vld [vmem:[%s5265_s2 + $0x64] sm:$0xf]  ;;  %v1407_v10 = vrot.slane %v1405_v14, 1 }
 0x17f   : > { %1121 = vrot.lane.b32.xlu0 %v1052_v25, %s4879_s15  ;;  %v1372_v55 = vsel %vm671_vm1, %v1367_v54, %v1371_v56  ;;  %v3905_v25 = vcombine.low %v3801_v2, %v5565_v8  ;;  %v3925_v54 = vcombine.low %v3825_v35, %v5565_v8  ;;  %v1087_v58 = vrot.slane %v1085_v42, 1 }
 0x180   : > { %v1182_v2 = vrot.slane %v4412_v34, 1 }
 0x181   : > { %v1068_v33 = vshll.u32 %v3905_v25, 16  ;;  %v1066_v47 = vshrl.u32 %v3905_v25, 16  ;;  %v1181_v5 = vrot.slane %v3925_v54, 1 }
 0x182   : > { %1203 = vrot.lane.b32.xlu1 %v1180_v37, %s4876_s22 }
 0x183   : > { %1201 = vrot.lane.b32.xlu0 %v1177_v40, %s4876_s22  ;;  %v866_v40 = vsel %vm842_vm0, %v864_v26, %v865_v27  ;;  %v1070_v49 = vrot.slane %v1068_v33, 1  ;;  %v776_v33 = vshll.u32 %v5622_v16, 16 }
 0x185   : > { %v1071_v59 = vor.u32 %v1070_v49, %v1066_v47  ;;  %v778_v35 = vrot.slane %v776_v33, 1  ;;  %v3828_v33 = vld [vmem:[%s5265_s2 + $0x78] sm:$0xe] }
 0x186   : > { %1273 = vrot.lane.b32.xlu1 %v3934_v3, %s4880_s17  ;;  %v3804_v3 = vld [vmem:[%s5265_s2 + $0x64] sm:$0xf] }
 0x187   : > { %1271 = vrot.lane.b32.xlu0 %v3933_v13, %s4880_s17  ;;  %v755_v13 = vsel %vm671_vm1, %v750_v48, %v754_v57  ;;  %v3906_v17 = vcombine.low %v3803_v63, %v3804_v3  ;;  %v3926_v39 = vcombine.low %v3826_v36, %v3804_v3  ;;  %v3935_v48 = vcombine.low %v3841_v45, %v3842_v52  ;;  %v485_v57 = vld [vmem:[%s5265_s2 + $0x60] sm:$0xf]  ;;  %v4418_v3 = vld [vmem:[%s5265_s2 + $0x68] ss:$0 sps:$4 sm:$0x11]  }
 0x188   : > { %v5612_v6 = vcombine.low %v485_v57, %v5602_v62  ;;  %v1393_v27 = vshll.u32 %v4418_v3, 16  ;;  %v1502_v49 = vrot.slane %v4418_v3, 1  ;;  %v5656_v57 = vld [vmem:[%s5265_s2 + $0x7c] sm:$0xf] }
 0x189   : > { %v1080_v28 = vshll.u32 %v3906_v17, 16  ;;  %v1078_v37 = vshrl.u32 %v3906_v17, 16  ;;  %v1184_v63 = vrot.slane %v3926_v39, 1  ;;  %v1388_v8 = vshll.u32 %v3935_v48, 16 }
 0x18a   : > { %1443 = vrot.lane.b32.xlu1 %v1384_v60, %s4881_s14  ;;  %v1075_v60 = vrot.slane %v1073_v51, 1  ;;  %v771_v19 = vshll.u32 %v5612_v6, 16  ;;  %v769_v34 = vshrl.u32 %v5612_v6, 16  ;;  %v1395_v42 = vrot.slane %v1393_v27, 1 }
 0x18b   : > { %1441 = vrot.lane.b32.xlu0 %v1372_v55, %s4881_s14  ;;  %v1082_v41 = vrot.slane %v1080_v28, 1  ;;  %v1185_v55 = vrot.slane %v4411_v30, 1  ;;  %v1390_v26 = vrot.slane %v1388_v8, 1 }
 0x18c   : > { %v1076_v7 = vsel %vm671_vm1, %v1071_v59, %v1075_v60  ;;  %v773_v36 = vrot.slane %v771_v19, 1  ;;  %v3807_v60 = vld [vmem:[%s5265_s2 + $0x78] sm:$0xf] }
 0x18d   : > { %v1083_v56 = vor.u32 %v1082_v41, %v1078_v37  ;;  %v4422_v37 = vld [vmem:[%s5265_s2 + $0x74] ss:$0 sps:$4 sm:$0x11]  }
 0x18e   : > { %804 = vrot.lane.b32.xlu1 %v755_v13, %s4878_s0  ;;  %v1402_v13 = vrot.slane %v1400_v0, 1  ;;  %v774_v45 = vor.u32 %v773_v36, %v769_v34  ;;  %v788_v54 = vshll.u32 %v4422_v37, 16  ;;  %v3805_v0 = vld [vmem:[%s5265_s2 + $0x6c] sm:$0xf] }
 0x18f   : > { %1521 = vrot.lane.b32.xlu0 %v1497_v21, %s4882_s9  ;;  %v1088_v4 = vsel %vm671_vm1, %v1083_v56, %v1087_v58  ;;  %v3865_v21 = vld [vmem:[%s5265_s2 + $0x60] sm:$0xe]  ;;  %v508_v56 = vld [vmem:[%s5265_s2 + $0x6c] sm:$0xe] }
 0x190   : > { %v1403_v31 = vor.u32 %v1402_v13, %v1398_v12  ;;  %v790_v3 = vrot.slane %v788_v54, 1  ;;  %v3827_v34 = vld [vmem:[%s5265_s2 + $0x6c] sm:$0xe]  ;;  %v5702_v54 = vld [vmem:[%s5265_s2 + $0x7c] sm:$0xf] }
 0x192   : > { %806 = vrot.lane.b32.xlu1 %v767_v22, %s4878_s0  ;;  %v1386_v22 = vshrl.u32 %v3935_v48, 16 }
 0x193   : > { %1523 = vrot.lane.b32.xlu0 %v1500_v15, %s4882_s9  ;;  %v3955_v15 = vcombine.low %v3865_v21, %v3842_v52  ;;  %v781_v52 = vshrl.u32 %v5629_v24, 16 }
 0x194   : > { %v1391_v41 = vor.u32 %v1390_v26, %v1386_v22  ;;  %v868_v26 = vrot.slane %v5622_v16, 1 }
 0x195   : > { %v1501_v47 = vrot.slane %v3955_v15, 1  ;;  %v5683_v15 = vld [vmem:[%s5265_s2 + $0x74] ss:$0 sps:$4 sm:$0x11]  }
 0x196   : > { %887 = vrot.lane.b32.xlu1 %v866_v40, %s4877_s6  ;;  %v783_v40 = vshll.u32 %v5629_v24, 16  ;;  %v1396_v59 = vsel %vm671_vm1, %v1391_v41, %v1395_v42 }
 0x197   : > { %885 = vrot.lane.b32.xlu0 %v863_v46, %s4877_s6  ;;  %v1408_v46 = vsel %vm671_vm1, %v1403_v31, %v1407_v10 }
 0x198   : > { %v785_v39 = vrot.slane %v783_v40, 1 }
 0x19a   : > { %957 = vrot.lane.b32.xlu1 %v3906_v17, %s4875_s13  ;;  %v1186_v17 = vsel %vm842_vm0, %v1184_v63, %v1185_v55  ;;  %v507_v63 = vld [vmem:[%s5265_s2 + $0x60] sm:$0xe]  ;;  %v3898_v55 = vcombine.low %v508_v56, %v5617_v11 }
 0x19b   : > { %955 = vrot.lane.b32.xlu0 %v3905_v25, %s4875_s13  ;;  %v1183_v25 = vsel %vm842_vm0, %v1181_v5, %v1182_v2  ;;  %v786_v5 = vor.u32 %v785_v39, %v781_v52  ;;  %v3897_v12 = vcombine.low %v507_v63, %v5602_v62  ;;  %v3928_v52 = vcombine.low %v3828_v33, %v5656_v57  ;;  %v3845_v39 = vld [vmem:[%s5265_s2 + $0x78] sm:$0xf]  ;;  %v3868_v33 = vld [vmem:[%s5265_s2 + $0x84] sm:$0xe] }
 0x19c   : > { %v870_v11 = vrot.slane %v3898_v55, 1  ;;  %v3937_v55 = vcombine.low %v3845_v39, %v5702_v54 }
 0x19d   : > { %v791_v21 = vsel %vm671_vm1, %v786_v5, %v790_v3  ;;  %v867_v22 = vrot.slane %v3897_v12, 1 }
 0x19e   : > { %1127 = vrot.lane.b32.xlu1 %v1088_v4, %s4879_s15  ;;  %v1503_v4 = vsel %vm842_vm0, %v1501_v47, %v1502_v49  ;;  %v5695_v47 = vld [vmem:[%s5265_s2 + $0x88] sm:$0xf] }
 0x19f   : > { %1125 = vrot.lane.b32.xlu0 %v1076_v7, %s4879_s15  ;;  %v3908_v7 = vcombine.low %v3807_v60, %v5656_v57  ;;  %v869_v42 = vsel %vm842_vm0, %v867_v22, %v868_v26 }
 0x1a1   : > { %v1104_v19 = vshll.u32 %v3908_v7, 16  ;;  %v1102_v36 = vshrl.u32 %v3908_v7, 16 }
 0x1a2   : > { %1207 = vrot.lane.b32.xlu1 %v1186_v17, %s4876_s22  ;;  %v5633_v28 = vpop.permute.xlu1 %945  ;;  %v5635_v30 = vpop.permute.xlu0 %943  ;;  %v871_v17 = vrot.slane %v4422_v37, 1 }
 0x1a3   : > { %1205 = vrot.lane.b32.xlu0 %v1183_v25, %s4876_s22  ;;  %v5676_v25 = vld [vmem:[%s5265_s2 + $0x80] ss:$0 sps:$4 sm:$0x11]   ;;  %v1106_v37 = vrot.slane %v1104_v19, 1 }
 0x1a4   : > { %v872_v10 = vsel %vm842_vm0, %v870_v11, %v871_v17  ;;  %v1109_v16 = vshll.u32 %v5676_v25, 16 }
 0x1a6   : > { %1277 = vrot.lane.b32.xlu1 %v3936_v53, %s4880_s17  ;;  %v5646_v51 = vpop.permute.xlu0 %1193  ;;  %v3956_v53 = vcombine.low %v3866_v43, %v5590_v44  ;;  %v779_v44 = vsel %vm671_vm1, %v774_v45, %v778_v35  ;;  %v3847_v35 = vld [vmem:[%s5265_s2 + $0x84] sm:$0xf]  ;;  %v1111_v60 = vrot.slane %v1109_v16, 1 }
 0x1a7   : > { %1275 = vrot.lane.b32.xlu0 %v3935_v48, %s4880_s17  ;;  %v5661_v48 = vld [vmem:[%s5265_s2 + $0x70] sm:$0xf] }
 0x1a8   : > { %v5651_v58 = vpop.permute.xlu1 %873  ;;  %v1504_v8 = vrot.slane %v3956_v53, 1  ;;  %v3907_v13 = vcombine.low %v3805_v0, %v5661_v48  ;;  %v3927_v56 = vcombine.low %v3827_v34, %v5661_v48 }
 0x1aa   : > { %1447 = vrot.lane.b32.xlu1 %v1408_v46, %s4881_s14  ;;  %v1506_v62 = vsel %vm842_vm0, %v1504_v8, %v1505_v9  ;;  %v1092_v27 = vshll.u32 %v3907_v13, 16  ;;  %v1090_v40 = vshrl.u32 %v3907_v13, 16  ;;  %v1097_v46 = vshll.u32 %v5683_v15, 16 }
 0x1ab   : > { %1445 = vrot.lane.b32.xlu0 %v1396_v59, %s4881_s14  ;;  %v1107_v59 = vor.u32 %v1106_v37, %v1102_v36  ;;  %v1187_v3 = vrot.slane %v3927_v56, 1  ;;  %v1188_v8 = vrot.slane %v5683_v15, 1 }
 0x1ac   : > { %v876_v2 = vpop.permute.xlu1 %875  ;;  %v1094_v43 = vrot.slane %v1092_v27, 1  ;;  %v1410_v27 = vshrl.u32 %v3937_v55, 16 }
 0x1ad   : > { %v793_v14 = vpop.permute.xlu0 %792  ;;  %v1112_v9 = vsel %vm671_vm1, %v1107_v59, %v1111_v60 }
 0x1ae   : > { %808 = vrot.lane.b32.xlu1 %v779_v44, %s4878_s0  ;;  %v1535_v49 = vsel %vm1533_vm3, %v5323_v23, %v793_v14  ;;  %v5710_v23 = vcombine.low %v3847_v35, %v5695_v47  ;;  %v1095_v0 = vor.u32 %v1094_v43, %v1090_v40  ;;  %v1190_v44 = vrot.slane %v3928_v52, 1  ;;  %v4438_v14 = vld [vmem:[%s5265_s2 + $0x8c] ss:$0 sps:$4 sm:$0x11]   ;;  %v3867_v40 = vld [vmem:[%s5265_s2 + $0x78] sm:$0xe] }
 0x1af   : > { %1525 = vrot.lane.b32.xlu0 %v1503_v4, %s4882_s9  ;;  %v1556_v57 = vsel %vm1554_vm4, %v1535_v49, %v5651_v58  ;;  %v1099_v4 = vrot.slane %v1097_v46, 1  ;;  %v1429_v26 = vshll.u32 %v4438_v14, 16  ;;  %v1511_v60 = vrot.slane %v4438_v14, 1 }
 0x1b0   : > { %v5678_v1 = vpop.permute.xlu1 %1195  ;;  %v1577_v58 = vsel %vm1575_vm5, %v1556_v57, %v5635_v30  ;;  %v1424_v12 = vshll.u32 %v5710_v23, 16 }
 0x1b1   : > { %v795_v31 = vpop.permute.xlu0 %794  ;;  %v1431_v46 = vrot.slane %v1429_v26, 1 }
 0x1b2   : > { %810 = vrot.lane.b32.xlu1 %v791_v21, %s4878_s0  ;;  %v1537_v53 = vsel %vm1533_vm3, %v5328_v29, %v795_v31  ;;  %v1191_v29 = vrot.slane %v5676_v25, 1  ;;  %v4439_v21 = vld [vmem:[%s5265_s2 + $0x80] ss:$0 sps:$4 sm:$0x11]   ;;  %v1189_v25 = vsel %vm842_vm0, %v1187_v3, %v1188_v8 }
 0x1b3   : > { %1527 = vrot.lane.b32.xlu0 %v1506_v62, %s4882_s9  ;;  %v1558_v5 = vsel %vm1554_vm4, %v1537_v53, %v876_v2  ;;  %v1100_v2 = vsel %vm671_vm1, %v1095_v0, %v1099_v4  ;;  %v1422_v62 = vshrl.u32 %v5710_v23, 16  ;;  %v1417_v36 = vshll.u32 %v4439_v21, 16 }
 0x1b4   : > { %v1116_v41 = vpop.permute.xlu1 %1115  ;;  %v1579_v19 = vsel %vm1575_vm5, %v1558_v5, %v5633_v28  ;;  %v1426_v28 = vrot.slane %v1424_v12, 1  ;;  %v1508_v0 = vrot.slane %v4439_v21, 1 }
 0x1b5   : > { %v1114_v45 = vpop.permute.xlu0 %1113  ;;  %v1600_v15 = vsel %vm1596_vm6, %v1579_v19, %v1116_v41  ;;  %v3958_v41 = vcombine.low %v3868_v33, %v5695_v47  ;;  %v1419_v39 = vrot.slane %v1417_v36, 1 }
 0x1b6   : > { %891 = vrot.lane.b32.xlu1 %v872_v10, %s4877_s6  ;;  %v1598_v11 = vsel %vm1596_vm6, %v1577_v58, %v1114_v45  ;;  %v1427_v43 = vor.u32 %v1426_v28, %v1422_v62  ;;  %v3957_v45 = vcombine.low %v3867_v40, %v5702_v54 }
 0x1b7   : > { %889 = vrot.lane.b32.xlu0 %v869_v42, %s4877_s6  ;;  %v1619_v22 = vsel %vm1617_vm7, %v1598_v11, %v5646_v51  ;;  %v1621_v42 = vsel %vm1617_vm7, %v1600_v15, %v5678_v1  ;;  %v1510_v59 = vrot.slane %v3958_v41, 1 }
 0x1b8   : > { %v1266_v63 = vpop.permute.xlu1 %1265  ;;  %v1432_v47 = vsel %vm671_vm1, %v1427_v43, %v1431_v46 }
 0x1b9   : > { %v1264_v48 = vpop.permute.xlu0 %1263  ;;  %v1642_v35 = vsel %vm6519_vm8, %v1621_v42, %v1266_v63  ;;  %v1507_v63 = vrot.slane %v3957_v45, 1 }
 0x1ba   : > { %961 = vrot.lane.b32.xlu1 %v3908_v7, %s4875_s13  ;;  %v1412_v7 = vshll.u32 %v3937_v55, 16  ;;  %v1640_v31 = vsel %vm6519_vm8, %v1619_v22, %v1264_v48 }
 0x1bb   : > { %959 = vrot.lane.b32.xlu0 %v3907_v13, %s4875_s13  ;;  %v1192_v13 = vsel %vm842_vm0, %v1190_v44, %v1191_v29 }
 0x1bc   : > { %v1436_v17 = vpop.permute.xlu1 %1435  ;;  %v1414_v34 = vrot.slane %v1412_v7, 1 }
 0x1bd   : > { %v1434_v30 = vpop.permute.xlu0 %1433  ;;  %v1663_v56 = vsel %vm6518_vm9, %v1642_v35, %v1436_v17 }
 0x1be   : > { %1131 = vrot.lane.b32.xlu1 %v1112_v9, %s4879_s15  ;;  %v1661_v37 = vsel %vm6518_vm9, %v1640_v31, %v1434_v30  ;;  %v1415_v52 = vor.u32 %v1414_v34, %v1410_v27 }
 0x1bf   : > { %1129 = vrot.lane.b32.xlu0 %v1100_v2, %s4879_s15 }
 0x1c0   : > { %v797_v10 = vpop.permute.xlu1 %796  ;;  %v1420_v54 = vsel %vm671_vm1, %v1415_v52, %v1419_v39 }
 0x1c1   : > { %v1514_v16 = vpop.permute.xlu0 %1513  ;;  %v1539_v12 = vsel %vm1533_vm3, %v5370_v18, %v797_v10 }
 0x1c2   : > { %1211 = vrot.lane.b32.xlu1 %v1192_v13, %s4876_s22  ;;  %v1682_v51 = vsel %vm6517_vm10, %v1661_v37, %v1514_v16 }
 0x1c3   : > { %1209 = vrot.lane.b32.xlu0 %v1189_v25, %s4876_s22  ;;  %4140 = vmatprep.mubr.msk.bf16.mxu0 %vm6516_vm11, %v1682_v51 }
 0x1c4   : > { %v799_v49 = vpop.permute.xlu1 %798 }
 0x1c5   : > { %v1516_v53 = vpop.permute.xlu0 %1515  ;;  %v1541_v21 = vsel %vm1533_vm3, %v5382_v32, %v799_v49 }
 0x1c6   : > { %v1684_v1 = vsel %vm6517_vm10, %v1663_v56, %v1516_v53  ;;  %1281 = vrot.lane.b32.xlu1 %v5710_v23, %s4880_s17  ;;  %v1512_v23 = vsel %vm842_vm0, %v1510_v59, %v1511_v60 }
 0x1c7   : > { %1279 = vrot.lane.b32.xlu0 %v3937_v55, %s4880_s17  ;;  %4141 = vmatmul.mubr.msk.bf16.vlgmr.msra.gmra.mrb[0].mxu0 %vm6516_vm11, %v1684_v1  ;;  %v1509_v55 = vsel %vm842_vm0, %v1507_v63, %v1508_v0 }
 0x1c8   : > { %v880_v57 = vpop.permute.xlu1 %879 }
 0x1c9   : > { %v878_v4 = vpop.permute.xlu0 %877  ;;  %v1562_v30 = vsel %vm1554_vm4, %v1541_v21, %v880_v57 }
 0x1ca   : > { %1451 = vrot.lane.b32.xlu1 %v1432_v47, %s4881_s14  ;;  %v1560_v14 = vsel %vm1554_vm4, %v1539_v12, %v878_v4 }
 0x1cb   : > { %1449 = vrot.lane.b32.xlu0 %v1420_v54, %s4881_s14 }
 0x1cc   : > { %v950_v48 = vpop.permute.xlu1 %949 }
 0x1cd   : > { %v948_v44 = vpop.permute.xlu0 %947  ;;  %v1583_v18 = vsel %vm1575_vm5, %v1562_v30, %v950_v48 }
 0x1ce   : > { %1531 = vrot.lane.b32.xlu1 %v1512_v23, %s4882_s9  ;;  %v1581_v17 = vsel %vm1575_vm5, %v1560_v14, %v948_v44 }
 0x1cf   : > { %1529 = vrot.lane.b32.xlu0 %v1509_v55, %s4882_s9 }
 0x1d0   : > { %v1120_v29 = vpop.permute.xlu1 %1119 }
 0x1d1   : > { %v1118_v5 = vpop.permute.xlu0 %1117  ;;  %v1604_v28 = vsel %vm1596_vm6, %v1583_v18, %v1120_v29 }
 0x1d2   : > { %v1602_v7 = vsel %vm1596_vm6, %v1581_v17, %v1118_v5 }
 0x1d4   : > { %v1200_v3 = vpop.permute.xlu1 %1199 }
 0x1d5   : > { %v1198_v8 = vpop.permute.xlu0 %1197  ;;  %v1625_v27 = vsel %vm1617_vm7, %v1604_v28, %v1200_v3 }
 0x1d6   : > { %v1623_v19 = vsel %vm1617_vm7, %v1602_v7, %v1198_v8 }
 0x1d8   : > { %v1270_v58 = vpop.permute.xlu1 %1269 }
 0x1d9   : > { %v1268_v9 = vpop.permute.xlu0 %1267  ;;  %v1646_v32 = vsel %vm6519_vm8, %v1625_v27, %v1270_v58 }
 0x1da   : > { %v1644_v13 = vsel %vm6519_vm8, %v1623_v19, %v1268_v9 }
 0x1dc   : > { %v1440_v11 = vpop.permute.xlu1 %1439 }
 0x1dd   : > { %v1438_v2 = vpop.permute.xlu0 %1437  ;;  %v1667_v31 = vsel %vm6518_vm9, %v1646_v32, %v1440_v11 }
 0x1de   : > { %v1665_v62 = vsel %vm6518_vm9, %v1644_v13, %v1438_v2 }
 0x1e0   : > { %v801_v25 = vpop.permute.xlu1 %800 }
 0x1e1   : > { %v1518_v22 = vpop.permute.xlu0 %1517  ;;  %v1543_v35 = vsel %vm1533_vm3, %v5446_v50, %v801_v25 }
 0x1e2   : > { %v1686_v26 = vsel %vm6517_vm10, %v1665_v62, %v1518_v22 }
 0x1e3   : > { %4144 = vmatprep.mubr.msk.bf16.mxu0 %vm6516_vm11, %v1686_v26 }
 0x1e4   : > { %v803_v15 = vpop.permute.xlu1 %802 }
 0x1e5   : > { %v1520_v10 = vpop.permute.xlu0 %1519  ;;  %v1545_v53 = vsel %vm1533_vm3, %v5460_v61, %v803_v15 }
 0x1e6   : > { %v1688_v33 = vsel %vm6517_vm10, %v1667_v31, %v1520_v10 }
 0x1e7   : > { %4145 = vmatmul.mubr.msk.bf16.gmra.mrb[4].mxu0 %vm6516_vm11, %v1688_v33 }
 0x1e8   : > { %v884_v34 = vpop.permute.xlu1 %883 }
 0x1e9   : > { %v882_v36 = vpop.permute.xlu0 %881  ;;  %v1566_v47 = vsel %vm1554_vm4, %v1545_v53, %v884_v34 }
 0x1ea   : > { %v1564_v49 = vsel %vm1554_vm4, %v1543_v35, %v882_v36 }
 0x1ec   : > { %v954_v37 = vpop.permute.xlu1 %953 }
 0x1ed   : > { %v952_v16 = vpop.permute.xlu0 %951  ;;  %v1587_v50 = vsel %vm1575_vm5, %v1566_v47, %v954_v37 }
 0x1ee   : > { %v1585_v52 = vsel %vm1575_vm5, %v1564_v49, %v952_v16 }
 0x1f0   : > { %v1124_v40 = vpop.permute.xlu1 %1123 }
 0x1f1   : > { %v1122_v51 = vpop.permute.xlu0 %1121  ;;  %v1608_v63 = vsel %vm1596_vm6, %v1587_v50, %v1124_v40 }
 0x1f2   : > { %v1606_v56 = vsel %vm1596_vm6, %v1585_v52, %v1122_v51 }
 0x1f4   : > { %v1204_v42 = vpop.permute.xlu1 %1203 }
 0x1f5   : > { %v1202_v41 = vpop.permute.xlu0 %1201  ;;  %v1629_v4 = vsel %vm1617_vm7, %v1608_v63, %v1204_v42 }
 0x1f6   : > { %v1627_v1 = vsel %vm1617_vm7, %v1606_v56, %v1202_v41 }
 0x1f8   : > { %v1274_v43 = vpop.permute.xlu1 %1273 }
 0x1f9   : > { %v1272_v46 = vpop.permute.xlu0 %1271  ;;  %v1650_v61 = vsel %vm6519_vm8, %v1629_v4, %v1274_v43 }
 0x1fa   : > { %v1648_v59 = vsel %vm6519_vm8, %v1627_v1, %v1272_v46 }
 0x1fc   : > { %v1444_v45 = vpop.permute.xlu1 %1443 }
 0x1fd   : > { %v1442_v39 = vpop.permute.xlu0 %1441  ;;  %v1671_v48 = vsel %vm6518_vm9, %v1650_v61, %v1444_v45 }
 0x1fe   : > { %v1669_v57 = vsel %vm6518_vm9, %v1648_v59, %v1442_v39 }
 0x200   : > { %v805_v60 = vpop.permute.xlu1 %804 }
 0x201   : > { %v1522_v54 = vpop.permute.xlu0 %1521  ;;  %v1547_v2 = vsel %vm1533_vm3, %v5519_v20, %v805_v60 }
 0x202   : > { %v1690_v0 = vsel %vm6517_vm10, %v1669_v57, %v1522_v54 }
 0x203   : > { %4148 = vmatprep.mubr.msk.bf16.mxu0 %vm6516_vm11, %v1690_v0 }
 0x204   : > { %v807_v23 = vpop.permute.xlu1 %806 }
 0x205   : > { %v1524_v55 = vpop.permute.xlu0 %1523  ;;  %v1549_v25 = vsel %vm1533_vm3, %v5541_v38, %v807_v23 }
 0x206   : > { %v1692_v44 = vsel %vm6517_vm10, %v1671_v48, %v1524_v55  ;;  %v5845_v55 = vld [vmem:[#allocation9] ss:$0 sm:$0xff] }
 0x207   : > { %4149 = vmatmul.mubr.msk.bf16.gmra.mrb[8].mxu0 %vm6516_vm11, %v1692_v44 }
 0x208   : > { %v888_v29 = vpop.permute.xlu1 %887 }
 0x209   : > { %v886_v5 = vpop.permute.xlu0 %885  ;;  %v1570_v62 = vsel %vm1554_vm4, %v1549_v25, %v888_v29  ;;  %v5847_v29 = vld [vmem:[#allocation11] ss:$0 sm:$0xff] }
 0x20a   : > { %v1568_v7 = vsel %vm1554_vm4, %v1547_v2, %v886_v5 }
 0x20c   : > { %v958_v3 = vpop.permute.xlu1 %957 }
 0x20d   : > { %v956_v8 = vpop.permute.xlu0 %955  ;;  %v1591_v20 = vsel %vm1575_vm5, %v1570_v62, %v958_v3 }
 0x20e   : > { %v1589_v19 = vsel %vm1575_vm5, %v1568_v7, %v956_v8 }
 0x210   : > { %v1128_v58 = vpop.permute.xlu1 %1127 }
 0x211   : > { %v1126_v9 = vpop.permute.xlu0 %1125  ;;  %v1612_v32 = vsel %vm1596_vm6, %v1591_v20, %v1128_v58 }
 0x212   : > { %v1610_v13 = vsel %vm1596_vm6, %v1589_v19, %v1126_v9 }
 0x214   : > { %v1208_v12 = vpop.permute.xlu1 %1207 }
 0x215   : > { %v1206_v14 = vpop.permute.xlu0 %1205  ;;  %v1633_v31 = vsel %vm1617_vm7, %v1612_v32, %v1208_v12 }
 0x216   : > { %v1631_v18 = vsel %vm1617_vm7, %v1610_v13, %v1206_v14 }
 0x218   : > { %v1278_v11 = vpop.permute.xlu1 %1277 }
 0x219   : > { %v1276_v17 = vpop.permute.xlu0 %1275  ;;  %v1654_v38 = vsel %vm6519_vm8, %v1633_v31, %v1278_v11  ;;  %v2209_v31 = vld [vmem:[#allocation2 + $0xc] sm:$0xf] }
 0x21a   : > { %v1652_v22 = vsel %vm6519_vm8, %v1631_v18, %v1276_v17 }
 0x21c   : > { %v1448_v21 = vpop.permute.xlu1 %1447 }
 0x21d   : > { %v1446_v30 = vpop.permute.xlu0 %1445  ;;  %v1675_v33 = vsel %vm6518_vm9, %v1654_v38, %v1448_v21 }
 0x21e   : > { %v1673_v26 = vsel %vm6518_vm9, %v1652_v22, %v1446_v30 }
 0x220   : > { %v809_v28 = vpop.permute.xlu1 %808 }
 0x221   : > { %v1526_v27 = vpop.permute.xlu0 %1525  ;;  %v1551_v52 = vsel %vm1533_vm3, %v5612_v6, %v809_v28 }
 0x222   : > { %v1694_v15 = vsel %vm6517_vm10, %v1673_v26, %v1526_v27 }
 0x223   : > { %4152 = vmatprep.mubr.msk.bf16.mxu0 %vm6516_vm11, %v1694_v15 }
 0x224   : > { %v811_v10 = vpop.permute.xlu1 %810 }
 0x225   : > { %v1528_v34 = vpop.permute.xlu0 %1527  ;;  %v1553_v45 = vsel %vm1533_vm3, %v5629_v24, %v811_v10 }
 0x226   : > { %v1696_v36 = vsel %vm6517_vm10, %v1675_v33, %v1528_v34 }
 0x227   : > { %4153 = vmatmul.mubr.msk.bf16.gmra.mrb[12].mxu0 %vm6516_vm11, %v1696_v36 }
 0x228   : > { %v892_v37 = vpop.permute.xlu1 %891 }
 0x229   : > { %v890_v16 = vpop.permute.xlu0 %889  ;;  %v1574_v39 = vsel %vm1554_vm4, %v1553_v45, %v892_v37  ;;  %v2199_v37 = vld [vmem:[#allocation2] sm:$0xf] }
 0x22a   : > { %v1572_v56 = vsel %vm1554_vm4, %v1551_v52, %v890_v16 }
 0x22c   : > { %v962_v40 = vpop.permute.xlu1 %961 }
 0x22d   : > { %v960_v51 = vpop.permute.xlu0 %959  ;;  %v1595_v53 = vsel %vm1575_vm5, %v1574_v39, %v962_v40  ;;  %v2206_v39 = vld [vmem:[#allocation2 + $0x8] sm:$0x1] }
 0x22e   : > { %v1593_v47 = vsel %vm1575_vm5, %v1572_v56, %v960_v51 }
 0x230   : > { %v1132_v42 = vpop.permute.xlu1 %1131 }
 0x231   : > { %v1130_v41 = vpop.permute.xlu0 %1129  ;;  %v1616_v59 = vsel %vm1596_vm6, %v1595_v53, %v1132_v42 }
 0x232   : > { %v1614_v50 = vsel %vm1596_vm6, %v1593_v47, %v1130_v41  ;;  %v2213_v41 = vld [vmem:[#allocation2 + $0x14] sm:$0x1] }
 0x234   : > { %v1212_v43 = vpop.permute.xlu1 %1211 }
 0x235   : > { %v1210_v46 = vpop.permute.xlu0 %1209  ;;  %v1637_v57 = vsel %vm1617_vm7, %v1616_v59, %v1212_v43 }
 0x236   : > { %v1635_v24 = vsel %vm1617_vm7, %v1614_v50, %v1210_v46 }
 0x238   : > { %v1282_v35 = vpop.permute.xlu1 %1281 }
 0x239   : > { %v1280_v49 = vpop.permute.xlu0 %1279  ;;  %v1658_v6 = vsel %vm6519_vm8, %v1637_v57, %v1282_v35 }
 0x23a   : > { %v1656_v54 = vsel %vm6519_vm8, %v1635_v24, %v1280_v49 }
 0x23c   : > { %v1452_v1 = vpop.permute.xlu1 %1451 }
 0x23d   : > { %v1450_v60 = vpop.permute.xlu0 %1449  ;;  %v1679_v63 = vsel %vm6518_vm9, %v1658_v6, %v1452_v1 }
 0x23e   : > { %v1677_v4 = vsel %vm6518_vm9, %v1656_v54, %v1450_v60  ;;  %vm5865_vm9 = vmand %vm2204_vm15, %vm1993_vm14 }
 0x240   : > { %v1532_v0 = vpop.permute.xlu1 %1531 }
 0x241   : > { %v1700_v61 = vsel %vm6517_vm10, %v1679_v63, %v1532_v0  ;;  %v1530_v23 = vpop.permute.xlu0 %1529 }
 0x242   : > { %v1698_v48 = vsel %vm6517_vm10, %v1677_v4, %v1530_v23  ;;  %vm5859_vm10 = vmand %vm2196_vm12, %vm2197_vm13 }
 0x243   : > { %4156 = vmatprep.mubr.msk.bf16.mxu0 %vm6516_vm11, %v1698_v48 }
 0x244   : > { %4157 = vmatmul.mubr.msk.bf16.gmra.mrb[16].mxu0 %vm6516_vm11, %v1700_v61  ;;  %vm1994_vm11 = vsmask.f32 4368 }
 0x245   : > { %vm5870_vm8 = vmor %vm1993_vm14, %vm1994_vm11 }
 0x246   : > { %vm5890_vm11 = vmand %vm2204_vm15, %vm2197_vm13 }
 0x29a   : > { %v4142_v44 = vpop.f32.mrb[0].mxu0 }
 0x29b   : > { %v1868_v5 = vmul.f32 %v4142_v44, %v5845_v55  ;;  %v1780_v3 = vpop.f32.mrb[1].mxu0 }
 0x29c   : > { %v1866_v8 = vmul.f32 %v5845_v55, %v1780_v3  ;;  %v4143_v58 = vpop.f32.mrb[2].mxu0 }
 0x29d   : > { %v1895_v9 = vadd.f32 %v5847_v29, %v1868_v5  ;;  %v1869_v12 = vmul.f32 %v4143_v58, %v5845_v55  ;;  %v1783_v14 = vpop.f32.mrb[3].mxu0 }
 0x29e   : > { %v1893_v11 = vadd.f32 %v5847_v29, %v1866_v8  ;;  %v1867_v17 = vmul.f32 %v5845_v55, %v1783_v14 }
 0x29f   : > { %v1915_v2 = vmax.f32 %v1895_v9, 0.0  ;;  %v1896_v7 = vadd.f32 %v5847_v29, %v1869_v12 }
 0x2a0   : > { %v1913_v21 = vmax.f32 %v1893_v11, 0.0  ;;  %v1894_v19 = vadd.f32 %v5847_v29, %v1867_v17 }
 0x2a1   : > { %v4091_v30 = vpack.c.bf16 %v1915_v2, %v1915_v2  ;;  %v1916_v13 = vmax.f32 %v1896_v7, 0.0 }
 0x2a2   : > { %v4089_v25 = vpack.c.bf16 %v1913_v21, %v1913_v21  ;;  %v1914_v18 = vmax.f32 %v1894_v19, 0.0 }
 0x2a3   : > { %v2014_v62 = vshrl.u32 %v4091_v30, 16  ;;  %v4092_v22 = vpack.c.bf16 %v1916_v13, %v1916_v13  ;;  %v2017_v27 = vshll.u32 %v4091_v30, 16 }
 0x2a4   : > { %v1997_v28 = vshrl.u32 %v4089_v25, 16  ;;  %v4090_v20 = vpack.c.bf16 %v1914_v18, %v1914_v18  ;;  %v2000_v10 = vshll.u32 %v4089_v25, 16 }
 0x2a5   : > { %v2016_v26 = vrot.slane %v2014_v62, 7  ;;  %v2022_v32 = vshrl.u32 %v4092_v22, 16  ;;  %v2025_v40 = vshll.u32 %v4092_v22, 16 }
 0x2a6   : > { %v1999_v38 = vrot.slane %v1997_v28, 7  ;;  %v2005_v33 = vshrl.u32 %v4090_v20, 16  ;;  %v2008_v46 = vshll.u32 %v4090_v20, 16 }
 0x2a7   : > { %v2019_v34 = vor.u32 %v2017_v27, %v2016_v26  ;;  %v2024_v16 = vrot.slane %v2022_v32, 7  ;;  %v2020_v35 = vrot.slane %v2016_v26, 4 }
 0x2a8   : > { %v2002_v51 = vor.u32 %v2000_v10, %v1999_v38  ;;  %v2007_v43 = vrot.slane %v2005_v33, 7  ;;  %v2003_v56 = vrot.slane %v1999_v38, 4 }
 0x2a9   : > { %v2210_v49 = vsel %vm5859_vm10, %v2019_v34, %v2209_v31  ;;  %v2027_v45 = vor.u32 %v2025_v40, %v2024_v16  ;;  %v2029_v52 = vrot.slane %v2024_v16, 4  ;;  %v2223_v31 = vld [vmem:[#allocation2 + $0x24] sm:$0xf] }
 0x2aa   : > { %2211 = vst [vmem:[#allocation2 + $0xc] sm:$0xf] %v2210_v49  ;;  %v2200_v53 = vsel %vm5859_vm10, %v2002_v51, %v2199_v37  ;;  %v2010_v1 = vor.u32 %v2008_v46, %v2007_v43  ;;  %v2012_v47 = vrot.slane %v2007_v43, 4  ;;  %v2216_v37 = vld [vmem:[#allocation2 + $0x18] sm:$0xf] }
 0x2ab   : > { %2201 = vst [vmem:[#allocation2] sm:$0xf] %v2200_v53  ;;  %v2028_v59 = vsel %vm5870_vm8, %v2020_v35, %v2027_v45  ;;  %v2214_v60 = vsel %vm5865_vm9, %v2029_v52, %v2213_v41  ;;  %v2227_v41 = vld [vmem:[#allocation2 + $0x2c] sm:$0x1] }
 0x2ac   : > { %2212 = vst.msk [vmem:[#allocation2 + $0x10] sm:$0xf] %vm2196_vm12, %v2028_v59  ;;  %2215 = vst [vmem:[#allocation2 + $0x14] sm:$0x1] %v2214_v60  ;;  %v2011_v50 = vsel %vm5870_vm8, %v2003_v56, %v2010_v1  ;;  %v2207_v57 = vsel %vm5865_vm9, %v2012_v47, %v2206_v39  ;;  %v2220_v39 = vld [vmem:[#allocation2 + $0x20] sm:$0x1] }
 0x2ad   : > { %2203 = vst.msk [vmem:[#allocation2 + $0x4] sm:$0xf] %vm2196_vm12, %v2011_v50  ;;  %2208 = vst [vmem:[#allocation2 + $0x8] sm:$0x1] %v2207_v57 }
 0x2b1   : > { %v2275_v24 = vld [vmem:[#allocation2 + $0xc] sm:$0x1] }
 0x2b2   : > { %v2276_v54 = vsel %vm5865_vm9, 0, %v2275_v24  ;;  %v2272_v63 = vld [vmem:[#allocation2] sm:$0x1] }
 0x2b3   : > { %2277 = vst [vmem:[#allocation2 + $0xc] sm:$0x1] %v2276_v54  ;;  %v2273_v0 = vsel %vm5865_vm9, 0, %v2272_v63  ;;  %v2306_v4 = vld [vmem:[#allocation2 + $0x14] sm:$0x1] }
 0x2b4   : > { %2274 = vst [vmem:[#allocation2] sm:$0x1] %v2273_v0  ;;  %v2307_v61 = vsel %vm5890_vm11, 0, %v2306_v4  ;;  %v2303_v23 = vld [vmem:[#allocation2 + $0x8] sm:$0x1] }
 0x2b5   : > { %2308 = vst [vmem:[#allocation2 + $0x14] sm:$0x1] %v2307_v61  ;;  %v2304_v48 = vsel %vm5890_vm11, 0, %v2303_v23 }
 0x2b6   : > { %2305 = vst [vmem:[#allocation2 + $0x8] sm:$0x1] %v2304_v48 }
 0x2ba   : > { %v4146_v44 = vpop.f32.mrb[4].mxu0 }
 0x2bb   : > { %v1872_v5 = vmul.f32 %v4146_v44, %v5845_v55  ;;  %v1796_v3 = vpop.f32.mrb[5].mxu0 }
 0x2bc   : > { %v1870_v8 = vmul.f32 %v5845_v55, %v1796_v3  ;;  %v4147_v58 = vpop.f32.mrb[6].mxu0 }
 0x2bd   : > { %v1899_v9 = vadd.f32 %v5847_v29, %v1872_v5  ;;  %v1873_v12 = vmul.f32 %v4147_v58, %v5845_v55  ;;  %v1799_v14 = vpop.f32.mrb[7].mxu0 }
 0x2be   : > { %v1897_v11 = vadd.f32 %v5847_v29, %v1870_v8  ;;  %v1871_v17 = vmul.f32 %v5845_v55, %v1799_v14 }
 0x2bf   : > { %v1919_v2 = vmax.f32 %v1899_v9, 0.0  ;;  %v1900_v7 = vadd.f32 %v5847_v29, %v1873_v12 }
 0x2c0   : > { %v1917_v21 = vmax.f32 %v1897_v11, 0.0  ;;  %v1898_v19 = vadd.f32 %v5847_v29, %v1871_v17 }
 0x2c1   : > { %v4095_v30 = vpack.c.bf16 %v1919_v2, %v1919_v2  ;;  %v1920_v13 = vmax.f32 %v1900_v7, 0.0 }
 0x2c2   : > { %v4093_v25 = vpack.c.bf16 %v1917_v21, %v1917_v21  ;;  %v1918_v18 = vmax.f32 %v1898_v19, 0.0 }
 0x2c3   : > { %v2048_v62 = vshrl.u32 %v4095_v30, 16  ;;  %v4096_v22 = vpack.c.bf16 %v1920_v13, %v1920_v13  ;;  %v2051_v27 = vshll.u32 %v4095_v30, 16 }
 0x2c4   : > { %v2031_v28 = vshrl.u32 %v4093_v25, 16  ;;  %v4094_v20 = vpack.c.bf16 %v1918_v18, %v1918_v18  ;;  %v2034_v10 = vshll.u32 %v4093_v25, 16 }
 0x2c5   : > { %v2050_v26 = vrot.slane %v2048_v62, 7  ;;  %v2056_v32 = vshrl.u32 %v4096_v22, 16  ;;  %v2059_v40 = vshll.u32 %v4096_v22, 16 }
 0x2c6   : > { %v2033_v38 = vrot.slane %v2031_v28, 7  ;;  %v2039_v33 = vshrl.u32 %v4094_v20, 16  ;;  %v2042_v46 = vshll.u32 %v4094_v20, 16 }
 0x2c7   : > { %v2053_v34 = vor.u32 %v2051_v27, %v2050_v26  ;;  %v2058_v16 = vrot.slane %v2056_v32, 7  ;;  %v2054_v35 = vrot.slane %v2050_v26, 4 }
 0x2c8   : > { %v2036_v51 = vor.u32 %v2034_v10, %v2033_v38  ;;  %v2041_v43 = vrot.slane %v2039_v33, 7  ;;  %v2037_v56 = vrot.slane %v2033_v38, 4 }
 0x2c9   : > { %v2224_v49 = vsel %vm5859_vm10, %v2053_v34, %v2223_v31  ;;  %v2061_v45 = vor.u32 %v2059_v40, %v2058_v16  ;;  %v2063_v52 = vrot.slane %v2058_v16, 4  ;;  %v2237_v31 = vld [vmem:[#allocation2 + $0x3c] sm:$0xf] }
 0x2ca   : > { %2225 = vst [vmem:[#allocation2 + $0x24] sm:$0xf] %v2224_v49  ;;  %v2217_v53 = vsel %vm5859_vm10, %v2036_v51, %v2216_v37  ;;  %v2044_v1 = vor.u32 %v2042_v46, %v2041_v43  ;;  %v2046_v47 = vrot.slane %v2041_v43, 4  ;;  %v2230_v37 = vld [vmem:[#allocation2 + $0x30] sm:$0xf] }
 0x2cb   : > { %2218 = vst [vmem:[#allocation2 + $0x18] sm:$0xf] %v2217_v53  ;;  %v2062_v59 = vsel %vm5870_vm8, %v2054_v35, %v2061_v45  ;;  %v2228_v60 = vsel %vm5865_vm9, %v2063_v52, %v2227_v41  ;;  %v2241_v41 = vld [vmem:[#allocation2 + $0x44] sm:$0x1] }
 0x2cc   : > { %2226 = vst.msk [vmem:[#allocation2 + $0x28] sm:$0xf] %vm2196_vm12, %v2062_v59  ;;  %2229 = vst [vmem:[#allocation2 + $0x2c] sm:$0x1] %v2228_v60  ;;  %v2045_v50 = vsel %vm5870_vm8, %v2037_v56, %v2044_v1  ;;  %v2221_v57 = vsel %vm5865_vm9, %v2046_v47, %v2220_v39  ;;  %v2234_v39 = vld [vmem:[#allocation2 + $0x38] sm:$0x1] }
 0x2cd   : > { %2219 = vst.msk [vmem:[#allocation2 + $0x1c] sm:$0xf] %vm2196_vm12, %v2045_v50  ;;  %2222 = vst [vmem:[#allocation2 + $0x20] sm:$0x1] %v2221_v57 }
 0x2d1   : > { %v2281_v24 = vld [vmem:[#allocation2 + $0x24] sm:$0x1] }
 0x2d2   : > { %v2282_v54 = vsel %vm5865_vm9, 0, %v2281_v24  ;;  %v2278_v63 = vld [vmem:[#allocation2 + $0x18] sm:$0x1] }
 0x2d3   : > { %2283 = vst [vmem:[#allocation2 + $0x24] sm:$0x1] %v2282_v54  ;;  %v2279_v0 = vsel %vm5865_vm9, 0, %v2278_v63  ;;  %v2312_v4 = vld [vmem:[#allocation2 + $0x2c] sm:$0x1] }
 0x2d4   : > { %2280 = vst [vmem:[#allocation2 + $0x18] sm:$0x1] %v2279_v0  ;;  %v2313_v61 = vsel %vm5890_vm11, 0, %v2312_v4  ;;  %v2309_v23 = vld [vmem:[#allocation2 + $0x20] sm:$0x1] }
 0x2d5   : > { %2314 = vst [vmem:[#allocation2 + $0x2c] sm:$0x1] %v2313_v61  ;;  %v2310_v48 = vsel %vm5890_vm11, 0, %v2309_v23 }
 0x2d6   : > { %2311 = vst [vmem:[#allocation2 + $0x20] sm:$0x1] %v2310_v48 }
 0x2da   : > { %v4150_v44 = vpop.f32.mrb[8].mxu0 }
 0x2db   : > { %v1876_v5 = vmul.f32 %v4150_v44, %v5845_v55  ;;  %v1812_v3 = vpop.f32.mrb[9].mxu0 }
 0x2dc   : > { %v1874_v8 = vmul.f32 %v5845_v55, %v1812_v3  ;;  %v4151_v58 = vpop.f32.mrb[10].mxu0 }
 0x2dd   : > { %v1903_v9 = vadd.f32 %v5847_v29, %v1876_v5  ;;  %v1877_v12 = vmul.f32 %v4151_v58, %v5845_v55  ;;  %v1815_v14 = vpop.f32.mrb[11].mxu0 }
 0x2de   : > { %v1901_v11 = vadd.f32 %v5847_v29, %v1874_v8  ;;  %v1875_v17 = vmul.f32 %v5845_v55, %v1815_v14 }
 0x2df   : > { %v1923_v2 = vmax.f32 %v1903_v9, 0.0  ;;  %v1904_v7 = vadd.f32 %v5847_v29, %v1877_v12 }
 0x2e0   : > { %v1921_v21 = vmax.f32 %v1901_v11, 0.0  ;;  %v1902_v19 = vadd.f32 %v5847_v29, %v1875_v17 }
 0x2e1   : > { %v4099_v30 = vpack.c.bf16 %v1923_v2, %v1923_v2  ;;  %v1924_v13 = vmax.f32 %v1904_v7, 0.0 }
 0x2e2   : > { %v4097_v25 = vpack.c.bf16 %v1921_v21, %v1921_v21  ;;  %v1922_v18 = vmax.f32 %v1902_v19, 0.0 }
 0x2e3   : > { %v2082_v62 = vshrl.u32 %v4099_v30, 16  ;;  %v4100_v22 = vpack.c.bf16 %v1924_v13, %v1924_v13  ;;  %v2085_v27 = vshll.u32 %v4099_v30, 16 }
 0x2e4   : > { %v2065_v28 = vshrl.u32 %v4097_v25, 16  ;;  %v4098_v20 = vpack.c.bf16 %v1922_v18, %v1922_v18  ;;  %v2068_v10 = vshll.u32 %v4097_v25, 16 }
 0x2e5   : > { %v2084_v26 = vrot.slane %v2082_v62, 7  ;;  %v2090_v32 = vshrl.u32 %v4100_v22, 16  ;;  %v2093_v40 = vshll.u32 %v4100_v22, 16 }
 0x2e6   : > { %v2067_v38 = vrot.slane %v2065_v28, 7  ;;  %v2073_v33 = vshrl.u32 %v4098_v20, 16  ;;  %v2076_v46 = vshll.u32 %v4098_v20, 16 }
 0x2e7   : > { %v2087_v34 = vor.u32 %v2085_v27, %v2084_v26  ;;  %v2092_v16 = vrot.slane %v2090_v32, 7  ;;  %v2088_v35 = vrot.slane %v2084_v26, 4 }
 0x2e8   : > { %v2070_v51 = vor.u32 %v2068_v10, %v2067_v38  ;;  %v2075_v43 = vrot.slane %v2073_v33, 7  ;;  %v2071_v56 = vrot.slane %v2067_v38, 4 }
 0x2e9   : > { %v2238_v49 = vsel %vm5859_vm10, %v2087_v34, %v2237_v31  ;;  %v2095_v45 = vor.u32 %v2093_v40, %v2092_v16  ;;  %v2097_v52 = vrot.slane %v2092_v16, 4  ;;  %v2251_v31 = vld [vmem:[#allocation2 + $0x54] sm:$0xf] }
 0x2ea   : > { %2239 = vst [vmem:[#allocation2 + $0x3c] sm:$0xf] %v2238_v49  ;;  %v2231_v53 = vsel %vm5859_vm10, %v2070_v51, %v2230_v37  ;;  %v2078_v1 = vor.u32 %v2076_v46, %v2075_v43  ;;  %v2080_v47 = vrot.slane %v2075_v43, 4  ;;  %v2244_v37 = vld [vmem:[#allocation2 + $0x48] sm:$0xf] }
 0x2eb   : > { %2232 = vst [vmem:[#allocation2 + $0x30] sm:$0xf] %v2231_v53  ;;  %v2096_v59 = vsel %vm5870_vm8, %v2088_v35, %v2095_v45  ;;  %v2242_v60 = vsel %vm5865_vm9, %v2097_v52, %v2241_v41  ;;  %v2255_v41 = vld [vmem:[#allocation2 + $0x5c] sm:$0x1] }
 0x2ec   : > { %2240 = vst.msk [vmem:[#allocation2 + $0x40] sm:$0xf] %vm2196_vm12, %v2096_v59  ;;  %2243 = vst [vmem:[#allocation2 + $0x44] sm:$0x1] %v2242_v60  ;;  %v2079_v50 = vsel %vm5870_vm8, %v2071_v56, %v2078_v1  ;;  %v2235_v57 = vsel %vm5865_vm9, %v2080_v47, %v2234_v39  ;;  %v2248_v39 = vld [vmem:[#allocation2 + $0x50] sm:$0x1] }
 0x2ed   : > { %2233 = vst.msk [vmem:[#allocation2 + $0x34] sm:$0xf] %vm2196_vm12, %v2079_v50  ;;  %2236 = vst [vmem:[#allocation2 + $0x38] sm:$0x1] %v2235_v57 }
 0x2f1   : > { %v2287_v24 = vld [vmem:[#allocation2 + $0x3c] sm:$0x1] }
 0x2f2   : > { %v2288_v54 = vsel %vm5865_vm9, 0, %v2287_v24  ;;  %v2284_v63 = vld [vmem:[#allocation2 + $0x30] sm:$0x1] }
 0x2f3   : > { %2289 = vst [vmem:[#allocation2 + $0x3c] sm:$0x1] %v2288_v54  ;;  %v2285_v0 = vsel %vm5865_vm9, 0, %v2284_v63  ;;  %v2318_v4 = vld [vmem:[#allocation2 + $0x44] sm:$0x1] }
 0x2f4   : > { %2286 = vst [vmem:[#allocation2 + $0x30] sm:$0x1] %v2285_v0  ;;  %v2319_v61 = vsel %vm5890_vm11, 0, %v2318_v4  ;;  %v2315_v23 = vld [vmem:[#allocation2 + $0x38] sm:$0x1] }
 0x2f5   : > { %2320 = vst [vmem:[#allocation2 + $0x44] sm:$0x1] %v2319_v61  ;;  %v2316_v48 = vsel %vm5890_vm11, 0, %v2315_v23 }
 0x2f6   : > { %2317 = vst [vmem:[#allocation2 + $0x38] sm:$0x1] %v2316_v48 }
 0x2fa   : > { %v4154_v44 = vpop.f32.mrb[12].mxu0 }
 0x2fb   : > { %v1880_v5 = vmul.f32 %v4154_v44, %v5845_v55  ;;  %v1828_v3 = vpop.f32.mrb[13].mxu0 }
 0x2fc   : > { %v1878_v8 = vmul.f32 %v5845_v55, %v1828_v3  ;;  %v4155_v58 = vpop.f32.mrb[14].mxu0 }
 0x2fd   : > { %v1907_v9 = vadd.f32 %v5847_v29, %v1880_v5  ;;  %v1881_v12 = vmul.f32 %v4155_v58, %v5845_v55  ;;  %v1831_v14 = vpop.f32.mrb[15].mxu0 }
 0x2fe   : > { %v1905_v11 = vadd.f32 %v5847_v29, %v1878_v8  ;;  %v1879_v17 = vmul.f32 %v5845_v55, %v1831_v14 }
 0x2ff   : > { %v1927_v2 = vmax.f32 %v1907_v9, 0.0  ;;  %v1908_v7 = vadd.f32 %v5847_v29, %v1881_v12 }
 0x300   : > { %v1925_v21 = vmax.f32 %v1905_v11, 0.0  ;;  %v1906_v19 = vadd.f32 %v5847_v29, %v1879_v17 }
 0x301   : > { %v4103_v30 = vpack.c.bf16 %v1927_v2, %v1927_v2  ;;  %v1928_v13 = vmax.f32 %v1908_v7, 0.0 }
 0x302   : > { %v4101_v25 = vpack.c.bf16 %v1925_v21, %v1925_v21  ;;  %v1926_v18 = vmax.f32 %v1906_v19, 0.0 }
 0x303   : > { %v2116_v62 = vshrl.u32 %v4103_v30, 16  ;;  %v4104_v22 = vpack.c.bf16 %v1928_v13, %v1928_v13  ;;  %v2119_v27 = vshll.u32 %v4103_v30, 16 }
 0x304   : > { %v2099_v28 = vshrl.u32 %v4101_v25, 16  ;;  %v4102_v20 = vpack.c.bf16 %v1926_v18, %v1926_v18  ;;  %v2102_v10 = vshll.u32 %v4101_v25, 16 }
 0x305   : > { %v2118_v26 = vrot.slane %v2116_v62, 7  ;;  %v2124_v32 = vshrl.u32 %v4104_v22, 16  ;;  %v2127_v40 = vshll.u32 %v4104_v22, 16 }
 0x306   : > { %v2101_v38 = vrot.slane %v2099_v28, 7  ;;  %v2107_v33 = vshrl.u32 %v4102_v20, 16  ;;  %v2110_v46 = vshll.u32 %v4102_v20, 16 }
 0x307   : > { %v2121_v34 = vor.u32 %v2119_v27, %v2118_v26  ;;  %v2126_v16 = vrot.slane %v2124_v32, 7  ;;  %v2122_v35 = vrot.slane %v2118_v26, 4 }
 0x308   : > { %v2104_v51 = vor.u32 %v2102_v10, %v2101_v38  ;;  %v2109_v43 = vrot.slane %v2107_v33, 7  ;;  %v2105_v56 = vrot.slane %v2101_v38, 4 }
 0x309   : > { %v2252_v49 = vsel %vm5859_vm10, %v2121_v34, %v2251_v31  ;;  %v2129_v45 = vor.u32 %v2127_v40, %v2126_v16  ;;  %v2131_v52 = vrot.slane %v2126_v16, 4  ;;  %v2265_v31 = vld [vmem:[#allocation2 + $0x6c] sm:$0xf]  ;;  %v2258_v34 = vld [vmem:[#allocation2 + $0x60] sm:$0xf] }
 0x30a   : > { %2253 = vst [vmem:[#allocation2 + $0x54] sm:$0xf] %v2252_v49  ;;  %v2245_v53 = vsel %vm5859_vm10, %v2104_v51, %v2244_v37  ;;  %v2112_v1 = vor.u32 %v2110_v46, %v2109_v43  ;;  %v2114_v47 = vrot.slane %v2109_v43, 4  ;;  %v2269_v40 = vld [vmem:[#allocation2 + $0x74] sm:$0x1] }
 0x30b   : > { %2246 = vst [vmem:[#allocation2 + $0x48] sm:$0xf] %v2245_v53  ;;  %v2130_v59 = vsel %vm5870_vm8, %v2122_v35, %v2129_v45  ;;  %v2256_v60 = vsel %vm5865_vm9, %v2131_v52, %v2255_v41  ;;  %v2262_v45 = vld [vmem:[#allocation2 + $0x68] sm:$0x1] }
 0x30c   : > { %2254 = vst.msk [vmem:[#allocation2 + $0x58] sm:$0xf] %vm2196_vm12, %v2130_v59  ;;  %2257 = vst [vmem:[#allocation2 + $0x5c] sm:$0x1] %v2256_v60  ;;  %v2113_v50 = vsel %vm5870_vm8, %v2105_v56, %v2112_v1  ;;  %v2249_v57 = vsel %vm5865_vm9, %v2114_v47, %v2248_v39 }
 0x30d   : > { %2247 = vst.msk [vmem:[#allocation2 + $0x4c] sm:$0xf] %vm2196_vm12, %v2113_v50  ;;  %2250 = vst [vmem:[#allocation2 + $0x50] sm:$0x1] %v2249_v57 }
 0x311   : > { %v2293_v24 = vld [vmem:[#allocation2 + $0x54] sm:$0x1] }
 0x312   : > { %v2294_v54 = vsel %vm5865_vm9, 0, %v2293_v24  ;;  %v2290_v63 = vld [vmem:[#allocation2 + $0x48] sm:$0x1] }
 0x313   : > { %2295 = vst [vmem:[#allocation2 + $0x54] sm:$0x1] %v2294_v54  ;;  %v2291_v0 = vsel %vm5865_vm9, 0, %v2290_v63  ;;  %v2324_v4 = vld [vmem:[#allocation2 + $0x5c] sm:$0x1] }
 0x314   : > { %2292 = vst [vmem:[#allocation2 + $0x48] sm:$0x1] %v2291_v0  ;;  %v2325_v61 = vsel %vm5890_vm11, 0, %v2324_v4  ;;  %v2321_v23 = vld [vmem:[#allocation2 + $0x50] sm:$0x1]  ;;  %v4883_v4 = vmov (!%p3994_p4), 0  }
 0x315   : > { %2326 = vst [vmem:[#allocation2 + $0x5c] sm:$0x1] %v2325_v61  ;;  %v2322_v48 = vsel %vm5890_vm11, 0, %v2321_v23  ;;  %2337 = vst.msk [vmem:[#allocation2] sm:$0xf] (!%p3994_p4), %vm2196_vm12, %v4883_v4 }
 0x316   : > { %2323 = vst [vmem:[#allocation2 + $0x50] sm:$0x1] %v2322_v48  ;;  %2338 = vst.msk [vmem:[#allocation2 + $0x4] sm:$0xf] (!%p3994_p4), %vm2196_vm12, %v4883_v4 }
 0x317   : > { %v4158_v44 = vpop.f32.mrb[16].mxu0  ;;  %2340 = vst.msk [vmem:[#allocation2 + $0x8] sm:$0x1] (!%p3994_p4), %vm2204_vm15, %v4883_v4 }
 0x318   : > { %v1884_v5 = vmul.f32 %v4158_v44, %v5845_v55  ;;  %v1844_v3 = vpop.f32.mrb[17].mxu0 }
 0x319   : > { %v1882_v8 = vmul.f32 %v5845_v55, %v1844_v3  ;;  %v4159_v58 = vpop.f32.mrb[18].mxu0 }
 0x31a   : > { %v1911_v9 = vadd.f32 %v5847_v29, %v1884_v5  ;;  %v1885_v12 = vmul.f32 %v4159_v58, %v5845_v55  ;;  %v1847_v14 = vpop.f32.mrb[19].mxu0 }
 0x31b   : > { %v1909_v11 = vadd.f32 %v5847_v29, %v1882_v8  ;;  %v1883_v17 = vmul.f32 %v5845_v55, %v1847_v14 }
 0x31c   : > { %v1931_v2 = vmax.f32 %v1911_v9, 0.0  ;;  %v1912_v7 = vadd.f32 %v5847_v29, %v1885_v12 }
 0x31d   : > { %v1929_v21 = vmax.f32 %v1909_v11, 0.0  ;;  %v1910_v19 = vadd.f32 %v5847_v29, %v1883_v17 }
 0x31e   : > { %v4107_v30 = vpack.c.bf16 %v1931_v2, %v1931_v2  ;;  %v1932_v13 = vmax.f32 %v1912_v7, 0.0 }
 0x31f   : > { %v4105_v25 = vpack.c.bf16 %v1929_v21, %v1929_v21  ;;  %v1930_v18 = vmax.f32 %v1910_v19, 0.0 }
 0x320   : > { %v2150_v62 = vshrl.u32 %v4107_v30, 16  ;;  %v4108_v22 = vpack.c.bf16 %v1932_v13, %v1932_v13  ;;  %v2153_v27 = vshll.u32 %v4107_v30, 16 }
 0x321   : > { %v2133_v28 = vshrl.u32 %v4105_v25, 16  ;;  %v4106_v20 = vpack.c.bf16 %v1930_v18, %v1930_v18  ;;  %v2136_v55 = vshll.u32 %v4105_v25, 16 }
 0x322   : > { %v2152_v26 = vrot.slane %v2150_v62, 7  ;;  %v2158_v32 = vshrl.u32 %v4108_v22, 16  ;;  %v2161_v16 = vshll.u32 %v4108_v22, 16 }
 0x323   : > { %v2135_v38 = vrot.slane %v2133_v28, 7  ;;  %v2141_v10 = vshrl.u32 %v4106_v20, 16  ;;  %v2144_v41 = vshll.u32 %v4106_v20, 16 }
 0x324   : > { %v2155_v33 = vor.u32 %v2153_v27, %v2152_v26  ;;  %v2160_v37 = vrot.slane %v2158_v32, 7  ;;  %v2156_v43 = vrot.slane %v2152_v26, 4 }
 0x325   : > { %v2138_v29 = vor.u32 %v2136_v55, %v2135_v38  ;;  %v2143_v51 = vrot.slane %v2141_v10, 7  ;;  %v2139_v52 = vrot.slane %v2135_v38, 4 }
 0x326   : > { %v2266_v46 = vsel %vm5859_vm10, %v2155_v33, %v2265_v31  ;;  %v2163_v35 = vor.u32 %v2161_v16, %v2160_v37  ;;  %v2165_v49 = vrot.slane %v2160_v37, 4 }
 0x327   : > { %2267 = vst [vmem:[#allocation2 + $0x6c] sm:$0xf] %v2266_v46  ;;  %v2259_v39 = vsel %vm5859_vm10, %v2138_v29, %v2258_v34  ;;  %v2146_v56 = vor.u32 %v2144_v41, %v2143_v51  ;;  %v2148_v53 = vrot.slane %v2143_v51, 4 }
 0x328   : > { %2260 = vst [vmem:[#allocation2 + $0x60] sm:$0xf] %v2259_v39  ;;  %v2164_v1 = vsel %vm5870_vm8, %v2156_v43, %v2163_v35  ;;  %v2270_v47 = vsel %vm5865_vm9, %v2165_v49, %v2269_v40 }
 0x329   : > { %2268 = vst.msk [vmem:[#allocation2 + $0x70] sm:$0xf] %vm2196_vm12, %v2164_v1  ;;  %2271 = vst [vmem:[#allocation2 + $0x74] sm:$0x1] %v2270_v47  ;;  %v2147_v59 = vsel %vm5870_vm8, %v2139_v52, %v2146_v56  ;;  %v2263_v15 = vsel %vm5865_vm9, %v2148_v53, %v2262_v45 }
 0x32a   : > { %2261 = vst.msk [vmem:[#allocation2 + $0x64] sm:$0xf] %vm2196_vm12, %v2147_v59  ;;  %2264 = vst [vmem:[#allocation2 + $0x68] sm:$0x1] %v2263_v15 }
 0x32d   : > { %2336 = sbr.rel (%p3994_p4) target bundleno = 820 (0x334), region = 88 }
 0x32e   : > { %v2299_v60 = vld [vmem:[#allocation2 + $0x6c] sm:$0x1] }
 0x32f   : > { %v2300_v50 = vsel %vm5865_vm9, 0, %v2299_v60  ;;  %v2296_v57 = vld [vmem:[#allocation2 + $0x60] sm:$0x1] }
 0x330   : > { %2301 = vst [vmem:[#allocation2 + $0x6c] sm:$0x1] %v2300_v50  ;;  %v2297_v24 = vsel %vm5865_vm9, 0, %v2296_v57  ;;  %v2330_v54 = vld [vmem:[#allocation2 + $0x74] sm:$0x1] }
 0x331   : > { %2298 = vst [vmem:[#allocation2 + $0x60] sm:$0x1] %v2297_v24  ;;  %v2331_v42 = vsel %vm5890_vm11, 0, %v2330_v54  ;;  %v2327_v63 = vld [vmem:[#allocation2 + $0x68] sm:$0x1] }
 0x332   : > { %2332 = vst [vmem:[#allocation2 + $0x74] sm:$0x1] %v2331_v42  ;;  %v2328_v0 = vsel %vm5890_vm11, 0, %v2327_v63 }
 0x333   : > { %2329 = vst [vmem:[#allocation2 + $0x68] sm:$0x1] %v2328_v0 }
 0x334 PF: > { %s6570_s5 = sld [smem:[#allocation25_spill]] }
 0x33a   : > { %p3995_p10 = scmp.ne.s32.totalorder %s6570_s5, 1 }
 0x33b   : > { %v4884_v36 = vmov (!%p3995_p10), 0  }
 0x33c   : > { %2344 = sbr.rel (%p3995_p10) target bundleno = 835 (0x343), region = 92  ;;  %2346 = vst.msk [vmem:[#allocation2 + $0x6c] sm:$0xf] (!%p3995_p10), %vm2196_vm12, %v4884_v36  ;;  %2347 = vst.msk [vmem:[#allocation2 + $0x70] sm:$0xf] (!%p3995_p10), %vm2196_vm12, %v4884_v36 }
 0x33d   : > { %2349 = vst.msk [vmem:[#allocation2 + $0x74] sm:$0x1] (!%p3995_p10), %vm2204_vm15, %v4884_v36 }
 0x343 PF: > { %v2383_v6 = vld [vmem:[#allocation2 + $0xc] sm:$0xf]  ;;  %v6034_v61 = vld [vmem:[#allocation2 + $0x10] sm:$0xf]  ;;  %v2351_v23 = vld [vmem:[#allocation2 + $0x4] sm:$0xf] }
 0x344   : > { %v4020_v48 = vcombine.low %v2383_v6, %v6034_v61  ;;  %v2374_v44 = vld [vmem:[#allocation2] sm:$0xe]  ;;  %v4441_v3 = vld [vmem:[#allocation2 + $0x8] ss:$0 sps:$4 sm:$0x11]   ;;  %v4512_v4 = vld [vmem:[#allocation12] sm:$0xff]  }
 0x345   : > { %v2350_v5 = vld [vmem:[#allocation2] sm:$0xf]  ;;  %v4012_v8 = vcombine.low %v2374_v44, %v2351_v23  ;;  %v2352_v9 = vld [vmem:[#allocation2 + $0xc] sm:$0xf]  ;;  %v2353_v12 = vld [vmem:[#allocation2 + $0x10] sm:$0xf]  ;;  %4160 = vmatprep.subr.bf16.mxu1 %v4512_v4 }
 0x346   : > { %v6037_v58 = vcombine.low %v2350_v5, %v2351_v23  ;;  %2728 = vrot.lane.b32.xlu0 %v4020_v48, %s4875_s13  ;;  %v2375_v14 = vld [vmem:[#allocation2 + $0xc] sm:$0xe]  ;;  %v2649_v17 = vrot.slane %v4441_v3, 1  ;;  %v6040_v2 = vcombine.low %v2352_v9, %v2353_v12  ;;  %v4445_v7 = vld [vmem:[#allocation2 + $0x14] ss:$0 sps:$4 sm:$0x11]   ;;  %4161 = vmatpush3.bf16.msra.mxu1 %v4512_v4 }
 0x347   : > { %v2648_v11 = vrot.slane %v4012_v8, 1  ;;  %v4013_v21 = vcombine.low %v2375_v14, %v2353_v12  ;;  %v2520_v13 = vshll.u32 %v4441_v3, 16  ;;  %v2385_v25 = vld [vmem:[#allocation2 + $0x18] sm:$0xf]  ;;  %v2652_v22 = vrot.slane %v4445_v7, 1  ;;  %s6603_s8 = sld [smem:[#allocation25_spill]] }
 0x348   : > { %v2513_v19 = vshrl.u32 %v6037_v58, 16  ;;  %v2515_v30 = vshll.u32 %v6037_v58, 16  ;;  %v2386_v28 = vld [vmem:[#allocation2 + $0x1c] sm:$0xf]  ;;  %v2525_v20 = vshrl.u32 %v6040_v2, 16  ;;  %v2527_v31 = vshll.u32 %v6040_v2, 16 }
 0x349   : > { %v2650_v18 = vsel %vm842_vm0, %v2648_v11, %v2649_v17  ;;  %v2651_v62 = vrot.slane %v4013_v21, 1  ;;  %v2522_v27 = vrot.slane %v2520_v13, 1  ;;  %v4021_v32 = vcombine.low %v2385_v25, %v2386_v28  ;;  %v4448_v10 = vld [vmem:[#allocation2 + $0x20] ss:$0 sps:$4 sm:$0x11]   ;;  %v4513_v13 = vld [vmem:[#allocation12 + $0x8] sm:$0xff]  }
 0x34a   : > { %2672 = vrot.lane.b32.xlu1 %v2650_v18, %s4877_s6  ;;  %v2517_v26 = vrot.slane %v2515_v30, 1  ;;  %v2532_v55 = vshll.u32 %v4445_v7, 16  ;;  %v2529_v34 = vrot.slane %v2527_v31, 1  ;;  %v4449_v29 = vld [vmem:[#allocation2 + $0x14] ss:$0 sps:$4 sm:$0x11]   ;;  %4162 = vmatprep.subr.bf16.mxu1 %v4513_v13 }
 0x34b   : > { %v2653_v38 = vsel %vm842_vm0, %v2651_v62, %v2652_v22  ;;  %v2781_v37 = vshrl.u32 %v4021_v32, 16  ;;  %v2783_v16 = vshll.u32 %v4021_v32, 16  ;;  %v2788_v51 = vshll.u32 %v4448_v10, 16  ;;  %v2408_v46 = vld [vmem:[#allocation2 + $0x18] sm:$0xe]  ;;  %4163 = vmatpush3.bf16.msra.mxu1 %v4513_v13  ;;  %s6604_s26 = sld [smem:[#allocation26_spill]] }
 0x34c   : > { %v2518_v33 = vor.u32 %v2517_v26, %v2513_v19  ;;  %v2534_v40 = vrot.slane %v2532_v55, 1  ;;  %v2769_v41 = vshrl.u32 %v4020_v48, 16  ;;  %v2771_v43 = vshll.u32 %v4020_v48, 16  ;;  %v2407_v39 = vld [vmem:[#allocation2 + $0xc] sm:$0xe]  ;;  %s3591_s20 = sshll.u32 %s6024_s4, 4  ;;  %s6440_s20 = int_to_ptr.vmem [resolvable:$true] %s3591_s20 }
 0x34d   : > { %v2530_v49 = vor.u32 %v2529_v34, %v2525_v20  ;;  %v2785_v45 = vrot.slane %v2783_v16, 1  ;;  %v2776_v52 = vshll.u32 %v4449_v29, 16  ;;  %v2418_v56 = vld [vmem:[#allocation2 + $0x24] sm:$0xf]  ;;  %v2790_v53 = vrot.slane %v2788_v51, 1  ;;  %s4109_s18 = sshll.u32 %s6603_s8, 4 }
 0x34e   : > { %2674 = vrot.lane.b32.xlu1 %v2653_v38, %s4877_s6  ;;  %v2523_v35 = vsel %vm671_vm1, %v2518_v33, %v2522_v27  ;;  %v2773_v1 = vrot.slane %v2771_v43, 1  ;;  %v4037_v47 = vcombine.low %v2408_v46, %v2386_v28  ;;  %v6052_v59 = vld [vmem:[#allocation2 + $0x28] sm:$0xf]  ;;  %v2416_v15 = vld [vmem:[#allocation2 + $0x18] sm:$0xf]  ;;  %v4036_v24 = vcombine.low %v2407_v39, %v6034_v61  ;;  %p6606_p8 = scmp.ne.s32.totalorder %s6544_s16, 0 }
 0x34f   : > { %2608 = vrot.lane.b32.xlu0 %v2523_v35, %s4878_s0  ;;  %v2535_v60 = vsel %vm671_vm1, %v2530_v49, %v2534_v40  ;;  %v2786_v50 = vor.u32 %v2785_v45, %v2781_v37  ;;  %v2778_v57 = vrot.slane %v2776_v52, 1  ;;  %v6056_v54 = vld [vmem:[#allocation2 + $0x1c] sm:$0xf]  ;;  %v4045_v63 = vcombine.low %v2418_v56, %v6052_v59  ;;  %v6059_v0 = vld [vmem:[#allocation2 + $0x2c] ss:$0 sps:$4 sm:$0x11]  }
 0x350   : > { %v2774_v42 = vor.u32 %v2773_v1, %v2769_v41  ;;  %v2908_v36 = vrot.slane %v4448_v10, 1  ;;  %v4044_v6 = vcombine.low %v2416_v15, %v6056_v54  ;;  %v6063_v23 = vld [vmem:[#allocation2 + $0x20] ss:$0 sps:$4 sm:$0x11]   ;;  %v2907_v61 = vrot.slane %v4037_v47, 1 }
 0x351   : > { %v2791_v48 = vsel %vm671_vm1, %v2786_v50, %v2790_v53  ;;  %v2905_v44 = vrot.slane %v4449_v29, 1  ;;  %v2354_v5 = vld [vmem:[#allocation2 + $0x18] sm:$0xf]  ;;  %v6067_v3 = vld [vmem:[#allocation2 + $0x1c] sm:$0xf]  ;;  %v2904_v9 = vrot.slane %v4036_v24, 1 }
 0x352   : > { %2730 = vrot.lane.b32.xlu1 %v4021_v32, %s4875_s13  ;;  %v2779_v8 = vsel %vm671_vm1, %v2774_v42, %v2778_v57  ;;  %v3039_v12 = vshll.u32 %v4045_v63, 16  ;;  %v3027_v14 = vshll.u32 %v4044_v6, 16  ;;  %v6071_v11 = vcombine.low %v2354_v5, %v6067_v3  ;;  %v6073_v17 = vld [vmem:[#allocation2 + $0x20] ss:$0 sps:$4 sm:$0x11]   ;;  %s4084_s2 = sshll.u32 %s6604_s26, 5 }
 0x353   : > { %2610 = vrot.lane.b32.xlu0 %v2535_v60, %s4878_s0  ;;  %v3037_v7 = vshrl.u32 %v4045_v63, 16  ;;  %v3044_v19 = vshll.u32 %v6059_v0, 16  ;;  %v2356_v30 = vld [vmem:[#allocation2 + $0x24] sm:$0xf]  ;;  %v2909_v25 = vsel %vm842_vm0, %v2907_v61, %v2908_v36  ;;  %v2357_v62 = vld [vmem:[#allocation2 + $0x28] sm:$0xf]  ;;  %v2906_v22 = vsel %vm842_vm0, %v2904_v9, %v2905_v44  ;;  %s3588_s7 = sadd.s32 %s4109_s18, %s4084_s2 }
 0x354   : > { %v3041_v21 = vrot.slane %v3039_v12, 1  ;;  %v2539_v18 = vshll.u32 %v6071_v11, 16  ;;  %v3025_v28 = vshrl.u32 %v4044_v6, 16  ;;  %v3029_v20 = vrot.slane %v3027_v14, 1  ;;  %v2440_v32 = vld [vmem:[#allocation2 + $0x18] sm:$0xe] }
 0x355   : > { %v3032_v26 = vshll.u32 %v6063_v23, 16  ;;  %v2544_v27 = vshll.u32 %v6073_v17, 16  ;;  %v6083_v31 = vcombine.low %v2356_v30, %v2357_v62  ;;  %v3046_v55 = vrot.slane %v3044_v19, 1  ;;  %v4460_v34 = vld [vmem:[#allocation2 + $0x2c] ss:$0 sps:$4 sm:$0x11]  }
 0x356   : > { %2866 = vrot.lane.b32.xlu1 %v2791_v48, %s4879_s15  ;;  %v3042_v38 = vor.u32 %v3041_v21, %v3037_v7  ;;  %v2537_v10 = vshrl.u32 %v6071_v11, 16  ;;  %v2541_v33 = vrot.slane %v2539_v18, 1  ;;  %v3030_v16 = vor.u32 %v3029_v20, %v3025_v28  ;;  %v2441_v41 = vld [vmem:[#allocation2 + $0x24] sm:$0xe]  ;;  %v2376_v39 = vld [vmem:[#allocation2 + $0x18] sm:$0xe] }
 0x357   : > { %2864 = vrot.lane.b32.xlu0 %v2779_v8, %s4879_s15  ;;  %v2551_v37 = vshll.u32 %v6083_v31, 16  ;;  %v3034_v29 = vrot.slane %v3032_v26, 1  ;;  %v4060_v40 = vcombine.low %v2440_v32, %v6056_v54  ;;  %v2546_v51 = vrot.slane %v2544_v27, 1  ;;  %v2377_v46 = vld [vmem:[#allocation2 + $0x24] sm:$0xe]  ;;  %s4085_s24 = sshll.u32 %s3588_s7, 7 }
 0x358   : > { %v3047_v43 = vsel %vm671_vm1, %v3042_v38, %v3046_v55  ;;  %v2542_v35 = vor.u32 %v2541_v33, %v2537_v10  ;;  %v2549_v49 = vshrl.u32 %v6083_v31, 16  ;;  %v2556_v52 = vshll.u32 %v4460_v34, 16  ;;  %v2389_v15 = vld [vmem:[#allocation2 + $0x30] sm:$0xf]  ;;  %v2390_v60 = vld [vmem:[#allocation2 + $0x34] sm:$0xf] }
 0x359   : > { %v2553_v45 = vrot.slane %v2551_v37, 1  ;;  %v3035_v56 = vsel %vm671_vm1, %v3030_v16, %v3034_v29  ;;  %v3160_v53 = vrot.slane %v4060_v40, 1  ;;  %v3161_v1 = vrot.slane %v6063_v23, 1  ;;  %v2387_v50 = vld [vmem:[#allocation2 + $0x24] sm:$0xf] }
 0x35a   : > { %2930 = vrot.lane.b32.xlu1 %v2909_v25, %s4876_s22  ;;  %v4061_v47 = vcombine.low %v2441_v41, %v6052_v59  ;;  %v6097_v57 = vld [vmem:[#allocation2 + $0x28] sm:$0xf]  ;;  %v4015_v24 = vcombine.low %v2377_v46, %v2357_v62  ;;  %v4014_v54 = vcombine.low %v2376_v39, %v6067_v3  ;;  %v2547_v42 = vsel %vm671_vm1, %v2542_v35, %v2546_v51  ;;  %v4466_v9 = vld [vmem:[#allocation2 + $0x38] ss:$0 sps:$4 sm:$0x11]  }
 0x35b   : > { %2928 = vrot.lane.b32.xlu0 %v2906_v22, %s4876_s22  ;;  %v2558_v4 = vrot.slane %v2556_v52, 1  ;;  %v4023_v36 = vcombine.low %v2389_v15, %v2390_v60  ;;  %v3164_v23 = vrot.slane %v6059_v0, 1  ;;  %v4022_v48 = vcombine.low %v2387_v50, %v6097_v57  ;;  %v4467_v7 = vld [vmem:[#allocation2 + $0x2c] ss:$0 sps:$4 sm:$0x11]  }
 0x35c   : > { %v3163_v59 = vrot.slane %v4061_v47, 1  ;;  %v2658_v61 = vrot.slane %v4460_v34, 1  ;;  %v2655_v44 = vrot.slane %v6073_v17, 1  ;;  %v2657_v3 = vrot.slane %v4015_v24, 1  ;;  %v2410_v19 = vld [vmem:[#allocation2 + $0x30] sm:$0xe] }
 0x35d   : > { %v2654_v8 = vrot.slane %v4014_v54, 1  ;;  %v2807_v12 = vshll.u32 %v4023_v36, 16  ;;  %v2795_v21 = vshll.u32 %v4022_v48, 16  ;;  %v2805_v0 = vshrl.u32 %v4023_v36, 16  ;;  %v2422_v25 = vld [vmem:[#allocation2 + $0x3c] sm:$0xf] }
 0x35e   : > { %2986 = vrot.lane.b32.xlu1 %v4045_v63, %s4880_s17  ;;  %v2554_v63 = vor.u32 %v2553_v45, %v2549_v49  ;;  %v3165_v14 = vsel %vm842_vm0, %v3163_v59, %v3164_v23  ;;  %v2659_v17 = vsel %vm842_vm0, %v2657_v3, %v2658_v61  ;;  %v2812_v13 = vshll.u32 %v4466_v9, 16  ;;  %v6114_v18 = vld [vmem:[#allocation2 + $0x40] sm:$0xf]  ;;  %v2409_v26 = vld [vmem:[#allocation2 + $0x24] sm:$0xe] }
 0x35f   : > { %2984 = vrot.lane.b32.xlu0 %v4044_v6, %s4880_s17  ;;  %v3162_v6 = vsel %vm842_vm0, %v3160_v53, %v3161_v1  ;;  %v2809_v30 = vrot.slane %v2807_v12, 1  ;;  %v2656_v62 = vsel %vm842_vm0, %v2654_v8, %v2655_v44  ;;  %v2793_v22 = vshrl.u32 %v4022_v48, 16  ;;  %v2420_v27 = vld [vmem:[#allocation2 + $0x30] sm:$0xf]  ;;  %v2421_v32 = vld [vmem:[#allocation2 + $0x34] sm:$0xf] }
 0x360   : > { %v2559_v5 = vsel %vm671_vm1, %v2554_v63, %v2558_v4  ;;  %v2797_v28 = vrot.slane %v2795_v21, 1  ;;  %v2800_v20 = vshll.u32 %v4467_v7, 16  ;;  %v4047_v38 = vcombine.low %v2422_v25, %v6114_v18  ;;  %v2358_v40 = vld [vmem:[#allocation2 + $0x30] sm:$0xf]  ;;  %v6121_v51 = vld [vmem:[#allocation2 + $0x34] sm:$0xf] }
 0x361   : > { %v2810_v55 = vor.u32 %v2809_v30, %v2805_v0  ;;  %v2814_v10 = vrot.slane %v2812_v13, 1  ;;  %v4039_v33 = vcombine.low %v2410_v19, %v2390_v60  ;;  %v4038_v16 = vcombine.low %v2409_v26, %v6097_v57  ;;  %v4473_v52 = vld [vmem:[#allocation2 + $0x38] ss:$0 sps:$4 sm:$0x11]   ;;  %v2360_v47 = vld [vmem:[#allocation2 + $0x3c] sm:$0xf] }
 0x362   : > { %3122 = vrot.lane.b32.xlu1 %v3047_v43, %s4881_s14  ;;  %v2798_v34 = vor.u32 %v2797_v28, %v2793_v22  ;;  %v2802_v37 = vrot.slane %v2800_v20, 1  ;;  %v4046_v29 = vcombine.low %v2420_v27, %v2421_v32  ;;  %v2914_v41 = vrot.slane %v4466_v9, 1  ;;  %v6124_v43 = vld [vmem:[#allocation2 + $0x44] ss:$0 sps:$4 sm:$0x11]  }
 0x363   : > { %3120 = vrot.lane.b32.xlu0 %v3035_v56, %s4881_s14  ;;  %v3063_v46 = vshll.u32 %v4047_v38, 16  ;;  %v2815_v35 = vsel %vm671_vm1, %v2810_v55, %v2814_v10  ;;  %v2913_v49 = vrot.slane %v4039_v33, 1  ;;  %v2911_v45 = vrot.slane %v4467_v7, 1  ;;  %v6132_v15 = vld [vmem:[#allocation2 + $0x40] sm:$0xf] }
 0x364   : > { %v6129_v39 = vcombine.low %v2358_v40, %v6121_v51  ;;  %v2803_v56 = vsel %vm671_vm1, %v2798_v34, %v2802_v37  ;;  %v2910_v53 = vrot.slane %v4038_v16, 1  ;;  %v3051_v1 = vshll.u32 %v4046_v29, 16  ;;  %v6136_v24 = vld [vmem:[#allocation2 + $0x38] ss:$0 sps:$4 sm:$0x11]  }
 0x365   : > { %v3061_v60 = vshrl.u32 %v4047_v38, 16  ;;  %v3065_v50 = vrot.slane %v3063_v46, 1  ;;  %v3068_v57 = vshll.u32 %v6124_v43, 16  ;;  %v2915_v54 = vsel %vm842_vm0, %v2913_v49, %v2914_v41  ;;  %v2442_v63 = vld [vmem:[#allocation2 + $0x30] sm:$0xe] }
 0x366   : > { %2612 = vrot.lane.b32.xlu1 %v2547_v42, %s4878_s0  ;;  %v2563_v42 = vshll.u32 %v6129_v39, 16  ;;  %v6142_v4 = vcombine.low %v2360_v47, %v6132_v15  ;;  %v3053_v59 = vrot.slane %v3051_v1, 1  ;;  %v3056_v23 = vshll.u32 %v4473_v52, 16  ;;  %v4478_v9 = vld [vmem:[#allocation2 + $0x44] ss:$0 sps:$4 sm:$0x11]  }
 0x367   : > { %3184 = vrot.lane.b32.xlu0 %v3162_v6, %s4882_s9  ;;  %v3049_v6 = vshrl.u32 %v4046_v29, 16  ;;  %v3070_v61 = vrot.slane %v3068_v57, 1  ;;  %v2568_v44 = vshll.u32 %v6136_v24, 16  ;;  %v2561_v3 = vshrl.u32 %v6129_v39, 16  ;;  %v2443_v21 = vld [vmem:[#allocation2 + $0x3c] sm:$0xe] }
 0x368   : > { %v2565_v8 = vrot.slane %v2563_v42, 1  ;;  %v2575_v12 = vshll.u32 %v6142_v4, 16  ;;  %v3058_v7 = vrot.slane %v3056_v23, 1  ;;  %v3167_v30 = vrot.slane %v4473_v52, 1  ;;  %v2379_v28 = vld [vmem:[#allocation2 + $0x3c] sm:$0xe] }
 0x369   : > { %v2570_v19 = vrot.slane %v2568_v44, 1  ;;  %v2573_v25 = vshrl.u32 %v6142_v4, 16  ;;  %v2580_v22 = vshll.u32 %v4478_v9, 16  ;;  %v4063_v26 = vcombine.low %v2443_v21, %v6114_v18  ;;  %v2393_v27 = vld [vmem:[#allocation2 + $0x48] sm:$0xf] }
 0x36a   : > { %2614 = vrot.lane.b32.xlu1 %v2559_v5, %s4878_s0  ;;  %v4062_v5 = vcombine.low %v2442_v63, %v2421_v32  ;;  %v2566_v13 = vor.u32 %v2565_v8, %v2561_v3  ;;  %v6156_v32 = vld [vmem:[#allocation2 + $0x4c] sm:$0xf]  ;;  %v2391_v55 = vld [vmem:[#allocation2 + $0x3c] sm:$0xf]  ;;  %v6158_v10 = vld [vmem:[#allocation2 + $0x40] sm:$0xf]  ;;  %v4017_v34 = vcombine.low %v2379_v28, %v6132_v15 }
 0x36b   : > { %3186 = vrot.lane.b32.xlu0 %v3165_v14, %s4882_s9  ;;  %v3054_v14 = vor.u32 %v3053_v59, %v3049_v6  ;;  %v3170_v33 = vrot.slane %v6124_v43, 1  ;;  %v4025_v18 = vcombine.low %v2393_v27, %v6156_v32  ;;  %v3169_v41 = vrot.slane %v4063_v26, 1  ;;  %v6170_v43 = vld [vmem:[#allocation2 + $0x50] ss:$0 sps:$4 sm:$0x11]  }
 0x36c   : > { %v2571_v37 = vsel %vm671_vm1, %v2566_v13, %v2570_v19  ;;  %v2664_v52 = vrot.slane %v4478_v9, 1  ;;  %v2412_v57 = vld [vmem:[#allocation2 + $0x48] sm:$0xe]  ;;  %v6183_v6 = vld [vmem:[#allocation2 + $0x58] sm:$0xf]  ;;  %vm6574_vm8 = vcmask 293888  }
 0x36d   : > { %v3059_v20 = vsel %vm671_vm1, %v3054_v14, %v3058_v7  ;;  %v3171_v1 = vsel %vm842_vm0, %v3169_v41, %v3170_v33  ;;  %v6186_v44 = vld [vmem:[#allocation2 + $0x4c] sm:$0xf]  ;;  %v4514_v26 = vld [vmem:[#allocation12 + $0x10] ss:$0 sps:$4 sm:$0x33]   ;;  %vm6578_vm13 = vmmov %vm6574_vm8 }
 0x36e   : > { %2678 = vrot.lane.b32.xlu1 %v2659_v17, %s4877_s6  ;;  %v3166_v17 = vrot.slane %v4062_v5, 1  ;;  %v6194_v19 = vld [vmem:[#allocation2 + $0x4c] sm:$0xf]  ;;  %4183 = vmatprep.subr.msk.bf16.mxu1 %vm1742_vm2, %v4514_v26  ;;  %v3365_v33 = vsel %vm1742_vm2, %v4514_v26, 0  ;;  %vm6573_vm2 = vcmask 261120  }
 0x36f   : > { %2676 = vrot.lane.b32.xlu0 %v2656_v62, %s4877_s6  ;;  %v2577_v62 = vrot.slane %v2575_v12, 1  ;;  %v4041_v12 = vcombine.low %v2412_v57, %v6156_v32  ;;  %4165 = vmatpush3.bf16.msra.mxu1 %v3365_v33  ;;  %vm6577_vm12 = vmmov %vm6573_vm2 }
 0x370   : > { %v3168_v40 = vsel %vm842_vm0, %v3166_v17, %v3167_v30  ;;  %v2920_v17 = vrot.slane %v6170_v43, 1  ;;  %v6197_v30 = vld [vmem:[#allocation2 + $0x5c] ss:$0 sps:$4 sm:$0x11]   ;;  %vm6581_vm11 = vmmov %vm6573_vm2 }
 0x371   : > { %v2578_v16 = vor.u32 %v2577_v62, %v2573_v25  ;;  %v6201_v62 = vld [vmem:[#allocation2 + $0x50] ss:$0 sps:$4 sm:$0x11]   ;;  %v2919_v28 = vrot.slane %v4041_v12, 1  ;;  %v2380_v12 = vld [vmem:[#allocation2 + $0x48] sm:$0xe] }
 0x372   : > { %2734 = vrot.lane.b32.xlu1 %v4023_v36, %s4875_s13  ;;  %v2912_v36 = vsel %vm842_vm0, %v2910_v53, %v2911_v45  ;;  %v2663_v45 = vrot.slane %v4017_v34, 1  ;;  %v6174_v53 = vld [vmem:[#allocation2 + $0x44] ss:$0 sps:$4 sm:$0x11]  }
 0x373   : > { %2732 = vrot.lane.b32.xlu0 %v4022_v48, %s4875_s13  ;;  %v3066_v48 = vor.u32 %v3065_v50, %v3061_v60  ;;  %v2829_v60 = vshrl.u32 %v4025_v18, 16  ;;  %v2836_v50 = vshll.u32 %v6170_v43, 16  ;;  %v2824_v63 = vshll.u32 %v6174_v53, 16 }
 0x374   : > { %v2917_v13 = vrot.slane %v6174_v53, 1 }
 0x375   : > { %v3071_v0 = vsel %vm671_vm1, %v3066_v48, %v3070_v61  ;;  %v2411_v48 = vld [vmem:[#allocation2 + $0x3c] sm:$0xe]  ;;  %v2424_v61 = vld [vmem:[#allocation2 + $0x48] sm:$0xf]  ;;  %v2838_v8 = vrot.slane %v2836_v50, 1  ;;  %v2826_v9 = vrot.slane %v2824_v63, 1 }
 0x376   : > { %2870 = vrot.lane.b32.xlu1 %v2815_v35, %s4879_s15  ;;  %v4024_v35 = vcombine.low %v2391_v55, %v6158_v10  ;;  %v4040_v7 = vcombine.low %v2411_v48, %v6158_v10  ;;  %v4048_v21 = vcombine.low %v2424_v61, %v6186_v44  ;;  %v2364_v55 = vld [vmem:[#allocation2 + $0x54] sm:$0xf]  ;;  %v2365_v10 = vld [vmem:[#allocation2 + $0x58] sm:$0xf] }
 0x377   : > { %2868 = vrot.lane.b32.xlu0 %v2803_v56, %s4879_s15  ;;  %v2831_v56 = vshll.u32 %v4025_v18, 16  ;;  %v6218_v41 = vcombine.low %v2364_v55, %v2365_v10  ;;  %v2381_v48 = vld [vmem:[#allocation2 + $0x54] sm:$0xe] }
 0x378   : > { %v2819_v15 = vshll.u32 %v4024_v35, 16  ;;  %v2916_v32 = vrot.slane %v4040_v7, 1  ;;  %v2396_v7 = vld [vmem:[#allocation2 + $0x58] sm:$0xf] }
 0x379   : > { %v2833_v42 = vrot.slane %v2831_v56, 1 }
 0x37a   : > { %2934 = vrot.lane.b32.xlu1 %v2915_v54, %s4876_s22  ;;  %v2665_v54 = vsel %vm842_vm0, %v2663_v45, %v2664_v52  ;;  %v2821_v23 = vrot.slane %v2819_v15, 1  ;;  %v2444_v45 = vld [vmem:[#allocation2 + $0x48] sm:$0xe]  ;;  %v2599_v15 = vshll.u32 %v6218_v41, 16 }
 0x37b   : > { %2932 = vrot.lane.b32.xlu0 %v2912_v36, %s4876_s22  ;;  %v2426_v36 = vld [vmem:[#allocation2 + $0x54] sm:$0xf]  ;;  %v2834_v3 = vor.u32 %v2833_v42, %v2829_v60  ;;  %v4064_v57 = vcombine.low %v2444_v45, %v6186_v44 }
 0x37c   : > { %v4049_v5 = vcombine.low %v2426_v36, %v6183_v6 }
 0x37e   : > { %2990 = vrot.lane.b32.xlu1 %v4047_v38, %s4880_s17  ;;  %v2378_v38 = vld [vmem:[#allocation2 + $0x30] sm:$0xe]  ;;  %v3087_v25 = vshll.u32 %v4049_v5, 16  ;;  %v3085_v34 = vshrl.u32 %v4049_v5, 16 }
 0x37f   : > { %2988 = vrot.lane.b32.xlu0 %v4046_v29, %s4880_s17  ;;  %v2582_v29 = vrot.slane %v2580_v22, 1  ;;  %v4016_v46 = vcombine.low %v2378_v38, %v6121_v51  ;;  %v2661_v51 = vrot.slane %v6136_v24, 1  ;;  %v2817_v24 = vshrl.u32 %v4024_v35, 16 }
 0x380   : > { %v2839_v22 = vsel %vm671_vm1, %v2834_v3, %v2838_v8  ;;  %v3075_v38 = vshll.u32 %v4048_v21, 16  ;;  %v3172_v3 = vrot.slane %v4064_v57, 1  ;;  %v3173_v8 = vrot.slane %v6201_v62, 1 }
 0x381   : > { %v2583_v49 = vsel %vm671_vm1, %v2578_v16, %v2582_v29  ;;  %v2660_v47 = vrot.slane %v4016_v46, 1  ;;  %v2822_v14 = vor.u32 %v2821_v23, %v2817_v24  ;;  %v3092_v16 = vshll.u32 %v6197_v30, 16  ;;  %v6213_v29 = vld [vmem:[#allocation2 + $0x50] ss:$0 sps:$4 sm:$0x11]  }
 0x382   : > { %3126 = vrot.lane.b32.xlu1 %v3071_v0, %s4881_s14  ;;  %v2362_v0 = vld [vmem:[#allocation2 + $0x48] sm:$0xf]  ;;  %v2918_v46 = vsel %vm842_vm0, %v2916_v32, %v2917_v13  ;;  %v3077_v43 = vrot.slane %v3075_v38, 1  ;;  %v2592_v53 = vshll.u32 %v6213_v29, 16  ;;  %v2601_v24 = vrot.slane %v2599_v15, 1 }
 0x383   : > { %3124 = vrot.lane.b32.xlu0 %v3059_v20, %s4881_s14  ;;  %v2662_v59 = vsel %vm842_vm0, %v2660_v47, %v2661_v51  ;;  %v6206_v20 = vcombine.low %v2362_v0, %v6194_v19  ;;  %v2827_v27 = vsel %vm671_vm1, %v2822_v14, %v2826_v9  ;;  %v3094_v56 = vrot.slane %v3092_v16, 1  ;;  %v4496_v51 = vld [vmem:[#allocation2 + $0x5c] ss:$0 sps:$4 sm:$0x11]   ;;  %v2397_v9 = vld [vmem:[#allocation2 + $0x60] sm:$0xf] }
 0x384   : > { %v2594_v63 = vrot.slane %v2592_v53, 1  ;;  %v2604_v23 = vshll.u32 %v4496_v51, 16  ;;  %v2395_v14 = vld [vmem:[#allocation2 + $0x54] sm:$0xf]  ;;  %v4019_v0 = vcombine.low %v2381_v48, %v2365_v10  ;;  %v2670_v32 = vrot.slane %v4496_v51, 1 }
 0x385   : > { %v4026_v26 = vcombine.low %v2395_v14, %v2396_v7  ;;  %v4502_v38 = vld [vmem:[#allocation2 + $0x68] ss:$0 sps:$4 sm:$0x11]   ;;  %v2431_v53 = vld [vmem:[#allocation2 + $0x70] sm:$0xf] }
 0x386   : > { %2616 = vrot.lane.b32.xlu1 %v2571_v37, %s4878_s0  ;;  %v3089_v37 = vrot.slane %v3087_v25, 1  ;;  %v2606_v25 = vrot.slane %v2604_v23, 1  ;;  %v4508_v23 = vld [vmem:[#allocation2 + $0x74] ss:$0 sps:$4 sm:$0x11]  }
 0x387   : > { %3188 = vrot.lane.b32.xlu0 %v3168_v40, %s4882_s9  ;;  %v2587_v40 = vshll.u32 %v6206_v20, 16  ;;  %v2843_v16 = vshll.u32 %v4026_v26, 16 }
 0x388   : > { %v3090_v52 = vor.u32 %v3089_v37, %v3085_v34  ;;  %v2667_v34 = vrot.slane %v6213_v29, 1  ;;  %v4503_v37 = vld [vmem:[#allocation2 + $0x5c] ss:$0 sps:$4 sm:$0x11]   ;;  %v2413_v29 = vld [vmem:[#allocation2 + $0x54] sm:$0xe] }
 0x389   : > { %v2589_v47 = vrot.slane %v2587_v40, 1  ;;  %v2845_v45 = vrot.slane %v2843_v16, 1 }
 0x38a   : > { %2618 = vrot.lane.b32.xlu1 %v2583_v49, %s4878_s0  ;;  %v3080_v49 = vshll.u32 %v6201_v62, 16  ;;  %v3095_v42 = vsel %vm671_vm1, %v3090_v52, %v3094_v56  ;;  %v3174_v62 = vsel %vm842_vm0, %v3172_v3, %v3173_v8  ;;  %v2848_v52 = vshll.u32 %v4503_v37, 16  ;;  %v2430_v56 = vld [vmem:[#allocation2 + $0x6c] sm:$0xf] }
 0x38b   : > { %3190 = vrot.lane.b32.xlu0 %v3171_v1, %s4882_s9  ;;  %v2585_v1 = vshrl.u32 %v6206_v20, 16  ;;  %v2923_v8 = vrot.slane %v4503_v37, 1 }
 0x38c   : > { %v3082_v50 = vrot.slane %v3080_v49, 1 }
 0x38d   : > { %v2590_v36 = vor.u32 %v2589_v47, %v2585_v1  ;;  %v2428_v1 = vld [vmem:[#allocation2 + $0x60] sm:$0xf]  ;;  %v2429_v47 = vld [vmem:[#allocation2 + $0x64] sm:$0xf] }
 0x38e   : > { %2682 = vrot.lane.b32.xlu1 %v2665_v54, %s4877_s6  ;;  %v2445_v54 = vld [vmem:[#allocation2 + $0x54] sm:$0xe] }
 0x38f   : > { %2680 = vrot.lane.b32.xlu0 %v2662_v59, %s4877_s6  ;;  %v2597_v59 = vshrl.u32 %v6218_v41, 16  ;;  %v4065_v44 = vcombine.low %v2445_v54, %v6183_v6  ;;  %v2850_v54 = vrot.slane %v2848_v52, 1 }
 0x391   : > { %v2602_v13 = vor.u32 %v2601_v24, %v2597_v59  ;;  %v3175_v6 = vrot.slane %v4065_v44, 1  ;;  %v2926_v24 = vrot.slane %v4502_v38, 1  ;;  %v4509_v44 = vld [vmem:[#allocation2 + $0x68] ss:$0 sps:$4 sm:$0x11]  }
 0x392   : > { %2738 = vrot.lane.b32.xlu1 %v4025_v18, %s4875_s13  ;;  %v2921_v18 = vsel %vm842_vm0, %v2919_v28, %v2920_v17  ;;  %v2595_v17 = vsel %vm671_vm1, %v2590_v36, %v2594_v63  ;;  %v4018_v28 = vcombine.low %v2380_v12, %v6194_v19  ;;  %v4050_v63 = vcombine.low %v2428_v1, %v2429_v47 }
 0x393   : > { %2736 = vrot.lane.b32.xlu0 %v4024_v35, %s4875_s13  ;;  %v3073_v35 = vshrl.u32 %v4048_v21, 16 }
 0x394   : > { %v2666_v33 = vrot.slane %v4018_v28, 1 }
 0x395   : > { %v3078_v60 = vor.u32 %v3077_v43, %v3073_v35  ;;  %v2841_v35 = vshrl.u32 %v4026_v26, 16  ;;  %v2414_v43 = vld [vmem:[#allocation2 + $0x60] sm:$0xe] }
 0x396   : > { %2874 = vrot.lane.b32.xlu1 %v2839_v22, %s4879_s15  ;;  %v2668_v49 = vsel %vm842_vm0, %v2666_v33, %v2667_v34  ;;  %v3182_v33 = vrot.slane %v4508_v23, 1 }
 0x397   : > { %2872 = vrot.lane.b32.xlu0 %v2827_v27, %s4879_s15  ;;  %v3083_v61 = vsel %vm671_vm1, %v3078_v60, %v3082_v50  ;;  %v2669_v27 = vrot.slane %v4019_v0, 1  ;;  %v4051_v50 = vcombine.low %v2430_v56, %v2431_v53  ;;  %v2846_v57 = vor.u32 %v2845_v45, %v2841_v35 }
 0x398   : > { %v3097_v0 = vshrl.u32 %v4050_v63, 16 }
 0x399   : > { %v2671_v19 = vsel %vm842_vm0, %v2669_v27, %v2670_v32  ;;  %v3111_v48 = vshll.u32 %v4051_v50, 16  ;;  %v3109_v12 = vshrl.u32 %v4051_v50, 16 }
 0x39a   : > { %2938 = vrot.lane.b32.xlu1 %v2921_v18, %s4876_s22 }
 0x39b   : > { %2936 = vrot.lane.b32.xlu0 %v2918_v46, %s4876_s22  ;;  %v2860_v46 = vshll.u32 %v4502_v38, 16  ;;  %v3113_v14 = vrot.slane %v3111_v48, 1 }
 0x39d   : > { %v2862_v15 = vrot.slane %v2860_v46, 1 }
 0x39e   : > { %2994 = vrot.lane.b32.xlu1 %v4049_v5, %s4880_s17  ;;  %v2398_v5 = vld [vmem:[#allocation2 + $0x64] sm:$0xf] }
 0x39f   : > { %2992 = vrot.lane.b32.xlu0 %v4048_v21, %s4880_s17  ;;  %v3176_v21 = vrot.slane %v6197_v30, 1  ;;  %v4027_v22 = vcombine.low %v2397_v9, %v2398_v5  ;;  %v2607_v30 = vsel %vm671_vm1, %v2602_v13, %v2606_v25  ;;  %v4043_v60 = vcombine.low %v2414_v43, %v2398_v5  ;;  %v2447_v25 = vld [vmem:[#allocation2 + $0x6c] sm:$0xe] }
 0x3a0   : > { %v3099_v9 = vshll.u32 %v4050_v63, 16  ;;  %v3104_v13 = vshll.u32 %v4509_v44, 16 }
 0x3a1   : > { %v2855_v55 = vshll.u32 %v4027_v22, 16  ;;  %v3177_v10 = vsel %vm842_vm0, %v3175_v6, %v3176_v21  ;;  %v2853_v18 = vshrl.u32 %v4027_v22, 16  ;;  %v2925_v59 = vrot.slane %v4043_v60, 1 }
 0x3a2   : > { %3130 = vrot.lane.b32.xlu1 %v3095_v42, %s4881_s14  ;;  %v4042_v42 = vcombine.low %v2413_v29, %v2396_v7  ;;  %v3116_v7 = vshll.u32 %v4508_v23, 16  ;;  %v3114_v6 = vor.u32 %v3113_v14, %v3109_v12 }
 0x3a3   : > { %3128 = vrot.lane.b32.xlu0 %v3083_v61, %s4881_s14  ;;  %v2857_v40 = vrot.slane %v2855_v55, 1  ;;  %v2851_v61 = vsel %vm671_vm1, %v2846_v57, %v2850_v54  ;;  %v2927_v5 = vsel %vm842_vm0, %v2925_v59, %v2926_v24 }
 0x3a4   : > { %v2922_v3 = vrot.slane %v4042_v42, 1  ;;  %v3118_v28 = vrot.slane %v3116_v7, 1 }
 0x3a5   : > { %v2858_v51 = vor.u32 %v2857_v40, %v2853_v18 }
 0x3a6   : > { %2620 = vrot.lane.b32.xlu1 %v2595_v17, %s4878_s0  ;;  %v2924_v21 = vsel %vm842_vm0, %v2922_v3, %v2923_v8  ;;  %v3101_v17 = vrot.slane %v3099_v9, 1  ;;  %v3119_v55 = vsel %vm671_vm1, %v3114_v6, %v3118_v28 }
 0x3a7   : > { %3192 = vrot.lane.b32.xlu0 %v3174_v62, %s4882_s9  ;;  %v2863_v36 = vsel %vm671_vm1, %v2858_v51, %v2862_v15 }
 0x3a8   : > { %v3102_v32 = vor.u32 %v3101_v17, %v3097_v0 }
 0x3aa   : > { %2622 = vrot.lane.b32.xlu1 %v2607_v30, %s4878_s0  ;;  %v3106_v30 = vrot.slane %v3104_v13, 1  ;;  %s6605_s0 = sld [smem:[#allocation36_spill]] }
 0x3ab   : > { %3194 = vrot.lane.b32.xlu0 %v3177_v10, %s4882_s9 }
 0x3ac   : > { %v3107_v37 = vsel %vm671_vm1, %v3102_v32, %v3106_v30  ;;  %vm6572_vm1 = vcmask 228352  }
 0x3ad   : > { %vm6576_vm10 = vmmov %vm6572_vm1 }
 0x3ae   : > { %2686 = vrot.lane.b32.xlu1 %v2671_v19, %s4877_s6  ;;  %v3179_v19 = vrot.slane %v4509_v44, 1  ;;  %vm6580_vm15 = vmmov %vm6572_vm1 }
 0x3af   : > { %2684 = vrot.lane.b32.xlu0 %v2668_v49, %s4877_s6 }
 0x3b2   : > { %2742 = vrot.lane.b32.xlu1 %v4027_v22, %s4875_s13  ;;  %v2446_v22 = vld [vmem:[#allocation2 + $0x60] sm:$0xe] }
 0x3b3   : > { %2740 = vrot.lane.b32.xlu0 %v4026_v26, %s4875_s13  ;;  %v4067_v26 = vcombine.low %v2447_v25, %v2431_v53  ;;  %v4066_v38 = vcombine.low %v2446_v22, %v2429_v47 }
 0x3b5   : > { %v3181_v10 = vrot.slane %v4067_v26, 1  ;;  %v3178_v16 = vrot.slane %v4066_v38, 1 }
 0x3b6   : > { %2878 = vrot.lane.b32.xlu1 %v2863_v36, %s4879_s15 }
 0x3b7   : > { %2876 = vrot.lane.b32.xlu0 %v2851_v61, %s4879_s15  ;;  %v3183_v40 = vsel %vm842_vm0, %v3181_v10, %v3182_v33  ;;  %v3180_v35 = vsel %vm842_vm0, %v3178_v16, %v3179_v19  ;;  %vm6571_vm0 = vcmask 195584   ;;  %s6436_s15 = scalar_lea.hbm %s6605_s0, %s4085_s24 }
 0x3b8   : > { %v2729_v62 = vpop.permute.xlu0 %2728  ;;  %vm6575_vm9 = vmmov %vm6571_vm0 }
 0x3b9   : > { %vm6579_vm14 = vmmov %vm6571_vm0 }
 0x3ba   : > { %2942 = vrot.lane.b32.xlu1 %v2927_v5, %s4876_s22 }
 0x3bb   : > { %2940 = vrot.lane.b32.xlu0 %v2924_v21, %s4876_s22 }
 0x3bc   : > { %v2673_v27 = vpop.permute.xlu1 %2672 }
 0x3be   : > { %2998 = vrot.lane.b32.xlu1 %v4051_v50, %s4880_s17 }
 0x3bf   : > { %2996 = vrot.lane.b32.xlu0 %v4050_v63, %s4880_s17  ;;  %s4743_s17 = scalar_lea.vmem %s6440_s20, 2048 }
 0x3c0   : > { %v2675_v34 = vpop.permute.xlu1 %2674  ;;  %p4744_p6 = scmp.ne.s32.totalorder %s6440_s20, %s4743_s17 }
 0x3c1   : > { %v2609_v18 = vpop.permute.xlu0 %2608 }
 0x3c2   : > { %3134 = vrot.lane.b32.xlu1 %v3119_v55, %s4881_s14  ;;  %v3201_v53 = vsel %vm1533_vm3, %v6037_v58, %v2609_v18  ;;  %p4745_p9 = pnand %p4744_p6, %p6606_p8 }
 0x3c3   : > { %3132 = vrot.lane.b32.xlu0 %v3107_v37, %s4881_s14  ;;  %v3217_v51 = vsel %vm1554_vm4, %v3201_v53, %v2673_v27  ;;  %s4885_s14 = smov [#allocation17]  }
 0x3c4   : > { %v2731_v46 = vpop.permute.xlu1 %2730  ;;  %v3233_v50 = vsel %vm1575_vm5, %v3217_v51, %v2729_v62  ;;  %p4746_p3 = pneg %p4745_p9 }
 0x3c5   : > { %v2611_v43 = vpop.permute.xlu0 %2610 }
 0x3c6   : > { %3198 = vrot.lane.b32.xlu1 %v3183_v40, %s4882_s9  ;;  %v3203_v1 = vsel %vm1533_vm3, %v6040_v2, %v2611_v43 }
 0x3c7   : > { %3196 = vrot.lane.b32.xlu0 %v3180_v35, %s4882_s9  ;;  %v3219_v15 = vsel %vm1554_vm4, %v3203_v1, %v2675_v34  ;;  %s4747_s9 = sshll.u32 %s4885_s14, 4  ;;  %s4748_s9 = int_to_ptr.vmem [resolvable:$false] %s4747_s9 }
 0x3c8   : > { %v2867_v49 = vpop.permute.xlu1 %2866  ;;  %v3235_v42 = vsel %vm1575_vm5, %v3219_v15, %v2731_v46  ;;  %s4749_s3 = scalar_lea.vmem %s4748_s9, 4096  ;;  %p4750_p7 = scmp.lt.s32.totalorder %s6440_s20, %s4748_s9 }
 0x3c9   : > { %v2865_v45 = vpop.permute.xlu0 %2864  ;;  %v3251_v24 = vsel %vm1596_vm6, %v3235_v42, %v2867_v49  ;;  %p4751_p5 = scmp.lt.s32.totalorder %s4749_s3, %s4743_s17 }
 0x3ca   : > { %v3249_v54 = vsel %vm1596_vm6, %v3233_v50, %v2865_v45 }
 0x3cb   : > { %p4752_p1 = por %p4751_p5, %p4750_p7 }
 0x3cc   : > { %v2931_v52 = vpop.permute.xlu1 %2930 }
 0x3cd   : > { %v2929_v56 = vpop.permute.xlu0 %2928  ;;  %v3267_v48 = vsel %vm1617_vm7, %v3251_v24, %v2931_v52  ;;  %p4753_p11 = pnand %p4752_p1, %p4746_p3 }
 0x3ce   : > { %v3265_v63 = vsel %vm1617_vm7, %v3249_v54, %v2929_v56 }
 0x3d0   : > { %v2987_v29 = vpop.permute.xlu1 %2986 }
 0x3d1   : > { %v2985_v47 = vpop.permute.xlu0 %2984  ;;  %v3283_v61 = vsel %vm6575_vm9, %v3267_v48, %v2987_v29 }
 0x3d2   : > { %v3281_v58 = vsel %vm6571_vm0, %v3265_v63, %v2985_v47  ;;  %vm6582_vm0 = vmmov %vm6574_vm8 }
 0x3d4   : > { %v3123_v60 = vpop.permute.xlu1 %3122 }
 0x3d5   : > { %v3121_v57 = vpop.permute.xlu0 %3120  ;;  %v3299_v8 = vsel %vm6576_vm10, %v3283_v61, %v3123_v60 }
 0x3d6   : > { %v3297_v2 = vsel %vm6572_vm1, %v3281_v58, %v3121_v57  ;;  %vm6583_vm1 = vmmov %vm6575_vm9 }
 0x3d7   : > { %vm6586_vm9 = vmmov %vm6582_vm0 }
 0x3d8   : > { %v2613_v36 = vpop.permute.xlu1 %2612 }
 0x3d9   : > { %v3185_v59 = vpop.permute.xlu0 %3184  ;;  %v3205_v62 = vsel %vm1533_vm3, %v6071_v11, %v2613_v36 }
 0x3da   : > { %v3313_v23 = vsel %vm6573_vm2, %v3297_v2, %v3185_v59  ;;  %vm6584_vm2 = vmmov %vm6576_vm10 }
 0x3db   : > { %4166 = vmatprep.mubr.msk.bf16.mxu1 %vm6574_vm8, %v3313_v23  ;;  %vm6585_vm8 = vmmov %vm6581_vm11 }
 0x3dc   : > { %v2615_v3 = vpop.permute.xlu1 %2614  ;;  %vm6587_vm10 = vmmov %vm6583_vm1 }
 0x3dd   : > { %v3187_v44 = vpop.permute.xlu0 %3186  ;;  %v3207_v30 = vsel %vm1533_vm3, %v6083_v31, %v2615_v3 }
 0x3de   : > { %v3315_v9 = vsel %vm6577_vm12, %v3299_v8, %v3187_v44  ;;  %vm6588_vm12 = vmmov %vm6584_vm2 }
 0x3df   : > { %4167 = vmatmul.mubr.msk.bf16.vlgmr.msra.gmra.mrb[0].mxu1 %vm6578_vm13, %v3315_v9  ;;  %vm6589_vm13 = vmmov %vm6585_vm8 }
 0x3e0   : > { %v2679_v5 = vpop.permute.xlu1 %2678 }
 0x3e1   : > { %v2677_v12 = vpop.permute.xlu0 %2676  ;;  %v3223_v55 = vsel %vm1554_vm4, %v3207_v30, %v2679_v5 }
 0x3e2   : > { %v3221_v6 = vsel %vm1554_vm4, %v3205_v62, %v2677_v12 }
 0x3e4   : > { %v2735_v14 = vpop.permute.xlu1 %2734 }
 0x3e5   : > { %v2733_v7 = vpop.permute.xlu0 %2732  ;;  %v3239_v11 = vsel %vm1575_vm5, %v3223_v55, %v2735_v14 }
 0x3e6   : > { %v3237_v26 = vsel %vm1575_vm5, %v3221_v6, %v2733_v7 }
 0x3e8   : > { %v2871_v21 = vpop.permute.xlu1 %2870 }
 0x3e9   : > { %v2869_v0 = vpop.permute.xlu0 %2868  ;;  %v3255_v16 = vsel %vm1596_vm6, %v3239_v11, %v2871_v21 }
 0x3ea   : > { %v3253_v32 = vsel %vm1596_vm6, %v3237_v26, %v2869_v0 }
 0x3ec   : > { %v2935_v17 = vpop.permute.xlu1 %2934 }
 0x3ed   : > { %v2933_v13 = vpop.permute.xlu0 %2932  ;;  %v3271_v18 = vsel %vm1617_vm7, %v3255_v16, %v2935_v17 }
 0x3ee   : > { %v3269_v38 = vsel %vm1617_vm7, %v3253_v32, %v2933_v13 }
 0x3f0   : > { %v2991_v25 = vpop.permute.xlu1 %2990 }
 0x3f1   : > { %v2989_v22 = vpop.permute.xlu0 %2988  ;;  %v3287_v31 = vsel %vm6583_vm1, %v3271_v18, %v2991_v25 }
 0x3f2   : > { %v3285_v10 = vsel %vm6579_vm14, %v3269_v38, %v2989_v22  ;;  %vm6590_vm14 = vmmov %vm6582_vm0 }
 0x3f4   : > { %v3127_v28 = vpop.permute.xlu1 %3126 }
 0x3f5   : > { %v3125_v27 = vpop.permute.xlu0 %3124  ;;  %v3303_v46 = vsel %vm6584_vm2, %v3287_v31, %v3127_v28 }
 0x3f6   : > { %v3301_v34 = vsel %vm6580_vm15, %v3285_v10, %v3125_v27  ;;  %vm6591_vm15 = vmmov %vm6583_vm1 }
 0x3f7   : > { %vm6594_vm1 = vmmov %vm6586_vm9 }
 0x3f8   : > { %v2617_v33 = vpop.permute.xlu1 %2616 }
 0x3f9   : > { %v3189_v37 = vpop.permute.xlu0 %3188  ;;  %v3209_v60 = vsel %vm1533_vm3, %v6129_v39, %v2617_v33 }
 0x3fa   : > { %v3317_v19 = vsel %vm6581_vm11, %v3301_v34, %v3189_v37  ;;  %vm6592_vm11 = vmmov %vm6584_vm2 }
 0x3fb   : > { %4170 = vmatprep.mubr.msk.bf16.mxu1 %vm6582_vm0, %v3317_v19  ;;  %vm6593_vm0 = vmmov %vm6585_vm8 }
 0x3fc   : > { %v2619_v40 = vpop.permute.xlu1 %2618  ;;  %vm6595_vm2 = vmmov %vm6587_vm10 }
 0x3fd   : > { %v3191_v35 = vpop.permute.xlu0 %3190  ;;  %v3211_v58 = vsel %vm1533_vm3, %v6142_v4, %v2619_v40 }
 0x3fe   : > { %v3319_v43 = vsel %vm6585_vm8, %v3303_v46, %v3191_v35  ;;  %vm6596_vm8 = vmmov %vm6595_vm2  ;;  %v6352_v35 = vld [vmem:[#allocation14] ss:$0 sm:$0xff] }
 0x3ff   : > { %4171 = vmatmul.mubr.msk.bf16.gmra.mrb[4].mxu1 %vm6586_vm9, %v3319_v43 }
 0x400   : > { %v2683_v49 = vpop.permute.xlu1 %2682 }
 0x401   : > { %v2681_v45 = vpop.permute.xlu0 %2680  ;;  %v3227_v2 = vsel %vm1554_vm4, %v3211_v58, %v2683_v49  ;;  %v6354_v49 = vld [vmem:[#allocation15] ss:$0 sm:$0xff] }
 0x402   : > { %v3225_v50 = vsel %vm1554_vm4, %v3209_v60, %v2681_v45 }
 0x404   : > { %v2739_v52 = vpop.permute.xlu1 %2738 }
 0x405   : > { %v2737_v56 = vpop.permute.xlu0 %2736  ;;  %v3243_v39 = vsel %vm1575_vm5, %v3227_v2, %v2739_v52 }
 0x406   : > { %v3241_v54 = vsel %vm1575_vm5, %v3225_v50, %v2737_v56  ;;  %v3512_v56 = vld [vmem:[%s5275_s19 + $0x10] sm:$0xff]  ;;  %v3513_v50 = vld [vmem:[%s5275_s19 + $0x18] sm:$0xff] }
 0x408   : > { %v2875_v53 = vpop.permute.xlu1 %2874 }
 0x409   : > { %v2873_v29 = vpop.permute.xlu0 %2872  ;;  %v3259_v61 = vsel %vm1596_vm6, %v3243_v39, %v2875_v53 }
 0x40a   : > { %v3257_v63 = vsel %vm1596_vm6, %v3241_v54, %v2873_v29 }
 0x40c   : > { %v2939_v1 = vpop.permute.xlu1 %2938 }
 0x40d   : > { %v2937_v47 = vpop.permute.xlu0 %2936  ;;  %v3275_v8 = vsel %vm1617_vm7, %v3259_v61, %v2939_v1 }
 0x40e   : > { %v3273_v36 = vsel %vm1617_vm7, %v3257_v63, %v2937_v47  ;;  %v3510_v47 = vld [vmem:[%s5275_s19] sm:$0xff]  ;;  %v3511_v63 = vld [vmem:[%s5275_s19 + $0x8] sm:$0xff] }
 0x410   : > { %v2995_v51 = vpop.permute.xlu1 %2994 }
 0x411   : > { %v2993_v15 = vpop.permute.xlu0 %2992  ;;  %v3291_v4 = vsel %vm6591_vm15, %v3275_v8, %v2995_v51 }
 0x412   : > { %v3289_v59 = vsel %vm6587_vm10, %v3273_v36, %v2993_v15  ;;  %vm6600_vm10 = vmmov %vm6593_vm0 }
 0x414   : > { %v3131_v57 = vpop.permute.xlu1 %3130 }
 0x415   : > { %v3129_v42 = vpop.permute.xlu0 %3128  ;;  %v3307_v9 = vsel %vm6592_vm11, %v3291_v4, %v3131_v57  ;;  %v3516_v4 = vld [vmem:[%s5275_s19 + $0x30] sm:$0xff] }
 0x416   : > { %v3305_v23 = vsel %vm6588_vm12, %v3289_v59, %v3129_v42 }
 0x418   : > { %v2621_v24 = vpop.permute.xlu1 %2620 }
 0x419   : > { %v3193_v48 = vpop.permute.xlu0 %3192  ;;  %v3213_v26 = vsel %vm1533_vm3, %v6206_v20, %v2621_v24 }
 0x41a   : > { %v3321_v3 = vsel %vm6589_vm13, %v3305_v23, %v3193_v48 }
 0x41b   : > { %4174 = vmatprep.mubr.msk.bf16.mxu1 %vm6590_vm14, %v3321_v3 }
 0x41c   : > { %v2623_v44 = vpop.permute.xlu1 %2622 }
 0x41d   : > { %v3195_v5 = vpop.permute.xlu0 %3194  ;;  %v3215_v28 = vsel %vm1533_vm3, %v6218_v41, %v2623_v44 }
 0x41e   : > { %v3323_v12 = vsel %vm6593_vm0, %v3307_v9, %v3195_v5 }
 0x41f   : > { %4175 = vmatmul.mubr.msk.bf16.gmra.mrb[8].mxu1 %vm6594_vm1, %v3323_v12  ;;  %v3514_v12 = vld [vmem:[%s5275_s19 + $0x20] sm:$0xff] }
 0x420   : > { %v2687_v14 = vpop.permute.xlu1 %2686 }
 0x421   : > { %v2685_v7 = vpop.permute.xlu0 %2684  ;;  %v3231_v27 = vsel %vm1554_vm4, %v3215_v28, %v2687_v14 }
 0x422   : > { %v3229_v32 = vsel %vm1554_vm4, %v3213_v26, %v2685_v7  ;;  %vm6597_vm4 = vmmov %vm6592_vm11 }
 0x423   : > { %vm6598_vm9 = vmmov %vm6597_vm4 }
 0x424   : > { %v2743_v21 = vpop.permute.xlu1 %2742 }
 0x425   : > { %v2741_v0 = vpop.permute.xlu0 %2740  ;;  %v3247_v30 = vsel %vm1575_vm5, %v3231_v27, %v2743_v21 }
 0x426   : > { %v3245_v55 = vsel %vm1575_vm5, %v3229_v32, %v2741_v0  ;;  %vm6599_vm5 = vmmov %vm6593_vm0  ;;  %v3517_v0 = vld [vmem:[%s5275_s19 + $0x38] sm:$0xff] }
 0x428   : > { %v2879_v17 = vpop.permute.xlu1 %2878 }
 0x429   : > { %v2877_v13 = vpop.permute.xlu0 %2876  ;;  %v3263_v10 = vsel %vm1596_vm6, %v3247_v30, %v2879_v17 }
 0x42a   : > { %v3261_v11 = vsel %vm1596_vm6, %v3245_v55, %v2877_v13  ;;  %vm6601_vm6 = vmmov %vm6594_vm1 }
 0x42c   : > { %v2943_v25 = vpop.permute.xlu1 %2942 }
 0x42d   : > { %v2941_v22 = vpop.permute.xlu0 %2940  ;;  %v3279_v34 = vsel %vm1617_vm7, %v3263_v10, %v2943_v25 }
 0x42e   : > { %v3277_v41 = vsel %vm1617_vm7, %v3261_v11, %v2941_v22  ;;  %vm6602_vm7 = vmmov %vm6594_vm1  ;;  %v3515_v22 = vld [vmem:[%s5275_s19 + $0x28] sm:$0xff]  ;;  %v3520_v11 = vld [vmem:[%s5275_s19 + $0x50] sm:$0xff] }
 0x430   : > { %v2999_v62 = vpop.permute.xlu1 %2998 }
 0x431   : > { %v2997_v6 = vpop.permute.xlu0 %2996  ;;  %v3295_v20 = vsel %vm6595_vm2, %v3279_v34, %v2999_v62 }
 0x432   : > { %v3293_v37 = vsel %vm6596_vm8, %v3277_v41, %v2997_v6 }
 0x434   : > { %v3135_v38 = vpop.permute.xlu1 %3134 }
 0x435   : > { %v3133_v33 = vpop.permute.xlu0 %3132  ;;  %v3311_v16 = vsel %vm6597_vm4, %v3295_v20, %v3135_v38 }
 0x436   : > { %v3309_v18 = vsel %vm6598_vm9, %v3293_v37, %v3133_v33  ;;  %v3518_v37 = vld [vmem:[%s5275_s19 + $0x40] sm:$0xff] }
 0x438   : > { %v3199_v19 = vpop.permute.xlu1 %3198 }
 0x439   : > { %v3327_v31 = vsel %vm6599_vm5, %v3311_v16, %v3199_v19  ;;  %v3197_v40 = vpop.permute.xlu0 %3196 }
 0x43a   : > { %v3325_v46 = vsel %vm6600_vm10, %v3309_v18, %v3197_v40 }
 0x43b   : > { %4178 = vmatprep.mubr.msk.bf16.mxu1 %vm6601_vm6, %v3325_v46 }
 0x43c   : > { %4179 = vmatmul.mubr.msk.bf16.gmra.mrb[12].mxu1 %vm6602_vm7, %v3327_v31  ;;  %v3521_v31 = vld [vmem:[%s5275_s19 + $0x58] sm:$0xff] }
 0x4b2   : > { %v4168_v43 = vpop.f32.mrb[0].mxu1 }
 0x4b3   : > { %v3473_v45 = vmul.f32 %v4168_v43, %v6352_v35  ;;  %v3401_v52 = vpop.f32.mrb[1].mxu1 }
 0x4b4   : > { %v3471_v53 = vmul.f32 %v6352_v35, %v3401_v52  ;;  %v4169_v29 = vpop.f32.mrb[2].mxu1 }
 0x4b5   : > { %v3496_v1 = vadd.f32 %v6354_v49, %v3473_v45  ;;  %v3474_v51 = vmul.f32 %v4169_v29, %v6352_v35  ;;  %v3404_v15 = vpop.f32.mrb[3].mxu1  ;;  %v3519_v45 = vld [vmem:[%s5275_s19 + $0x48] sm:$0xff] }
 0x4b6   : > { %v3494_v60 = vadd.f32 %v6354_v49, %v3471_v53  ;;  %v3472_v57 = vmul.f32 %v6352_v35, %v3404_v15 }
 0x4b7   : > { %v3528_v54 = vadd.f32 %v3512_v56, %v3496_v1  ;;  %v3497_v42 = vadd.f32 %v6354_v49, %v3474_v51 }
 0x4b8   : > { %v3526_v58 = vadd.f32 %v3510_v47, %v3494_v60  ;;  %v3495_v36 = vadd.f32 %v6354_v49, %v3472_v57 }
 0x4b9   : > { %v3544_v2 = vmax.f32 %v3528_v54, 0.0  ;;  %v3529_v59 = vadd.f32 %v3513_v50, %v3497_v42  ;;  %v3524_v54 = vld [vmem:[%s5275_s19 + $0x70] sm:$0xff] }
 0x4ba   : > { %v3542_v24 = vmax.f32 %v3526_v58, 0.0  ;;  %v3527_v39 = vadd.f32 %v3511_v63, %v3495_v36  ;;  %v3522_v36 = vld [vmem:[%s5275_s19 + $0x60] sm:$0xff] }
 0x4bb   : > { %3560 = vst.msk [vmem:[%s6024_s4 + $0x10] sm:$0xff] %vm1533_vm3, %v3544_v2  ;;  %v3545_v23 = vmax.f32 %v3529_v59, 0.0 }
 0x4bc   : > { %3558 = vst.msk [vmem:[%s6024_s4] sm:$0xff] %vm1533_vm3, %v3542_v24  ;;  %v3543_v48 = vmax.f32 %v3527_v39, 0.0  ;;  %v3525_v39 = vld [vmem:[%s5275_s19 + $0x78] sm:$0xff] }
 0x4bd   : > { %3561 = vst.msk [vmem:[%s6024_s4 + $0x18] sm:$0xff] %vm1533_vm3, %v3545_v23 }
 0x4be   : > { %3559 = vst.msk [vmem:[%s6024_s4 + $0x8] sm:$0xff] %vm1533_vm3, %v3543_v48 }
 0x4d2   : > { %v4172_v61 = vpop.f32.mrb[4].mxu1 }
 0x4d3   : > { %v3477_v3 = vmul.f32 %v4172_v61, %v6352_v35  ;;  %v3417_v8 = vpop.f32.mrb[5].mxu1 }
 0x4d4   : > { %v3475_v44 = vmul.f32 %v6352_v35, %v3417_v8  ;;  %v4173_v9 = vpop.f32.mrb[6].mxu1 }
 0x4d5   : > { %v3500_v5 = vadd.f32 %v6354_v49, %v3477_v3  ;;  %v3478_v14 = vmul.f32 %v4173_v9, %v6352_v35  ;;  %v3420_v7 = vpop.f32.mrb[7].mxu1  ;;  %v3523_v3 = vld [vmem:[%s5275_s19 + $0x68] sm:$0xff]  ;;  %s3575_s19 = scalar_lea.sflag [#allocation5], %s5261_s23 }
 0x4d6   : > { %v3498_v21 = vadd.f32 %v6354_v49, %v3475_v44  ;;  %v3476_v17 = vmul.f32 %v6352_v35, %v3420_v7 }
 0x4d7   : > { %v3532_v13 = vadd.f32 %v3516_v4, %v3500_v5  ;;  %v3501_v25 = vadd.f32 %v6354_v49, %v3478_v14 }
 0x4d8   : > { %v3530_v62 = vadd.f32 %v3514_v12, %v3498_v21  ;;  %v3499_v6 = vadd.f32 %v6354_v49, %v3476_v17 }
 0x4d9   : > { %v3548_v28 = vmax.f32 %v3532_v13, 0.0  ;;  %v3533_v26 = vadd.f32 %v3517_v0, %v3501_v25 }
 0x4da   : > { %v3546_v27 = vmax.f32 %v3530_v62, 0.0  ;;  %v3531_v32 = vadd.f32 %v3515_v22, %v3499_v6 }
 0x4db   : > { %3564 = vst.msk [vmem:[%s6024_s4 + $0x30] sm:$0xff] %vm1533_vm3, %v3548_v28  ;;  %v3549_v30 = vmax.f32 %v3533_v26, 0.0 }
 0x4dc   : > { %3562 = vst.msk [vmem:[%s6024_s4 + $0x20] sm:$0xff] %vm1533_vm3, %v3546_v27  ;;  %v3547_v38 = vmax.f32 %v3531_v32, 0.0 }
 0x4dd   : > { %3565 = vst.msk [vmem:[%s6024_s4 + $0x38] sm:$0xff] %vm1533_vm3, %v3549_v30 }
 0x4de   : > { %3563 = vst.msk [vmem:[%s6024_s4 + $0x28] sm:$0xff] %vm1533_vm3, %v3547_v38 }
 0x4f2   : > { %v4176_v55 = vpop.f32.mrb[8].mxu1 }
 0x4f3   : > { %v3481_v10 = vmul.f32 %v4176_v55, %v6352_v35  ;;  %v3433_v33 = vpop.f32.mrb[9].mxu1 }
 0x4f4   : > { %v3479_v34 = vmul.f32 %v6352_v35, %v3433_v33  ;;  %v4177_v41 = vpop.f32.mrb[10].mxu1 }
 0x4f5   : > { %v3504_v20 = vadd.f32 %v6354_v49, %v3481_v10  ;;  %v3482_v16 = vmul.f32 %v4177_v41, %v6352_v35  ;;  %v3436_v19 = vpop.f32.mrb[11].mxu1 }
 0x4f6   : > { %v3502_v18 = vadd.f32 %v6354_v49, %v3479_v34  ;;  %v3480_v40 = vmul.f32 %v6352_v35, %v3436_v19 }
 0x4f7   : > { %v3536_v46 = vadd.f32 %v3520_v11, %v3504_v20  ;;  %v3505_v43 = vadd.f32 %v6354_v49, %v3482_v16 }
 0x4f8   : > { %v3534_v52 = vadd.f32 %v3518_v37, %v3502_v18  ;;  %v3503_v56 = vadd.f32 %v6354_v49, %v3480_v40 }
 0x4f9   : > { %v3552_v53 = vmax.f32 %v3536_v46, 0.0  ;;  %v3537_v29 = vadd.f32 %v3521_v31, %v3505_v43 }
 0x4fa   : > { %v3550_v1 = vmax.f32 %v3534_v52, 0.0  ;;  %v3535_v47 = vadd.f32 %v3519_v45, %v3503_v56 }
 0x4fb   : > { %3568 = vst.msk [vmem:[%s6024_s4 + $0x50] sm:$0xff] %vm1533_vm3, %v3552_v53  ;;  %v3553_v51 = vmax.f32 %v3537_v29, 0.0 }
 0x4fc   : > { %3566 = vst.msk [vmem:[%s6024_s4 + $0x40] sm:$0xff] %vm1533_vm3, %v3550_v1  ;;  %v3551_v15 = vmax.f32 %v3535_v47, 0.0 }
 0x4fd   : > { %3569 = vst.msk [vmem:[%s6024_s4 + $0x58] sm:$0xff] %vm1533_vm3, %v3553_v51 }
 0x4fe   : > { %3567 = vst.msk [vmem:[%s6024_s4 + $0x48] sm:$0xff] %vm1533_vm3, %v3551_v15 }
 0x50f   : > { %v4180_v60 = vpop.f32.mrb[12].mxu1 }
 0x510   : > { %v3485_v50 = vmul.f32 %v4180_v60, %v6352_v35  ;;  %v3449_v57 = vpop.f32.mrb[13].mxu1 }
 0x511   : > { %v3483_v42 = vmul.f32 %v6352_v35, %v3449_v57  ;;  %v4181_v63 = vpop.f32.mrb[14].mxu1 }
 0x512   : > { %v3508_v58 = vadd.f32 %v6354_v49, %v3485_v50  ;;  %v3486_v2 = vmul.f32 %v4181_v63, %v6352_v35  ;;  %v3452_v59 = vpop.f32.mrb[15].mxu1 }
 0x513   : > { %v3506_v24 = vadd.f32 %v6354_v49, %v3483_v42  ;;  %v3484_v23 = vmul.f32 %v6352_v35, %v3452_v59 }
 0x514   : > { %v3540_v48 = vadd.f32 %v3524_v54, %v3508_v58  ;;  %v3509_v61 = vadd.f32 %v6354_v49, %v3486_v2 }
 0x515   : > { %v3538_v8 = vadd.f32 %v3522_v36, %v3506_v24  ;;  %v3507_v4 = vadd.f32 %v6354_v49, %v3484_v23 }
 0x516   : > { %v3556_v44 = vmax.f32 %v3540_v48, 0.0  ;;  %v3541_v9 = vadd.f32 %v3525_v39, %v3509_v61 }
 0x517   : > { %v3554_v5 = vmax.f32 %v3538_v8, 0.0  ;;  %v3539_v12 = vadd.f32 %v3523_v3, %v3507_v4 }
 0x518   : > { %3572 = vst.msk [vmem:[%s6024_s4 + $0x70] sm:$0xff] %vm1533_vm3, %v3556_v44  ;;  %v3557_v35 = vmax.f32 %v3541_v9, 0.0 }
 0x519   : > { %3570 = vst.msk [vmem:[%s6024_s4 + $0x60] sm:$0xff] %vm1533_vm3, %v3554_v5  ;;  %v3555_v14 = vmax.f32 %v3539_v12, 0.0 }
 0x51a   : > { %3573 = vst.msk [vmem:[%s6024_s4 + $0x78] sm:$0xff] %vm1533_vm3, %v3557_v35 }
 0x51b   : > { %3571 = vst.msk [vmem:[%s6024_s4 + $0x68] sm:$0xff] %vm1533_vm3, %v3555_v14 }
 0x51c   : > { %4756 = shalt.err (!%p4753_p11)
}
 0x51d   : > { %s4757_s4 = scalar_lea.hbm %s6436_s15, 2048  ;;  %s4761_s26 = scalar_lea.hbm %s6605_s0, 8192 }
 0x51e   : > { %p4758_p12 = scmp.ne.s32.totalorder %s6436_s15, %s4757_s4  ;;  %p4762_p0 = scmp.lt.u32.totalorder %s6436_s15, %s6605_s0 }
 0x51f   : > { %p4763_p4 = scmp.lt.u32.totalorder %s4761_s26, %s4757_s4  ;;  %p4765_p6 = scmp.lt.u32.totalorder %s4757_s4, %s6436_s15 }
 0x520   : > { %p4759_p13 = pnand %p4758_p12, %p6606_p8 }
 0x521   : > { %p4764_p10 = por %p4763_p4, %p4762_p0 }
 0x522   : > { %p4760_p2 = pneg %p4759_p13 }
 0x523   : > { %p4766_p9 = por %p4765_p6, %p4764_p10 }
 0x525   : > { %p4767_p3 = pnand %p4766_p9, %p4760_p2 }
 0x527   : > { %4770 = shalt.err (!%p4767_p3)
}
 0x528   : > { %s4886_s7 = smov 128  }
 0x529   : > { %4216 = dma.vmem_to_hbm [thread:$0]  (%p6606_p8), %s6440_s20, 2048, %s6436_s15, %s3575_s19, %s4886_s7, %s4886_s7, %s4877_s6  }
 0x52a PF: > { %p4261_p7 = scmp.ge.s32.totalorder %s4861_s12, 2  ;;  %s3606_s24 = sand.u32 1, %s4833_s27  }
 0x52b   : > { %p6607_p5 = scmp.ne.s32.totalorder %s6545_s21, 0  ;;  %s3607_s13 = scalar_lea.sflag [#allocation5], %s3606_s24 }
 0x52d   : > { %p4245_p1 = pnand %p4261_p7, %p6607_p5 }
 0x52f   : > { %4828 = dma.done.wait (!%p4245_p1), %s3607_s13, 2048  }
 0x530   : > { %4830 = vsyncadd (!%p4245_p1), %s3607_s13, 4294965248  ;;  %s30_s12 = sadd.s32 1, %s4861_s12   ;;  %s6608_s16 = sld [smem:[#allocation28_spill]] }
 0x531   : > { %p27_p11 = scmp.ge.s32.totalorder %s30_s12, 6   ;;  %s6609_s27 = smov %s4837_s28 }
 0x532   : > { %s6610_s28 = smov %s4841_s29  ;;  %s6611_s29 = smov %s5171_s30 }
 0x533   : > { %s6612_s30 = smov %s4853_s10  ;;  %s6613_s9 = smov %s4857_s11 }
 0x534   : > { %s6614_s10 = smov %s6617_s25  ;;  %29 = sbr.rel (!%p27_p11) target bundleno = 21 (0x15), region = 147 }
 0x536   : > { %s6615_s11 = smov %s6608_s16 }
 0x53b   :  { %3612 = vsyncpa [#allocation4], 1 }
 0x53c   :  { %3614 = vsyncpa [#allocation4 + $0x1], 1 }
 0x53d   :  { %3615 = vsyncpa [#allocation7], 1 }
 0x53e   :  { %3617 = vsyncpa [#allocation7 + $0x1], 1 }
 0x53f   :  { %3618 = vsyncpa [#allocation10], 1 }
 0x540   :  { %3619 = vsyncpa [#allocation13], 1 }
 0x541   :  { %3620 = vsyncpa [#allocation16], 1 }
 0x542   :  { %3621 = vsyncpa [#allocation5], 1 }
 0x543   :  { %3623 = vsyncpa [#allocation5 + $0x1], 1 }

</bundles_post_ra>
